<compile_context>
chip_gen: v7x
topology: tpu7x:2x2x1
jax: 0.10.0
libtpu: 0.0.40
codegen_flags: <defaults>
</compile_context>

<pallas_src>
import functools

import jax
import jax.numpy as jnp
from jax import lax
from jax.experimental import pallas as pl
from jax.experimental.pallas import tpu as pltpu

LANE = 128


def _round_up(x, m):
    return (x + m - 1) // m * m


# ---------------------------------------------------------------------------
# Pallas kernels
# ---------------------------------------------------------------------------
def _conv3x3_relu_kernel(x_ref, w_ref, b_ref, m_ref, o_ref, *, H, W):
    """Fused im2col + GEMM + bias + ReLU for one image (one grid step).

    x_ref : (Mp, Cin)      zero-padded image, flattened row-major over the
                           padded (H+2, W+2) grid, plus 2 tail zero rows so
                           every tap slice is in-bounds.
    w_ref : (9, Cin, Cpad) per-tap weight slabs, Cout zero-padded to Cpad.
    b_ref : (1, Cpad)      bias (zero-padded).
    m_ref : (Mr, 1)        column-validity mask (zeroes the 2 wrap columns).
    o_ref : (Mr, Cpad)     Mr = H*(W+2) candidate output rows.
    """
    Wp = W + 2
    Mr = H * Wp
    acc = None
    for kh in range(3):
        for kw in range(3):
            s = kh * Wp + kw                       # static shift per tap
            slab = x_ref[s:s + Mr, :]              # (Mr, Cin) shifted view
            # NOTE(v6e/v7x): cast `slab` and w_ref[...] to bf16 here (keep the
            # f32 accumulator via preferred_element_type) for full MXU rate.
            tap = jnp.dot(slab, w_ref[kh * 3 + kw],
                          preferred_element_type=jnp.float32)
            acc = tap if acc is None else acc + tap
    acc = jnp.maximum(acc + b_ref[...], 0.0)       # bias + ReLU, f32 epilogue
    acc = acc * m_ref[...]                         # zero wrap-around columns
    o_ref[...] = acc.astype(o_ref.dtype)


def _l1_sum_kernel(g_ref, t_ref, o_ref):
    """Accumulate sum(|g - t|) over one (tm, C) tile into an SMEM scalar."""
    first = jnp.logical_and(pl.program_id(0) == 0, pl.program_id(1) == 0)

    @pl.when(first)
    def _():
        o_ref[0, 0] = jnp.float32(0.0)

    d = jnp.abs(g_ref[...].astype(jnp.float32) - t_ref[...].astype(jnp.float32))
    o_ref[0, 0] += jnp.sum(d)


# ---------------------------------------------------------------------------
# Wrappers around pallas_call
# ---------------------------------------------------------------------------
def _conv3x3_relu(x_flat, w9, bias, mask, H, W):
    """x_flat: (B, Mp, Cin) f32 -> (B, H*(W+2), Cpad) f32 feature map."""
    B, Mp, Cin = x_flat.shape
    Cpad = w9.shape[-1]
    Wp = W + 2
    Mr = H * Wp
    kernel = functools.partial(_conv3x3_relu_kernel, H=H, W=W)
    flops = 2 * B * Mr * 9 * Cin * Cpad
    bytes_accessed = 4 * (x_flat.size + w9.size + bias.size + mask.size
                          + B * Mr * Cpad)
    return pl.pallas_call(
        kernel,
        out_shape=jax.ShapeDtypeStruct((B, Mr, Cpad), jnp.float32),
        grid=(B,),
        in_specs=[
            pl.BlockSpec((None, Mp, Cin), lambda b: (b, 0, 0)),
            pl.BlockSpec((9, Cin, Cpad), lambda b: (0, 0, 0)),   # resident
            pl.BlockSpec((1, Cpad), lambda b: (0, 0)),           # resident
            pl.BlockSpec((Mr, 1), lambda b: (0, 0)),             # resident
        ],
        out_specs=pl.BlockSpec((None, Mr, Cpad), lambda b: (b, 0, 0)),
        compiler_params=pltpu.CompilerParams(
            dimension_semantics=("parallel",),
            vmem_limit_bytes=32 * 1024 * 1024),
        cost_estimate=pl.CostEstimate(flops=int(flops), transcendentals=0,
                                      bytes_accessed=int(bytes_accessed)),
    )(x_flat, w9, bias, mask)


def _pick_row_tile(mr, cap=1024):
    if mr <= cap:
        return mr                      # full-extent block is always legal
    best = mr
    for d in range(8, cap + 1, 8):
        if mr % d == 0:
            best = d
    return best


def _l1_mean(feat, n_pairs, true_count):
    """feat: (2*n_pairs, Mr, C); rows [0,n) = generated, [n,2n) = target."""
    _, Mr, C = feat.shape
    tm = _pick_row_tile(Mr)
    mt = Mr // tm
    total = pl.pallas_call(
        _l1_sum_kernel,
        out_shape=jax.ShapeDtypeStruct((1, 1), jnp.float32),
        grid=(n_pairs, mt),
        in_specs=[
            pl.BlockSpec((None, tm, C), lambda n, m: (n, m, 0)),
            pl.BlockSpec((None, tm, C), lambda n, m: (n + n_pairs, m, 0)),
        ],
        out_specs=pl.BlockSpec((1, 1), lambda n, m: (0, 0),
                               memory_space=pltpu.MemorySpace.SMEM),
        compiler_params=pltpu.CompilerParams(
            dimension_semantics=("arbitrary", "arbitrary"),
            vmem_limit_bytes=32 * 1024 * 1024),
    )(feat, feat)
    return total[0, 0] / jnp.float32(true_count)


# ---------------------------------------------------------------------------
# Plain-JAX glue (layout only, no 9x blowup)
# ---------------------------------------------------------------------------
def _flatten_padded(xp):
    """(B, H+2, W+2, C) -> (B, (H+2)*(W+2)+2, C); 2 tail zero rows keep every
    shifted tap slice inside the kernel in-bounds."""
    B, Hp, Wp, C = xp.shape
    flat = xp.reshape(B, Hp * Wp, C)
    return jnp.pad(flat, ((0, 0), (0, 2), (0, 0)))


def _col_mask(H, W):
    Wp = W + 2
    col = jnp.arange(H * Wp, dtype=jnp.int32) % Wp
    return (col < W).astype(jnp.float32).reshape(H * Wp, 1)


def _refold_pad_flatten(feat, H, W):
    """Conv output (B, H*(W+2), C) -> zero-padded flat input for the next conv."""
    B, Mr, C = feat.shape
    Wp = W + 2
    g = feat.reshape(B, H, Wp, C)
    # rows: pad (1,1); cols: prepend one zero, drop the last wrap column ->
    # proper (1,1) spatial zero padding (kernel already zeroed wrap columns).
    g = lax.pad(g, jnp.zeros((), g.dtype),
                ((0, 0, 0), (1, 1, 0), (1, -1, 0), (0, 0, 0)))
    return _flatten_padded(g)


def _prep_params(params, cin):
    """Zero-pad Cout (and conv2's Cin) to 128-lane multiples; (9, Cin, Cpad) slabs."""
    w1, b1 = params["w1"], params["b1"]
    w2, b2 = params["w2"], params["b2"]
    c1, c2 = w1.shape[-1], w2.shape[-1]
    c1p, c2p = _round_up(c1, LANE), _round_up(c2, LANE)
    w1p = jnp.zeros((3, 3, cin, c1p), jnp.float32).at[..., :c1].set(w1)
    w1p = w1p.reshape(9, cin, c1p)
    b1p = jnp.zeros((1, c1p), jnp.float32).at[:, :c1].set(b1)
    w2p = jnp.zeros((3, 3, c1p, c2p), jnp.float32).at[:, :, :c1, :c2].set(w2)
    w2p = w2p.reshape(9, c1p, c2p)
    b2p = jnp.zeros((1, c2p), jnp.float32).at[:, :c2].set(b2)
    return (w1p, b1p, c1), (w2p, b2p, c2)


def feature_extractor(x_nchw, prepped):
    """Returns ({layer: (flat feature (B, H*(W+2), Cpad), true Cout)}, (H, W))."""
    (w1p, b1p, c1), (w2p, b2p, c2) = prepped
    x = jnp.transpose(x_nchw, (0, 2, 3, 1)).astype(jnp.float32)   # NCHW -> NHWC
    _, H, W, _ = x.shape
    mask = _col_mask(H, W)
    xp = jnp.pad(x, ((0, 0), (1, 1), (1, 1), (0, 0)))
    xf = _flatten_padded(xp)
    f1 = _conv3x3_relu(xf, w1p, b1p, mask, H, W)
    h2 = _refold_pad_flatten(f1, H, W)
    f2 = _conv3x3_relu(h2, w2p, b2p, mask, H, W)
    return {"conv1": (f1, c1), "conv2": (f2, c2)}, (H, W)


def perception_loss(generated_images, target_images, params,
                    layers=("conv1", "conv2")):
    n = generated_images.shape[0]
    cin = generated_images.shape[1]
    prepped = _prep_params(params, cin)
    # One batched extractor pass for both branches (halves weight DMA, 2x M).
    both = jnp.concatenate([generated_images, target_images], axis=0)
    feats, (H, W) = feature_extractor(both, prepped)
    loss = jnp.float32(0.0)
    for layer in layers:
        f, c_true = feats[layer]
        # F.l1_loss(reduction='mean'): divide by the TRUE element count; padded
        # channels and wrap columns are identically zero in both branches.
        loss = loss + _l1_mean(f, n, n * H * W * c_true)
    return loss


# ---------------------------------------------------------------------------
# Demo
# ---------------------------------------------------------------------------
if __name__ == "__main__":
    key = jax.random.PRNGKey(0)
    k1, k2, k3, k4, k5, k6 = jax.random.split(key, 6)

    N, Cin, H, W = 2, 4, 16, 16
    C1, C2 = 16, 32

    # Deterministic synthetic feature-extractor weights (HWIO layout).
    params = {
        "w1": jax.random.normal(k1, (3, 3, Cin, C1), jnp.float32) * 0.1,
        "b1": jax.random.normal(k2, (C1,), jnp.float32) * 0.01,
        "w2": jax.random.normal(k3, (3, 3, C1, C2), jnp.float32) * 0.1,
        "b2": jax.random.normal(k4, (C2,), jnp.float32) * 0.01,
    }

    generated = jax.random.normal(k5, (N, Cin, H, W), jnp.float32)
    target = jax.random.normal(k6, (N, Cin, H, W), jnp.float32)

    loss_fn = jax.jit(functools.partial(perception_loss, params=params))
    loss = loss_fn(generated, target)
    jax.block_until_ready(loss)
    assert loss.shape == () and bool(jnp.isfinite(loss))
    print("KERNEL_OK")
</pallas_src>

<mosaic_0001>
module attributes {stable_mosaic.version = 11 : i64} {
  func.func @_l1_sum_kernel(%arg0: i32, %arg1: i32, %arg2: memref<1x288x128xf32, #tpu.memory_space<vmem>>, %arg3: memref<1x288x128xf32, #tpu.memory_space<vmem>>, %arg4: memref<1x1xf32, #tpu.memory_space<smem>>) attributes {dimension_semantics = [#tpu.dimension_semantics<arbitrary>, #tpu.dimension_semantics<arbitrary>], iteration_bounds = array<i64: 2, 1>, scalar_prefetch = 0 : i64, scratch_operands = 0 : i64, tpu.core_type = #tpu.core_type<tc>, window_params = [{transform_indices = @transform_0, window_bounds = array<i64: 1, 288, 128>}, {transform_indices = @transform_1, window_bounds = array<i64: 1, 288, 128>}, {transform_indices = @transform_2, window_bounds = array<i64: 1, 1>}]} {
    %c0_i32 = arith.constant 0 : i32
    %0 = arith.cmpi eq, %arg0, %c0_i32 : i32
    %c0_i32_0 = arith.constant 0 : i32
    %1 = arith.cmpi eq, %arg1, %c0_i32_0 : i32
    %2 = arith.andi %0, %1 : i1
    %3 = arith.extui %2 : i1 to i32
    %c0_i32_1 = arith.constant 0 : i32
    %4 = arith.cmpi ne, %3, %c0_i32_1 : i32
    scf.if %4 {
      %cst_11 = arith.constant 0.000000e+00 : f32
      %c0_12 = arith.constant 0 : index
      %c0_13 = arith.constant 0 : index
      %18 = memref.load %arg4[%c0_12, %c0_13] : memref<1x1xf32, #tpu.memory_space<smem>>
      memref.store %cst_11, %arg4[%c0_12, %c0_13] : memref<1x1xf32, #tpu.memory_space<smem>>
    } else {
    }
    %c0 = arith.constant 0 : index
    %c0_2 = arith.constant 0 : index
    %c0_3 = arith.constant 0 : index
    %5 = vector.load %arg2[%c0, %c0_2, %c0_3] : memref<1x288x128xf32, #tpu.memory_space<vmem>>, vector<1x288x128xf32>
    %6 = vector.shape_cast %5 : vector<1x288x128xf32> to vector<288x128xf32>
    %c0_4 = arith.constant 0 : index
    %c0_5 = arith.constant 0 : index
    %c0_6 = arith.constant 0 : index
    %7 = vector.load %arg3[%c0_4, %c0_5, %c0_6] : memref<1x288x128xf32, #tpu.memory_space<vmem>>, vector<1x288x128xf32>
    %8 = vector.shape_cast %7 : vector<1x288x128xf32> to vector<288x128xf32>
    %9 = arith.subf %6, %8 : vector<288x128xf32>
    %10 = math.absf %9 : vector<288x128xf32>
    %c0_7 = arith.constant 0 : index
    %c0_8 = arith.constant 0 : index
    %11 = memref.load %arg4[%c0_7, %c0_8] : memref<1x1xf32, #tpu.memory_space<smem>>
    %12 = vector.shape_cast %10 : vector<288x128xf32> to vector<1x288x128xf32>
    %cst = arith.constant dense<0.000000e+00> : vector<1xf32>
    %13 = vector.multi_reduction <add>, %12, %cst [1, 2] : vector<1x288x128xf32> to vector<1xf32>
    %14 = vector.shape_cast %13 : vector<1xf32> to vector<1x1x1xf32>
    %15 = vector.extract %14[0, 0, 0] : f32 from vector<1x1x1xf32>
    %16 = arith.addf %11, %15 : f32
    %c0_9 = arith.constant 0 : index
    %c0_10 = arith.constant 0 : index
    %17 = memref.load %arg4[%c0_9, %c0_10] : memref<1x1xf32, #tpu.memory_space<smem>>
    memref.store %16, %arg4[%c0_9, %c0_10] : memref<1x1xf32, #tpu.memory_space<smem>>
    return
  }
  func.func @transform_0(%arg0: i32, %arg1: i32) -> (i32, i32, i32) {
    %c0_i32 = arith.constant 0 : i32
    %c0_i32_0 = arith.constant 0 : i32
    return %arg0, %arg1, %c0_i32 : i32, i32, i32
  }
  func.func @transform_1(%arg0: i32, %arg1: i32) -> (i32, i32, i32) {
    %c2_i32 = arith.constant 2 : i32
    %0 = arith.addi %arg0, %c2_i32 : i32
    %c0_i32 = arith.constant 0 : i32
    %c0_i32_0 = arith.constant 0 : i32
    return %0, %arg1, %c0_i32 : i32, i32, i32
  }
  func.func @transform_2(%arg0: i32, %arg1: i32) -> (i32, i32) {
    %c0_i32 = arith.constant 0 : i32
    %c0_i32_0 = arith.constant 0 : i32
    %c0_i32_1 = arith.constant 0 : i32
    return %c0_i32, %c0_i32_0 : i32, i32
  }
}

module attributes {stable_mosaic.version = 11 : i64} {
  func.func @_conv3x3_relu_kernel(%arg0: i32, %arg1: memref<1x326x4xf32, #tpu.memory_space<vmem>>, %arg2: memref<9x4x128xf32, #tpu.memory_space<vmem>>, %arg3: memref<1x128xf32, #tpu.memory_space<vmem>>, %arg4: memref<288x1xf32, #tpu.memory_space<vmem>>, %arg5: memref<1x288x128xf32, #tpu.memory_space<vmem>>) attributes {dimension_semantics = [#tpu.dimension_semantics<parallel>], iteration_bounds = array<i64: 4>, scalar_prefetch = 0 : i64, scratch_operands = 0 : i64, tpu.core_type = #tpu.core_type<tc>, window_params = [{transform_indices = @transform_0, window_bounds = array<i64: 1, 326, 4>}, {pipeline_mode = #tpu.pipeline_mode<synchronous>, transform_indices = @transform_1, window_bounds = array<i64: 9, 4, 128>}, {pipeline_mode = #tpu.pipeline_mode<synchronous>, transform_indices = @transform_2, window_bounds = array<i64: 1, 128>}, {pipeline_mode = #tpu.pipeline_mode<synchronous>, transform_indices = @transform_3, window_bounds = array<i64: 288, 1>}, {transform_indices = @transform_4, window_bounds = array<i64: 1, 288, 128>}]} {
    %c0 = arith.constant 0 : index
    %c0_0 = arith.constant 0 : index
    %c0_1 = arith.constant 0 : index
    %0 = vector.load %arg1[%c0, %c0_0, %c0_1] : memref<1x326x4xf32, #tpu.memory_space<vmem>>, vector<1x288x4xf32>
    %1 = vector.shape_cast %0 : vector<1x288x4xf32> to vector<288x4xf32>
    %c0_2 = arith.constant 0 : index
    %c0_3 = arith.constant 0 : index
    %c0_4 = arith.constant 0 : index
    %2 = vector.load %arg2[%c0_2, %c0_3, %c0_4] : memref<9x4x128xf32, #tpu.memory_space<vmem>>, vector<1x4x128xf32>
    %3 = vector.shape_cast %2 : vector<1x4x128xf32> to vector<4x128xf32>
    %cst = arith.constant dense<0.000000e+00> : vector<288x128xf32>
    %4 = tpu.matmul %1, %3, %cst {dimension_numbers = #tpu.dot_dimension_numbers<[1], [0], [0], [1], [0, 0, 1, 1], [], []>} : vector<288x4xf32>, vector<4x128xf32>, vector<288x128xf32> -> vector<288x128xf32>
    %c0_5 = arith.constant 0 : index
    %c1 = arith.constant 1 : index
    %c0_6 = arith.constant 0 : index
    %5 = vector.load %arg1[%c0_5, %c1, %c0_6] : memref<1x326x4xf32, #tpu.memory_space<vmem>>, vector<1x288x4xf32>
    %6 = vector.shape_cast %5 : vector<1x288x4xf32> to vector<288x4xf32>
    %c1_7 = arith.constant 1 : index
    %c0_8 = arith.constant 0 : index
    %c0_9 = arith.constant 0 : index
    %7 = vector.load %arg2[%c1_7, %c0_8, %c0_9] : memref<9x4x128xf32, #tpu.memory_space<vmem>>, vector<1x4x128xf32>
    %8 = vector.shape_cast %7 : vector<1x4x128xf32> to vector<4x128xf32>
    %cst_10 = arith.constant dense<0.000000e+00> : vector<288x128xf32>
    %9 = tpu.matmul %6, %8, %cst_10 {dimension_numbers = #tpu.dot_dimension_numbers<[1], [0], [0], [1], [0, 0, 1, 1], [], []>} : vector<288x4xf32>, vector<4x128xf32>, vector<288x128xf32> -> vector<288x128xf32>
    %10 = arith.addf %4, %9 : vector<288x128xf32>
    %c0_11 = arith.constant 0 : index
    %c2 = arith.constant 2 : index
    %c0_12 = arith.constant 0 : index
    %11 = vector.load %arg1[%c0_11, %c2, %c0_12] : memref<1x326x4xf32, #tpu.memory_space<vmem>>, vector<1x288x4xf32>
    %12 = vector.shape_cast %11 : vector<1x288x4xf32> to vector<288x4xf32>
    %c2_13 = arith.constant 2 : index
    %c0_14 = arith.constant 0 : index
    %c0_15 = arith.constant 0 : index
    %13 = vector.load %arg2[%c2_13, %c0_14, %c0_15] : memref<9x4x128xf32, #tpu.memory_space<vmem>>, vector<1x4x128xf32>
    %14 = vector.shape_cast %13 : vector<1x4x128xf32> to vector<4x128xf32>
    %cst_16 = arith.constant dense<0.000000e+00> : vector<288x128xf32>
    %15 = tpu.matmul %12, %14, %cst_16 {dimension_numbers = #tpu.dot_dimension_numbers<[1], [0], [0], [1], [0, 0, 1, 1], [], []>} : vector<288x4xf32>, vector<4x128xf32>, vector<288x128xf32> -> vector<288x128xf32>
    %16 = arith.addf %10, %15 : vector<288x128xf32>
    %c0_17 = arith.constant 0 : index
    %c18 = arith.constant 18 : index
    %c0_18 = arith.constant 0 : index
    %17 = vector.load %arg1[%c0_17, %c18, %c0_18] : memref<1x326x4xf32, #tpu.memory_space<vmem>>, vector<1x288x4xf32>
    %18 = vector.shape_cast %17 : vector<1x288x4xf32> to vector<288x4xf32>
    %c3 = arith.constant 3 : index
    %c0_19 = arith.constant 0 : index
    %c0_20 = arith.constant 0 : index
    %19 = vector.load %arg2[%c3, %c0_19, %c0_20] : memref<9x4x128xf32, #tpu.memory_space<vmem>>, vector<1x4x128xf32>
    %20 = vector.shape_cast %19 : vector<1x4x128xf32> to vector<4x128xf32>
    %cst_21 = arith.constant dense<0.000000e+00> : vector<288x128xf32>
    %21 = tpu.matmul %18, %20, %cst_21 {dimension_numbers = #tpu.dot_dimension_numbers<[1], [0], [0], [1], [0, 0, 1, 1], [], []>} : vector<288x4xf32>, vector<4x128xf32>, vector<288x128xf32> -> vector<288x128xf32>
    %22 = arith.addf %16, %21 : vector<288x128xf32>
    %c0_22 = arith.constant 0 : index
    %c19 = arith.constant 19 : index
    %c0_23 = arith.constant 0 : index
    %23 = vector.load %arg1[%c0_22, %c19, %c0_23] : memref<1x326x4xf32, #tpu.memory_space<vmem>>, vector<1x288x4xf32>
    %24 = vector.shape_cast %23 : vector<1x288x4xf32> to vector<288x4xf32>
    %c4 = arith.constant 4 : index
    %c0_24 = arith.constant 0 : index
    %c0_25 = arith.constant 0 : index
    %25 = vector.load %arg2[%c4, %c0_24, %c0_25] : memref<9x4x128xf32, #tpu.memory_space<vmem>>, vector<1x4x128xf32>
    %26 = vector.shape_cast %25 : vector<1x4x128xf32> to vector<4x128xf32>
    %cst_26 = arith.constant dense<0.000000e+00> : vector<288x128xf32>
    %27 = tpu.matmul %24, %26, %cst_26 {dimension_numbers = #tpu.dot_dimension_numbers<[1], [0], [0], [1], [0, 0, 1, 1], [], []>} : vector<288x4xf32>, vector<4x128xf32>, vector<288x128xf32> -> vector<288x128xf32>
    %28 = arith.addf %22, %27 : vector<288x128xf32>
    %c0_27 = arith.constant 0 : index
    %c20 = arith.constant 20 : index
    %c0_28 = arith.constant 0 : index
    %29 = vector.load %arg1[%c0_27, %c20, %c0_28] : memref<1x326x4xf32, #tpu.memory_space<vmem>>, vector<1x288x4xf32>
    %30 = vector.shape_cast %29 : vector<1x288x4xf32> to vector<288x4xf32>
    %c5 = arith.constant 5 : index
    %c0_29 = arith.constant 0 : index
    %c0_30 = arith.constant 0 : index
    %31 = vector.load %arg2[%c5, %c0_29, %c0_30] : memref<9x4x128xf32, #tpu.memory_space<vmem>>, vector<1x4x128xf32>
    %32 = vector.shape_cast %31 : vector<1x4x128xf32> to vector<4x128xf32>
    %cst_31 = arith.constant dense<0.000000e+00> : vector<288x128xf32>
    %33 = tpu.matmul %30, %32, %cst_31 {dimension_numbers = #tpu.dot_dimension_numbers<[1], [0], [0], [1], [0, 0, 1, 1], [], []>} : vector<288x4xf32>, vector<4x128xf32>, vector<288x128xf32> -> vector<288x128xf32>
    %34 = arith.addf %28, %33 : vector<288x128xf32>
    %c0_32 = arith.constant 0 : index
    %c36 = arith.constant 36 : index
    %c0_33 = arith.constant 0 : index
    %35 = vector.load %arg1[%c0_32, %c36, %c0_33] : memref<1x326x4xf32, #tpu.memory_space<vmem>>, vector<1x288x4xf32>
    %36 = vector.shape_cast %35 : vector<1x288x4xf32> to vector<288x4xf32>
    %c6 = arith.constant 6 : index
    %c0_34 = arith.constant 0 : index
    %c0_35 = arith.constant 0 : index
    %37 = vector.load %arg2[%c6, %c0_34, %c0_35] : memref<9x4x128xf32, #tpu.memory_space<vmem>>, vector<1x4x128xf32>
    %38 = vector.shape_cast %37 : vector<1x4x128xf32> to vector<4x128xf32>
    %cst_36 = arith.constant dense<0.000000e+00> : vector<288x128xf32>
    %39 = tpu.matmul %36, %38, %cst_36 {dimension_numbers = #tpu.dot_dimension_numbers<[1], [0], [0], [1], [0, 0, 1, 1], [], []>} : vector<288x4xf32>, vector<4x128xf32>, vector<288x128xf32> -> vector<288x128xf32>
    %40 = arith.addf %34, %39 : vector<288x128xf32>
    %c0_37 = arith.constant 0 : index
    %c37 = arith.constant 37 : index
    %c0_38 = arith.constant 0 : index
    %41 = vector.load %arg1[%c0_37, %c37, %c0_38] : memref<1x326x4xf32, #tpu.memory_space<vmem>>, vector<1x288x4xf32>
    %42 = vector.shape_cast %41 : vector<1x288x4xf32> to vector<288x4xf32>
    %c7 = arith.constant 7 : index
    %c0_39 = arith.constant 0 : index
    %c0_40 = arith.constant 0 : index
    %43 = vector.load %arg2[%c7, %c0_39, %c0_40] : memref<9x4x128xf32, #tpu.memory_space<vmem>>, vector<1x4x128xf32>
    %44 = vector.shape_cast %43 : vector<1x4x128xf32> to vector<4x128xf32>
    %cst_41 = arith.constant dense<0.000000e+00> : vector<288x128xf32>
    %45 = tpu.matmul %42, %44, %cst_41 {dimension_numbers = #tpu.dot_dimension_numbers<[1], [0], [0], [1], [0, 0, 1, 1], [], []>} : vector<288x4xf32>, vector<4x128xf32>, vector<288x128xf32> -> vector<288x128xf32>
    %46 = arith.addf %40, %45 : vector<288x128xf32>
    %c0_42 = arith.constant 0 : index
    %c38 = arith.constant 38 : index
    %c0_43 = arith.constant 0 : index
    %47 = vector.load %arg1[%c0_42, %c38, %c0_43] : memref<1x326x4xf32, #tpu.memory_space<vmem>>, vector<1x288x4xf32>
    %48 = vector.shape_cast %47 : vector<1x288x4xf32> to vector<288x4xf32>
    %c8 = arith.constant 8 : index
    %c0_44 = arith.constant 0 : index
    %c0_45 = arith.constant 0 : index
    %49 = vector.load %arg2[%c8, %c0_44, %c0_45] : memref<9x4x128xf32, #tpu.memory_space<vmem>>, vector<1x4x128xf32>
    %50 = vector.shape_cast %49 : vector<1x4x128xf32> to vector<4x128xf32>
    %cst_46 = arith.constant dense<0.000000e+00> : vector<288x128xf32>
    %51 = tpu.matmul %48, %50, %cst_46 {dimension_numbers = #tpu.dot_dimension_numbers<[1], [0], [0], [1], [0, 0, 1, 1], [], []>} : vector<288x4xf32>, vector<4x128xf32>, vector<288x128xf32> -> vector<288x128xf32>
    %52 = arith.addf %46, %51 : vector<288x128xf32>
    %c0_47 = arith.constant 0 : index
    %c0_48 = arith.constant 0 : index
    %53 = vector.load %arg3[%c0_47, %c0_48] : memref<1x128xf32, #tpu.memory_space<vmem>>, vector<1x128xf32>
    %54 = vector.broadcast %53 : vector<1x128xf32> to vector<288x128xf32>
    %55 = arith.addf %52, %54 : vector<288x128xf32>
    %cst_49 = arith.constant 0.000000e+00 : f32
    %56 = vector.broadcast %cst_49 : f32 to vector<288x128xf32>
    %57 = arith.maximumf %55, %56 : vector<288x128xf32>
    %c0_50 = arith.constant 0 : index
    %c0_51 = arith.constant 0 : index
    %58 = vector.load %arg4[%c0_50, %c0_51] : memref<288x1xf32, #tpu.memory_space<vmem>>, vector<288x1xf32>
    %59 = vector.broadcast %58 : vector<288x1xf32> to vector<288x128xf32>
    %60 = arith.mulf %57, %59 : vector<288x128xf32>
    %c0_52 = arith.constant 0 : index
    %c0_53 = arith.constant 0 : index
    %c0_54 = arith.constant 0 : index
    %61 = vector.load %arg5[%c0_52, %c0_53, %c0_54] : memref<1x288x128xf32, #tpu.memory_space<vmem>>, vector<1x288x128xf32>
    %62 = vector.shape_cast %61 : vector<1x288x128xf32> to vector<288x128xf32>
    %63 = vector.shape_cast %60 : vector<288x128xf32> to vector<1x288x128xf32>
    tpu.vector_store %arg5[%c0_52, %c0_53, %c0_54], %63 {strides = array<i32>} : memref<1x288x128xf32, #tpu.memory_space<vmem>>, vector<1x288x128xf32>,
    return
  }
  func.func @transform_0(%arg0: i32) -> (i32, i32, i32) {
    %c0_i32 = arith.constant 0 : i32
    %c0_i32_0 = arith.constant 0 : i32
    %c0_i32_1 = arith.constant 0 : i32
    return %arg0, %c0_i32, %c0_i32_0 : i32, i32, i32
  }
  func.func @transform_1(%arg0: i32) -> (i32, i32, i32) {
    %c0_i32 = arith.constant 0 : i32
    %c0_i32_0 = arith.constant 0 : i32
    %c0_i32_1 = arith.constant 0 : i32
    %c0_i32_2 = arith.constant 0 : i32
    return %c0_i32, %c0_i32_0, %c0_i32_1 : i32, i32, i32
  }
  func.func @transform_2(%arg0: i32) -> (i32, i32) {
    %c0_i32 = arith.constant 0 : i32
    %c0_i32_0 = arith.constant 0 : i32
    %c0_i32_1 = arith.constant 0 : i32
    return %c0_i32, %c0_i32_0 : i32, i32
  }
  func.func @transform_3(%arg0: i32) -> (i32, i32) {
    %c0_i32 = arith.constant 0 : i32
    %c0_i32_0 = arith.constant 0 : i32
    %c0_i32_1 = arith.constant 0 : i32
    return %c0_i32, %c0_i32_0 : i32, i32
  }
  func.func @transform_4(%arg0: i32) -> (i32, i32, i32) {
    %c0_i32 = arith.constant 0 : i32
    %c0_i32_0 = arith.constant 0 : i32
    %c0_i32_1 = arith.constant 0 : i32
    return %arg0, %c0_i32, %c0_i32_0 : i32, i32, i32
  }
}

module attributes {stable_mosaic.version = 11 : i64} {
  func.func @_conv3x3_relu_kernel(%arg0: i32, %arg1: memref<1x326x128xf32, #tpu.memory_space<vmem>>, %arg2: memref<9x128x128xf32, #tpu.memory_space<vmem>>, %arg3: memref<1x128xf32, #tpu.memory_space<vmem>>, %arg4: memref<288x1xf32, #tpu.memory_space<vmem>>, %arg5: memref<1x288x128xf32, #tpu.memory_space<vmem>>) attributes {dimension_semantics = [#tpu.dimension_semantics<parallel>], iteration_bounds = array<i64: 4>, scalar_prefetch = 0 : i64, scratch_operands = 0 : i64, tpu.core_type = #tpu.core_type<tc>, window_params = [{transform_indices = @transform_0, window_bounds = array<i64: 1, 326, 128>}, {pipeline_mode = #tpu.pipeline_mode<synchronous>, transform_indices = @transform_1, window_bounds = array<i64: 9, 128, 128>}, {pipeline_mode = #tpu.pipeline_mode<synchronous>, transform_indices = @transform_2, window_bounds = array<i64: 1, 128>}, {pipeline_mode = #tpu.pipeline_mode<synchronous>, transform_indices = @transform_3, window_bounds = array<i64: 288, 1>}, {transform_indices = @transform_4, window_bounds = array<i64: 1, 288, 128>}]} {
    %c0 = arith.constant 0 : index
    %c0_0 = arith.constant 0 : index
    %c0_1 = arith.constant 0 : index
    %0 = vector.load %arg1[%c0, %c0_0, %c0_1] : memref<1x326x128xf32, #tpu.memory_space<vmem>>, vector<1x288x128xf32>
    %1 = vector.shape_cast %0 : vector<1x288x128xf32> to vector<288x128xf32>
    %c0_2 = arith.constant 0 : index
    %c0_3 = arith.constant 0 : index
    %c0_4 = arith.constant 0 : index
    %2 = vector.load %arg2[%c0_2, %c0_3, %c0_4] : memref<9x128x128xf32, #tpu.memory_space<vmem>>, vector<1x128x128xf32>
    %3 = vector.shape_cast %2 : vector<1x128x128xf32> to vector<128x128xf32>
    %cst = arith.constant dense<0.000000e+00> : vector<288x128xf32>
    %4 = tpu.matmul %1, %3, %cst {dimension_numbers = #tpu.dot_dimension_numbers<[1], [0], [0], [1], [0, 0, 1, 1], [], []>} : vector<288x128xf32>, vector<128x128xf32>, vector<288x128xf32> -> vector<288x128xf32>
    %c0_5 = arith.constant 0 : index
    %c1 = arith.constant 1 : index
    %c0_6 = arith.constant 0 : index
    %5 = vector.load %arg1[%c0_5, %c1, %c0_6] : memref<1x326x128xf32, #tpu.memory_space<vmem>>, vector<1x288x128xf32>
    %6 = vector.shape_cast %5 : vector<1x288x128xf32> to vector<288x128xf32>
    %c1_7 = arith.constant 1 : index
    %c0_8 = arith.constant 0 : index
    %c0_9 = arith.constant 0 : index
    %7 = vector.load %arg2[%c1_7, %c0_8, %c0_9] : memref<9x128x128xf32, #tpu.memory_space<vmem>>, vector<1x128x128xf32>
    %8 = vector.shape_cast %7 : vector<1x128x128xf32> to vector<128x128xf32>
    %cst_10 = arith.constant dense<0.000000e+00> : vector<288x128xf32>
    %9 = tpu.matmul %6, %8, %cst_10 {dimension_numbers = #tpu.dot_dimension_numbers<[1], [0], [0], [1], [0, 0, 1, 1], [], []>} : vector<288x128xf32>, vector<128x128xf32>, vector<288x128xf32> -> vector<288x128xf32>
    %10 = arith.addf %4, %9 : vector<288x128xf32>
    %c0_11 = arith.constant 0 : index
    %c2 = arith.constant 2 : index
    %c0_12 = arith.constant 0 : index
    %11 = vector.load %arg1[%c0_11, %c2, %c0_12] : memref<1x326x128xf32, #tpu.memory_space<vmem>>, vector<1x288x128xf32>
    %12 = vector.shape_cast %11 : vector<1x288x128xf32> to vector<288x128xf32>
    %c2_13 = arith.constant 2 : index
    %c0_14 = arith.constant 0 : index
    %c0_15 = arith.constant 0 : index
    %13 = vector.load %arg2[%c2_13, %c0_14, %c0_15] : memref<9x128x128xf32, #tpu.memory_space<vmem>>, vector<1x128x128xf32>
    %14 = vector.shape_cast %13 : vector<1x128x128xf32> to vector<128x128xf32>
    %cst_16 = arith.constant dense<0.000000e+00> : vector<288x128xf32>
    %15 = tpu.matmul %12, %14, %cst_16 {dimension_numbers = #tpu.dot_dimension_numbers<[1], [0], [0], [1], [0, 0, 1, 1], [], []>} : vector<288x128xf32>, vector<128x128xf32>, vector<288x128xf32> -> vector<288x128xf32>
    %16 = arith.addf %10, %15 : vector<288x128xf32>
    %c0_17 = arith.constant 0 : index
    %c18 = arith.constant 18 : index
    %c0_18 = arith.constant 0 : index
    %17 = vector.load %arg1[%c0_17, %c18, %c0_18] : memref<1x326x128xf32, #tpu.memory_space<vmem>>, vector<1x288x128xf32>
    %18 = vector.shape_cast %17 : vector<1x288x128xf32> to vector<288x128xf32>
    %c3 = arith.constant 3 : index
    %c0_19 = arith.constant 0 : index
    %c0_20 = arith.constant 0 : index
    %19 = vector.load %arg2[%c3, %c0_19, %c0_20] : memref<9x128x128xf32, #tpu.memory_space<vmem>>, vector<1x128x128xf32>
    %20 = vector.shape_cast %19 : vector<1x128x128xf32> to vector<128x128xf32>
    %cst_21 = arith.constant dense<0.000000e+00> : vector<288x128xf32>
    %21 = tpu.matmul %18, %20, %cst_21 {dimension_numbers = #tpu.dot_dimension_numbers<[1], [0], [0], [1], [0, 0, 1, 1], [], []>} : vector<288x128xf32>, vector<128x128xf32>, vector<288x128xf32> -> vector<288x128xf32>
    %22 = arith.addf %16, %21 : vector<288x128xf32>
    %c0_22 = arith.constant 0 : index
    %c19 = arith.constant 19 : index
    %c0_23 = arith.constant 0 : index
    %23 = vector.load %arg1[%c0_22, %c19, %c0_23] : memref<1x326x128xf32, #tpu.memory_space<vmem>>, vector<1x288x128xf32>
    %24 = vector.shape_cast %23 : vector<1x288x128xf32> to vector<288x128xf32>
    %c4 = arith.constant 4 : index
    %c0_24 = arith.constant 0 : index
    %c0_25 = arith.constant 0 : index
    %25 = vector.load %arg2[%c4, %c0_24, %c0_25] : memref<9x128x128xf32, #tpu.memory_space<vmem>>, vector<1x128x128xf32>
    %26 = vector.shape_cast %25 : vector<1x128x128xf32> to vector<128x128xf32>
    %cst_26 = arith.constant dense<0.000000e+00> : vector<288x128xf32>
    %27 = tpu.matmul %24, %26, %cst_26 {dimension_numbers = #tpu.dot_dimension_numbers<[1], [0], [0], [1], [0, 0, 1, 1], [], []>} : vector<288x128xf32>, vector<128x128xf32>, vector<288x128xf32> -> vector<288x128xf32>
    %28 = arith.addf %22, %27 : vector<288x128xf32>
    %c0_27 = arith.constant 0 : index
    %c20 = arith.constant 20 : index
    %c0_28 = arith.constant 0 : index
    %29 = vector.load %arg1[%c0_27, %c20, %c0_28] : memref<1x326x128xf32, #tpu.memory_space<vmem>>, vector<1x288x128xf32>
    %30 = vector.shape_cast %29 : vector<1x288x128xf32> to vector<288x128xf32>
    %c5 = arith.constant 5 : index
    %c0_29 = arith.constant 0 : index
    %c0_30 = arith.constant 0 : index
    %31 = vector.load %arg2[%c5, %c0_29, %c0_30] : memref<9x128x128xf32, #tpu.memory_space<vmem>>, vector<1x128x128xf32>
    %32 = vector.shape_cast %31 : vector<1x128x128xf32> to vector<128x128xf32>
    %cst_31 = arith.constant dense<0.000000e+00> : vector<288x128xf32>
    %33 = tpu.matmul %30, %32, %cst_31 {dimension_numbers = #tpu.dot_dimension_numbers<[1], [0], [0], [1], [0, 0, 1, 1], [], []>} : vector<288x128xf32>, vector<128x128xf32>, vector<288x128xf32> -> vector<288x128xf32>
    %34 = arith.addf %28, %33 : vector<288x128xf32>
    %c0_32 = arith.constant 0 : index
    %c36 = arith.constant 36 : index
    %c0_33 = arith.constant 0 : index
    %35 = vector.load %arg1[%c0_32, %c36, %c0_33] : memref<1x326x128xf32, #tpu.memory_space<vmem>>, vector<1x288x128xf32>
    %36 = vector.shape_cast %35 : vector<1x288x128xf32> to vector<288x128xf32>
    %c6 = arith.constant 6 : index
    %c0_34 = arith.constant 0 : index
    %c0_35 = arith.constant 0 : index
    %37 = vector.load %arg2[%c6, %c0_34, %c0_35] : memref<9x128x128xf32, #tpu.memory_space<vmem>>, vector<1x128x128xf32>
    %38 = vector.shape_cast %37 : vector<1x128x128xf32> to vector<128x128xf32>
    %cst_36 = arith.constant dense<0.000000e+00> : vector<288x128xf32>
    %39 = tpu.matmul %36, %38, %cst_36 {dimension_numbers = #tpu.dot_dimension_numbers<[1], [0], [0], [1], [0, 0, 1, 1], [], []>} : vector<288x128xf32>, vector<128x128xf32>, vector<288x128xf32> -> vector<288x128xf32>
    %40 = arith.addf %34, %39 : vector<288x128xf32>
    %c0_37 = arith.constant 0 : index
    %c37 = arith.constant 37 : index
    %c0_38 = arith.constant 0 : index
    %41 = vector.load %arg1[%c0_37, %c37, %c0_38] : memref<1x326x128xf32, #tpu.memory_space<vmem>>, vector<1x288x128xf32>
    %42 = vector.shape_cast %41 : vector<1x288x128xf32> to vector<288x128xf32>
    %c7 = arith.constant 7 : index
    %c0_39 = arith.constant 0 : index
    %c0_40 = arith.constant 0 : index
    %43 = vector.load %arg2[%c7, %c0_39, %c0_40] : memref<9x128x128xf32, #tpu.memory_space<vmem>>, vector<1x128x128xf32>
    %44 = vector.shape_cast %43 : vector<1x128x128xf32> to vector<128x128xf32>
    %cst_41 = arith.constant dense<0.000000e+00> : vector<288x128xf32>
    %45 = tpu.matmul %42, %44, %cst_41 {dimension_numbers = #tpu.dot_dimension_numbers<[1], [0], [0], [1], [0, 0, 1, 1], [], []>} : vector<288x128xf32>, vector<128x128xf32>, vector<288x128xf32> -> vector<288x128xf32>
    %46 = arith.addf %40, %45 : vector<288x128xf32>
    %c0_42 = arith.constant 0 : index
    %c38 = arith.constant 38 : index
    %c0_43 = arith.constant 0 : index
    %47 = vector.load %arg1[%c0_42, %c38, %c0_43] : memref<1x326x128xf32, #tpu.memory_space<vmem>>, vector<1x288x128xf32>
    %48 = vector.shape_cast %47 : vector<1x288x128xf32> to vector<288x128xf32>
    %c8 = arith.constant 8 : index
    %c0_44 = arith.constant 0 : index
    %c0_45 = arith.constant 0 : index
    %49 = vector.load %arg2[%c8, %c0_44, %c0_45] : memref<9x128x128xf32, #tpu.memory_space<vmem>>, vector<1x128x128xf32>
    %50 = vector.shape_cast %49 : vector<1x128x128xf32> to vector<128x128xf32>
    %cst_46 = arith.constant dense<0.000000e+00> : vector<288x128xf32>
    %51 = tpu.matmul %48, %50, %cst_46 {dimension_numbers = #tpu.dot_dimension_numbers<[1], [0], [0], [1], [0, 0, 1, 1], [], []>} : vector<288x128xf32>, vector<128x128xf32>, vector<288x128xf32> -> vector<288x128xf32>
    %52 = arith.addf %46, %51 : vector<288x128xf32>
    %c0_47 = arith.constant 0 : index
    %c0_48 = arith.constant 0 : index
    %53 = vector.load %arg3[%c0_47, %c0_48] : memref<1x128xf32, #tpu.memory_space<vmem>>, vector<1x128xf32>
    %54 = vector.broadcast %53 : vector<1x128xf32> to vector<288x128xf32>
    %55 = arith.addf %52, %54 : vector<288x128xf32>
    %cst_49 = arith.constant 0.000000e+00 : f32
    %56 = vector.broadcast %cst_49 : f32 to vector<288x128xf32>
    %57 = arith.maximumf %55, %56 : vector<288x128xf32>
    %c0_50 = arith.constant 0 : index
    %c0_51 = arith.constant 0 : index
    %58 = vector.load %arg4[%c0_50, %c0_51] : memref<288x1xf32, #tpu.memory_space<vmem>>, vector<288x1xf32>
    %59 = vector.broadcast %58 : vector<288x1xf32> to vector<288x128xf32>
    %60 = arith.mulf %57, %59 : vector<288x128xf32>
    %c0_52 = arith.constant 0 : index
    %c0_53 = arith.constant 0 : index
    %c0_54 = arith.constant 0 : index
    %61 = vector.load %arg5[%c0_52, %c0_53, %c0_54] : memref<1x288x128xf32, #tpu.memory_space<vmem>>, vector<1x288x128xf32>
    %62 = vector.shape_cast %61 : vector<1x288x128xf32> to vector<288x128xf32>
    %63 = vector.shape_cast %60 : vector<288x128xf32> to vector<1x288x128xf32>
    tpu.vector_store %arg5[%c0_52, %c0_53, %c0_54], %63 {strides = array<i32>} : memref<1x288x128xf32, #tpu.memory_space<vmem>>, vector<1x288x128xf32>,
    return
  }
  func.func @transform_0(%arg0: i32) -> (i32, i32, i32) {
    %c0_i32 = arith.constant 0 : i32
    %c0_i32_0 = arith.constant 0 : i32
    %c0_i32_1 = arith.constant 0 : i32
    return %arg0, %c0_i32, %c0_i32_0 : i32, i32, i32
  }
  func.func @transform_1(%arg0: i32) -> (i32, i32, i32) {
    %c0_i32 = arith.constant 0 : i32
    %c0_i32_0 = arith.constant 0 : i32
    %c0_i32_1 = arith.constant 0 : i32
    %c0_i32_2 = arith.constant 0 : i32
    return %c0_i32, %c0_i32_0, %c0_i32_1 : i32, i32, i32
  }
  func.func @transform_2(%arg0: i32) -> (i32, i32) {
    %c0_i32 = arith.constant 0 : i32
    %c0_i32_0 = arith.constant 0 : i32
    %c0_i32_1 = arith.constant 0 : i32
    return %c0_i32, %c0_i32_0 : i32, i32
  }
  func.func @transform_3(%arg0: i32) -> (i32, i32) {
    %c0_i32 = arith.constant 0 : i32
    %c0_i32_0 = arith.constant 0 : i32
    %c0_i32_1 = arith.constant 0 : i32
    return %c0_i32, %c0_i32_0 : i32, i32
  }
  func.func @transform_4(%arg0: i32) -> (i32, i32, i32) {
    %c0_i32 = arith.constant 0 : i32
    %c0_i32_0 = arith.constant 0 : i32
    %c0_i32_1 = arith.constant 0 : i32
    return %arg0, %c0_i32, %c0_i32_0 : i32, i32, i32
  }
}

</mosaic_0001>

<bundles_post_ra>
// kernel: perception_loss.6
= control target key start
LH: loop header
LB: loop body
LE: loop exit
PB: predicated region body
PF: predicated region fallthrough
CT: control target
= control target key end

     0   :  { %7 = vsyncpa [#allocation3], 0  ;;  %s585_s9 = smov 0   ;;  %s587_s10 = smov 0   ;;  %s742_s0 = inlined_call_operand.vmem [shape: f32[4,288,128], index: 0, kind: input, shape index: {}, may-alias: {0,1}]   ;;  %s743_s1 = inlined_call_operand.vmem [shape: f32[4,288,128], index: 1, kind: input, shape index: {}, may-alias: {0,1}]   ;;  %s744_s2 = inlined_call_operand.hbm [shape: f32[1,1], index: 2, kind: output, shape index: {}]  }
   0x1   :  { %s589_s11 = smov 0  }
   0x2 LB: > { %s479_s12 = sadd.s32 4294967295, %s566_s11   ;;  %s25_s13 = sadd.s32 1, %s562_s10  ;;  %s566_s11 = sphi %s589_s11, %s13_s11   ;;  %s562_s10 = sphi %s587_s10, %s746_s10   ;;  %s558_s9 = sphi %s585_s9, %s745_s9  }
   0x3   : > { %p27_p0 = scmp.ge.s32.totalorder %s25_s13, 2  ;;  %p482_p1 = scmp.ge.s32.totalorder %s566_s11, 1 }
   0x4   : > { %p148_p2 = scmp.lt.s32.totalorder %s566_s11, 3 }
   0x5   : > { %s748_s13 = smov (%p27_p0, %s25_s13), 0 }
   0x6   : > { %p149_p3 = pnand %p482_p1, %p148_p2 }
   0x7   : > { %s189_s14 = sadd.s32 (!%p149_p3), 2, %s558_s9  ;;  %p180_p4 = scmp.lt.s32.totalorder (!%p149_p3), %s558_s9, 3 }
   0x8   : > { %152 = sbr.rel (%p149_p3) target bundleno = 310 (0x136), region = 28  ;;  %p191_p5 = scmp.lt.s32.totalorder (!%p149_p3), %s189_s14, 3 }
   0x9   : > { %p201_p6 = scmp.eq.s32.totalorder (!%p149_p3), %s558_s9, 0  ;;  %s568_s24 = smov (!%p149_p3), 0.0  }
   0xa   : > { %p500_p7 = scmp.eq.s32.totalorder (!%p149_p3), %s479_s12, 1  ;;  %s528_s30 = scalar_lea.hbm (!%p149_p3), %s744_s2, 16 }
   0xb   : > { %p529_p8 = scmp.ne.s32.totalorder (!%p149_p3), %s744_s2, %s528_s30  ;;  %p534_p11 = scmp.lt.u32.totalorder (!%p149_p3), %s528_s30, %s744_s2 }
   0xd   : > { %p530_p9 = pnand (!%p149_p3), %p529_p8, %p500_p7 }
   0xf   : > { %s181_s15 = scalar_select %p180_p4, %s558_s9, 3 }
  0x10   : > { %s750_s14 = smov (!%p191_p5, %s189_s14), 3  ;;  %495 = sst [smem:[#allocation2]] (%p201_p6), %s568_s24 }
  0x11   : > { %s491_s16 = smul.u32 288, %s181_s15  ;;  %s353_s25 = sld [smem:[#allocation2]] }
  0x12   : > { %s492_s17 = smul.u32 288, %s750_s14  ;;  %p531_p10 = pneg %p530_p9 }
  0x13   : > { %s612_s20 = scalar_lea.vmem %s742_s0, %s491_s16 }
  0x14   : > { %s617_s23 = scalar_lea.vmem %s743_s1, %s492_s17  ;;  %v209_v0 = vld [vmem:[%s612_s20] sm:$0xff]  ;;  %v210_v1 = vld [vmem:[%s612_s20 + $0x8] sm:$0xff]  ;;  %v211_v4 = vld [vmem:[%s612_s20 + $0x10] sm:$0xff]  ;;  %p536_p12 = pnand %p534_p11, %p531_p10 }
  0x15   : > { %v245_v2 = vld [vmem:[%s617_s23] sm:$0xff]  ;;  %v246_v3 = vld [vmem:[%s617_s23 + $0x8] sm:$0xff]  ;;  %v247_v5 = vld [vmem:[%s617_s23 + $0x10] sm:$0xff] }
  0x16   : > { %v281_v6 = vsub.f32 %v209_v0, %v245_v2  ;;  %v282_v7 = vsub.f32 %v210_v1, %v246_v3  ;;  %v212_v8 = vld [vmem:[%s612_s20 + $0x18] sm:$0xff]  ;;  %v283_v10 = vsub.f32 %v211_v4, %v247_v5  ;;  %v213_v11 = vld [vmem:[%s612_s20 + $0x20] sm:$0xff]  ;;  %v629_v12 = vld [vmem:[%s612_s20 + $0x108] sm:$0xff] }
  0x17   : > { %v248_v9 = vld [vmem:[%s617_s23 + $0x18] sm:$0xff]  ;;  %v249_v13 = vld [vmem:[%s617_s23 + $0x20] sm:$0xff]  ;;  %v633_v14 = vld [vmem:[%s612_s20 + $0x110] sm:$0xff] }
  0x18   : > { %v636_v15 = vld [vmem:[%s612_s20 + $0x118] sm:$0xff]  ;;  %v284_v16 = vsub.f32 %v212_v8, %v248_v9  ;;  %v317_v17 = vand.u32 2147483647, %v281_v6  ;;  %v318_v18 = vand.u32 2147483647, %v282_v7  ;;  %v214_v19 = vld [vmem:[%s612_s20 + $0x28] sm:$0xff]  ;;  %v285_v24 = vsub.f32 %v213_v11, %v249_v13 }
  0x19   : > { %v250_v20 = vld [vmem:[%s617_s23 + $0x28] sm:$0xff]  ;;  %v644_v22 = vld [vmem:[%s617_s23 + $0x110] sm:$0xff]  ;;  %v647_v23 = vld [vmem:[%s617_s23 + $0x118] sm:$0xff]  ;;  %v319_v25 = vand.u32 2147483647, %v283_v10 }
  0x1a   : > { %v641_v21 = vld [vmem:[%s617_s23 + $0x108] sm:$0xff]  ;;  %v215_v26 = vld [vmem:[%s612_s20 + $0x30] sm:$0xff]  ;;  %v315_v29 = vsub.f32 %v633_v14, %v644_v22  ;;  %v316_v30 = vsub.f32 %v636_v15, %v647_v23  ;;  %v286_v31 = vsub.f32 %v214_v19, %v250_v20  ;;  %v320_v32 = vand.u32 2147483647, %v284_v16  ;;  %v216_v34 = vld [vmem:[%s612_s20 + $0x38] sm:$0xff] }
  0x1b   : > { %v251_v27 = vld [vmem:[%s617_s23 + $0x30] sm:$0xff]  ;;  %v314_v28 = vsub.f32 %v629_v12, %v641_v21  ;;  %v354_v33 = vadd.f32 %v318_v18, %v317_v17  ;;  %v252_v35 = vld [vmem:[%s617_s23 + $0x38] sm:$0xff]  ;;  %v321_v37 = vand.u32 2147483647, %v285_v24  ;;  %v217_v39 = vld [vmem:[%s612_s20 + $0x40] sm:$0xff] }
  0x1c   : > { %v287_v36 = vsub.f32 %v215_v26, %v251_v27  ;;  %v253_v40 = vld [vmem:[%s617_s23 + $0x40] sm:$0xff]  ;;  %v288_v41 = vsub.f32 %v216_v34, %v252_v35  ;;  %v322_v42 = vand.u32 2147483647, %v286_v31  ;;  %v218_v44 = vld [vmem:[%s612_s20 + $0x48] sm:$0xff]  ;;  %v219_v49 = vld [vmem:[%s612_s20 + $0x50] sm:$0xff] }
  0x1d   : > { %v355_v38 = vadd.f32 %v354_v33, %v319_v25  ;;  %v254_v45 = vld [vmem:[%s617_s23 + $0x48] sm:$0xff]  ;;  %v289_v46 = vsub.f32 %v217_v39, %v253_v40  ;;  %v255_v50 = vld [vmem:[%s617_s23 + $0x50] sm:$0xff]  ;;  %v220_v54 = vld [vmem:[%s612_s20 + $0x58] sm:$0xff] }
  0x1e   : > { %v323_v47 = vand.u32 2147483647, %v287_v36  ;;  %v290_v51 = vsub.f32 %v218_v44, %v254_v45  ;;  %v324_v52 = vand.u32 2147483647, %v288_v41  ;;  %v256_v55 = vld [vmem:[%s617_s23 + $0x58] sm:$0xff]  ;;  %v291_v56 = vsub.f32 %v219_v49, %v255_v50  ;;  %v221_v59 = vld [vmem:[%s612_s20 + $0x60] sm:$0xff] }
  0x1f   : > { %v356_v43 = vadd.f32 %v355_v38, %v320_v32  ;;  %v325_v57 = vand.u32 2147483647, %v289_v46  ;;  %v257_v60 = vld [vmem:[%s617_s23 + $0x60] sm:$0xff]  ;;  %v292_v61 = vsub.f32 %v220_v54, %v256_v55  ;;  %v222_v0 = vld [vmem:[%s612_s20 + $0x68] sm:$0xff]  ;;  %v223_v5 = vld [vmem:[%s612_s20 + $0x70] sm:$0xff] }
  0x20   : > { %v326_v62 = vand.u32 2147483647, %v290_v51  ;;  %v258_v1 = vld [vmem:[%s617_s23 + $0x68] sm:$0xff]  ;;  %v293_v2 = vsub.f32 %v221_v59, %v257_v60  ;;  %v327_v3 = vand.u32 2147483647, %v291_v56  ;;  %v259_v6 = vld [vmem:[%s617_s23 + $0x70] sm:$0xff] }
  0x21   : > { %v357_v48 = vadd.f32 %v356_v43, %v321_v37  ;;  %v294_v7 = vsub.f32 %v222_v0, %v258_v1  ;;  %v328_v8 = vand.u32 2147483647, %v292_v61  ;;  %v224_v10 = vld [vmem:[%s612_s20 + $0x78] sm:$0xff]  ;;  %v295_v13 = vsub.f32 %v223_v5, %v259_v6  ;;  %v225_v18 = vld [vmem:[%s612_s20 + $0x80] sm:$0xff]  ;;  %v226_v26 = vld [vmem:[%s612_s20 + $0x88] sm:$0xff] }
  0x22   : > { %v260_v11 = vld [vmem:[%s617_s23 + $0x78] sm:$0xff]  ;;  %v329_v16 = vand.u32 2147483647, %v293_v2  ;;  %v261_v19 = vld [vmem:[%s617_s23 + $0x80] sm:$0xff]  ;;  %v262_v27 = vld [vmem:[%s617_s23 + $0x88] sm:$0xff] }
  0x23   : > { %v358_v53 = vadd.f32 %v357_v48, %v322_v42  ;;  %v296_v20 = vsub.f32 %v224_v10, %v260_v11  ;;  %v330_v24 = vand.u32 2147483647, %v294_v7  ;;  %v297_v31 = vsub.f32 %v225_v18, %v261_v19  ;;  %v227_v34 = vld [vmem:[%s612_s20 + $0x90] sm:$0xff]  ;;  %v228_v39 = vld [vmem:[%s612_s20 + $0x98] sm:$0xff]  ;;  %v229_v44 = vld [vmem:[%s612_s20 + $0xa0] sm:$0xff] }
  0x24   : > { %v331_v32 = vand.u32 2147483647, %v295_v13  ;;  %v263_v35 = vld [vmem:[%s617_s23 + $0x90] sm:$0xff]  ;;  %v298_v36 = vsub.f32 %v226_v26, %v262_v27  ;;  %v264_v40 = vld [vmem:[%s617_s23 + $0x98] sm:$0xff]  ;;  %v265_v45 = vld [vmem:[%s617_s23 + $0xa0] sm:$0xff] }
  0x25   : > { %v359_v58 = vadd.f32 %v358_v53, %v323_v47  ;;  %v332_v37 = vand.u32 2147483647, %v296_v20  ;;  %v299_v41 = vsub.f32 %v227_v34, %v263_v35  ;;  %v333_v42 = vand.u32 2147483647, %v297_v31  ;;  %v230_v49 = vld [vmem:[%s612_s20 + $0xa8] sm:$0xff]  ;;  %v231_v54 = vld [vmem:[%s612_s20 + $0xb0] sm:$0xff] }
  0x26   : > { %v300_v46 = vsub.f32 %v228_v39, %v264_v40  ;;  %v334_v47 = vand.u32 2147483647, %v298_v36  ;;  %v266_v50 = vld [vmem:[%s617_s23 + $0xa8] sm:$0xff]  ;;  %v301_v51 = vsub.f32 %v229_v44, %v265_v45  ;;  %v267_v55 = vld [vmem:[%s617_s23 + $0xb0] sm:$0xff]  ;;  %v232_v59 = vld [vmem:[%s612_s20 + $0xb8] sm:$0xff] }
  0x27   : > { %v360_v63 = vadd.f32 %v359_v58, %v324_v52  ;;  %v335_v52 = vand.u32 2147483647, %v299_v41  ;;  %v302_v56 = vsub.f32 %v230_v49, %v266_v50  ;;  %v268_v60 = vld [vmem:[%s617_s23 + $0xb8] sm:$0xff]  ;;  %v303_v61 = vsub.f32 %v231_v54, %v267_v55  ;;  %v233_v0 = vld [vmem:[%s612_s20 + $0xc0] sm:$0xff]  ;;  %v234_v5 = vld [vmem:[%s612_s20 + $0xc8] sm:$0xff] }
  0x28   : > { %v269_v1 = vld [vmem:[%s617_s23 + $0xc0] sm:$0xff]  ;;  %v304_v2 = vsub.f32 %v232_v59, %v268_v60  ;;  %v270_v6 = vld [vmem:[%s617_s23 + $0xc8] sm:$0xff]  ;;  %v235_v10 = vld [vmem:[%s612_s20 + $0xd0] sm:$0xff] }
  0x29   : > { %v361_v4 = vadd.f32 %v360_v63, %v325_v57  ;;  %v336_v57 = vand.u32 2147483647, %v300_v46  ;;  %v305_v7 = vsub.f32 %v233_v0, %v269_v1  ;;  %v271_v11 = vld [vmem:[%s617_s23 + $0xd0] sm:$0xff]  ;;  %v306_v13 = vsub.f32 %v234_v5, %v270_v6  ;;  %v236_v18 = vld [vmem:[%s612_s20 + $0xd8] sm:$0xff]  ;;  %v237_v26 = vld [vmem:[%s612_s20 + $0xe0] sm:$0xff] }
  0x2a   : > { %v272_v19 = vld [vmem:[%s617_s23 + $0xd8] sm:$0xff]  ;;  %v307_v20 = vsub.f32 %v235_v10, %v271_v11  ;;  %v273_v27 = vld [vmem:[%s617_s23 + $0xe0] sm:$0xff]  ;;  %v238_v34 = vld [vmem:[%s612_s20 + $0xe8] sm:$0xff]  ;;  %v352_v1 = vand.u32 2147483647, %v316_v30 }
  0x2b   : > { %v362_v9 = vadd.f32 %v361_v4, %v326_v62  ;;  %v337_v62 = vand.u32 2147483647, %v301_v51  ;;  %v308_v31 = vsub.f32 %v236_v18, %v272_v19  ;;  %v274_v35 = vld [vmem:[%s617_s23 + $0xe8] sm:$0xff]  ;;  %v309_v36 = vsub.f32 %v237_v26, %v273_v27  ;;  %v239_v39 = vld [vmem:[%s612_s20 + $0xf0] sm:$0xff]  ;;  %v240_v44 = vld [vmem:[%s612_s20 + $0xf8] sm:$0xff] }
  0x2c   : > { %v275_v40 = vld [vmem:[%s617_s23 + $0xf0] sm:$0xff]  ;;  %v310_v41 = vsub.f32 %v238_v34, %v274_v35  ;;  %v276_v45 = vld [vmem:[%s617_s23 + $0xf8] sm:$0xff]  ;;  %v241_v49 = vld [vmem:[%s612_s20 + $0x100] sm:$0xff] }
  0x2d   : > { %v363_v17 = vadd.f32 %v362_v9, %v327_v3  ;;  %v338_v3 = vand.u32 2147483647, %v302_v56  ;;  %v311_v46 = vsub.f32 %v239_v39, %v275_v40  ;;  %v277_v50 = vld [vmem:[%s617_s23 + $0x100] sm:$0xff]  ;;  %v312_v51 = vsub.f32 %v240_v44, %v276_v45 }
  0x2e   : > { %v313_v54 = vsub.f32 %v241_v49, %v277_v50 }
  0x2f   : > { %v364_v25 = vadd.f32 %v363_v17, %v328_v8  ;;  %v339_v8 = vand.u32 2147483647, %v303_v61  ;;  %v347_v55 = vand.u32 2147483647, %v311_v46  ;;  %v350_v61 = vand.u32 2147483647, %v314_v28 }
  0x30   : > { %v349_v59 = vand.u32 2147483647, %v313_v54 }
  0x31   : > { %v365_v33 = vadd.f32 %v364_v25, %v329_v16  ;;  %v340_v16 = vand.u32 2147483647, %v304_v2 }
  0x33   : > { %v366_v38 = vadd.f32 %v365_v33, %v330_v24  ;;  %v341_v24 = vand.u32 2147483647, %v305_v7 }
  0x35   : > { %v367_v43 = vadd.f32 %v366_v38, %v331_v32  ;;  %v342_v32 = vand.u32 2147483647, %v306_v13 }
  0x37   : > { %v368_v48 = vadd.f32 %v367_v43, %v332_v37  ;;  %v343_v37 = vand.u32 2147483647, %v307_v20 }
  0x39   : > { %v369_v53 = vadd.f32 %v368_v48, %v333_v42  ;;  %v344_v42 = vand.u32 2147483647, %v308_v31 }
  0x3b   : > { %v370_v58 = vadd.f32 %v369_v53, %v334_v47  ;;  %v345_v47 = vand.u32 2147483647, %v309_v36 }
  0x3d   : > { %v371_v63 = vadd.f32 %v370_v58, %v335_v52  ;;  %v346_v52 = vand.u32 2147483647, %v310_v41 }
  0x3f   : > { %v372_v4 = vadd.f32 %v371_v63, %v336_v57  ;;  %v348_v57 = vand.u32 2147483647, %v312_v51  ;;  %v351_v63 = vand.u32 2147483647, %v315_v29 }
  0x41   : > { %v373_v9 = vadd.f32 %v372_v4, %v337_v62 }
  0x43   : > { %v374_v17 = vadd.f32 %v373_v9, %v338_v3 }
  0x45   : > { %v375_v25 = vadd.f32 %v374_v17, %v339_v8 }
  0x47   : > { %v376_v33 = vadd.f32 %v375_v25, %v340_v16 }
  0x49   : > { %v377_v38 = vadd.f32 %v376_v33, %v341_v24 }
  0x4b   : > { %v378_v43 = vadd.f32 %v377_v38, %v342_v32 }
  0x4d   : > { %v379_v48 = vadd.f32 %v378_v43, %v343_v37 }
  0x4f   : > { %v380_v53 = vadd.f32 %v379_v48, %v344_v42 }
  0x51   : > { %v381_v56 = vadd.f32 %v380_v53, %v345_v47 }
  0x53   : > { %v382_v58 = vadd.f32 %v381_v56, %v346_v52 }
  0x55   : > { %v383_v60 = vadd.f32 %v382_v58, %v347_v55 }
  0x57   : > { %v384_v62 = vadd.f32 %v383_v60, %v348_v57 }
  0x59   : > { %v385_v0 = vadd.f32 %v384_v62, %v349_v59 }
  0x5b   : > { %v386_v2 = vadd.f32 %v385_v0, %v350_v61 }
  0x5d   : > { %v387_v3 = vadd.f32 %v386_v2, %v351_v63 }
  0x5f   : > { %v388_v4 = vadd.f32 %v387_v3, %v352_v1 }
  0x61   : > { %389 = vadd.xlane.f32.xlu0 %v388_v4 }
  0xee   : > { %v390_v12 = vpop.xlane.xlu0 %389 }
  0xef   : > { %v391_v21 = vrot.slane %v390_v12, 4 }
  0xf1   : > { %v392_v28 = vadd.f32 %v391_v21, %v390_v12 }
  0xf3   : > { %v393_v5 = vrot.slane %v392_v28, 2 }
  0xf5   : > { %v394_v6 = vadd.f32 %v393_v5, %v392_v28 }
  0xf7   : > { %v395_v14 = vrot.slane %v394_v6, 1 }
  0xf9   : > { %v396_v22 = vadd.f32 %v395_v14, %v394_v6 }
  0xfb   : > { %493 = vpush %v396_v22 }
 0x12c   : > { %s494_s26 = spop %493 }
 0x12d   : > { %s398_s27 = sadd.f32 %s494_s26, %s353_s25 }
 0x12f   : > { %400 = sst [smem:[#allocation2]] %s398_s27 }
 0x130   : > { %539 = shalt.err (!%p536_p12)
}
 0x131   : > { %s569_s7 = smov [#allocation2]  }
 0x132   : > { %497 = dma.smem_to_hbm (%p500_p7), %s569_s7, 16, %s744_s2, [#allocation3]  }
 0x133   : > { %553 = dma.done.wait (%p500_p7), [#allocation3], 16  }
 0x134   : > { %555 = vsyncadd (%p500_p7), [#allocation3], 4294967280 }
 0x135   : > { %414 = sfence }
 0x136 PF: > { %s13_s11 = sadd.s32 1, %s566_s11   ;;  %s745_s9 = smov %s562_s10 }
 0x137   : > { %p10_p13 = scmp.ge.s32.totalorder %s13_s11, 4   ;;  %s746_s10 = smov %s748_s13 }
 0x139   :  { %12 = sbr.rel (!%p10_p13) target bundleno = 2 (0x2), region = 64 }
 0x140   :  { %420 = vsyncpa [#allocation3], 1 }
 0x141   :  { %422 = vsyncpa [#allocation3 + $0x1], 1 }

// kernel: perception_loss.4
= control target key start
LH: loop header
LB: loop body
LE: loop exit
PB: predicated region body
PF: predicated region fallthrough
CT: control target
= control target key end

     0   :  { %s5944_s15 = smov 0   ;;  %s7181_s0 = inlined_call_operand.vmem [shape: f32[4,326,4], index: 0, kind: input, shape index: {}]   ;;  %s7182_s1 = inlined_call_operand.vmem [shape: f32[9,4,128], index: 1, kind: input, shape index: {}]   ;;  %s7183_s2 = inlined_call_operand.vmem [shape: f32[1,128], index: 2, kind: input, shape index: {}]   ;;  %s7184_s3 = inlined_call_operand.vmem [shape: f32[288,1], index: 3, kind: input, shape index: {}]   ;;  %s7185_s4 = inlined_call_operand.vmem [shape: f32[4,288,128], index: 4, kind: output, shape index: {}]  }
   0x1 LB: > { %s4419_s16 = sadd.s32 4294967295, %s5916_s15   ;;  %p4423_p0 = scmp.ge.s32.totalorder %s5916_s15, 1  ;;  %s5916_s15 = sphi %s5944_s15, %s14_s15  }
   0x2   : > { %p162_p1 = scmp.lt.s32.totalorder %s5916_s15, 5 }
   0x4   : > { %p163_p2 = pnand %p4423_p0, %p162_p1 }
   0x5   : > { %v4426_v0 = vld [vmem:[%s7182_s1 + $0x4] sm:$0xf] (!%p163_p2)  ;;  %vm382_vm0 = vcmask (!%p163_p2), 1043456   ;;  %v5958_v1 = vld [vmem:[%s7182_s1 + $0x10] sm:$0xf] (!%p163_p2)  ;;  %p188_p3 = scmp.lt.s32.totalorder (!%p163_p2), %s4419_s16, 3 }
   0x6   : > { %166 = sbr.rel (%p163_p2) target bundleno = 561 (0x231), region = 36  ;;  %5103 = vmatprep.subr.msk.mxu1 (!%p163_p2), %vm382_vm0, %v4426_v0  ;;  %5327 = vmatprep.subr.msk.mxu0 (!%p163_p2), %vm382_vm0, %v5958_v1  ;;  %v234_v2 = vld [vmem:[%s7182_s1] sm:$0xf] (!%p163_p2)  ;;  %v4615_v3 = vld [vmem:[%s7182_s1 + $0x14] sm:$0xf] (!%p163_p2)  ;;  %vm273_vm1 = vcmask (!%p163_p2), 31744  }
   0x7   : > { %5104 = vmatpush3.msk.msra.mxu1 (!%p163_p2), %vm382_vm0, %v4426_v0  ;;  %5328 = vmatpush3.msk.msra.mxu0 (!%p163_p2), %vm382_vm0, %v5958_v1  ;;  %v5995_v10 = vld [vmem:[%s7182_s1 + $0x18] sm:$0xf] (!%p163_p2)  ;;  %v6000_v11 = vld [vmem:[%s7182_s1 + $0x8] sm:$0xf] (!%p163_p2)  ;;  %v6083_v48 = vld [vmem:[%s7182_s1 + $0x1c] sm:$0xf] (!%p163_p2) }
   0x8   : > { %5159 = vmatprep.subr.msk.mxu1 (!%p163_p2), %vm382_vm0, %v234_v2  ;;  %5383 = vmatprep.subr.msk.mxu0 (!%p163_p2), %vm382_vm0, %v4615_v3 }
   0xd   : > { %s7187_s16 = smov (!%p188_p3, %s4419_s16), 3 }
   0xe   : > { %s5897_s25 = smul.u32 328, %s7187_s16 }
   0xf   : > { %s5898_s19 = smul.u32 288, %s7187_s16 }
  0x10   : > { %s5980_s28 = scalar_lea.vmem %s7181_s0, %s5897_s25 }
  0x11   : > { %v235_v4 = vld [vmem:[%s5980_s28 + $0x1] sm:$0xff]  ;;  %v1847_v5 = vld [vmem:[%s5980_s28 + $0x13] sm:$0xff]  ;;  %v236_v6 = vld [vmem:[%s5980_s28 + $0x9] sm:$0xff]  ;;  %s7050_s22 = scalar_lea.vmem %s7185_s4, %s5898_s19 }
  0x12   : > { %5105 = vmatprep.mubr.msk.f32.mxu1 %vm273_vm1, %v235_v4  ;;  %5329 = vmatprep.mubr.msk.f32.mxu0 %vm273_vm1, %v1847_v5  ;;  %v1848_v7 = vld [vmem:[%s5980_s28 + $0x1b] sm:$0xff]  ;;  %v237_v8 = vld [vmem:[%s5980_s28 + $0x11] sm:$0xff]  ;;  %v1849_v9 = vld [vmem:[%s5980_s28 + $0x23] sm:$0xff] }
  0x13   : > { %5106 = vmatmul.mubr.msk.f32.vlgmr.msra.gmra.mrb[0].mxu1 %vm273_vm1, %v236_v6  ;;  %5330 = vmatmul.mubr.msk.f32.vlgmr.msra.gmra.mrb[0].mxu0 %vm273_vm1, %v1848_v7  ;;  %v238_v12 = vld [vmem:[%s5980_s28 + $0x19] sm:$0xff]  ;;  %v1850_v13 = vld [vmem:[%s5980_s28 + $0x2b] sm:$0xff]  ;;  %v239_v14 = vld [vmem:[%s5980_s28 + $0x21] sm:$0xff] }
  0x14   : > { %5160 = vmatpush3.msk.msra.mxu1 %vm382_vm0, %v234_v2  ;;  %5384 = vmatpush3.msk.msra.mxu0 %vm382_vm0, %v4615_v3  ;;  %v1851_v15 = vld [vmem:[%s5980_s28 + $0x33] sm:$0xff]  ;;  %v240_v16 = vld [vmem:[%s5980_s28 + $0x29] sm:$0xff]  ;;  %v1852_v17 = vld [vmem:[%s5980_s28 + $0x3b] sm:$0xff] }
  0x15   : > { %5108 = vmatprep.mubr.msk.f32.mxu1 %vm273_vm1, %v237_v8  ;;  %5332 = vmatprep.mubr.msk.f32.mxu0 %vm273_vm1, %v1849_v9  ;;  %v241_v18 = vld [vmem:[%s5980_s28 + $0x31] sm:$0xff]  ;;  %v1853_v19 = vld [vmem:[%s5980_s28 + $0x43] sm:$0xff]  ;;  %v242_v20 = vld [vmem:[%s5980_s28 + $0x39] sm:$0xff] }
  0x16   : > { %5439 = vmatprep.subr.msk.mxu0 %vm382_vm0, %v5995_v10  ;;  %5215 = vmatprep.subr.msk.mxu1 %vm382_vm0, %v6000_v11  ;;  %v1854_v21 = vld [vmem:[%s5980_s28 + $0x4b] sm:$0xff]  ;;  %v243_v22 = vld [vmem:[%s5980_s28 + $0x41] sm:$0xff]  ;;  %v1855_v23 = vld [vmem:[%s5980_s28 + $0x53] sm:$0xff] }
  0x17   : > { %5109 = vmatmul.mubr.msk.f32.gmra.mrb[2].mxu1 %vm273_vm1, %v238_v12  ;;  %5333 = vmatmul.mubr.msk.f32.gmra.mrb[2].mxu0 %vm273_vm1, %v1850_v13  ;;  %v244_v24 = vld [vmem:[%s5980_s28 + $0x49] sm:$0xff]  ;;  %v1856_v25 = vld [vmem:[%s5980_s28 + $0x5b] sm:$0xff]  ;;  %v245_v26 = vld [vmem:[%s5980_s28 + $0x51] sm:$0xff] }
  0x18   : > { %5111 = vmatprep.mubr.msk.f32.mxu1 %vm273_vm1, %v239_v14  ;;  %5335 = vmatprep.mubr.msk.f32.mxu0 %vm273_vm1, %v1851_v15  ;;  %v1857_v27 = vld [vmem:[%s5980_s28 + $0x63] sm:$0xff]  ;;  %v246_v28 = vld [vmem:[%s5980_s28 + $0x59] sm:$0xff]  ;;  %v1858_v29 = vld [vmem:[%s5980_s28 + $0x6b] sm:$0xff] }
  0x19   : > { %v247_v30 = vld [vmem:[%s5980_s28 + $0x61] sm:$0xff]  ;;  %v1859_v31 = vld [vmem:[%s5980_s28 + $0x73] sm:$0xff]  ;;  %v248_v32 = vld [vmem:[%s5980_s28 + $0x69] sm:$0xff] }
  0x1a   : > { %v1860_v33 = vld [vmem:[%s5980_s28 + $0x7b] sm:$0xff]  ;;  %v249_v34 = vld [vmem:[%s5980_s28 + $0x71] sm:$0xff]  ;;  %v1861_v35 = vld [vmem:[%s5980_s28 + $0x83] sm:$0xff] }
  0x1b   : > { %5112 = vmatmul.mubr.msk.f32.gmra.mrb[4].mxu1 %vm273_vm1, %v240_v16  ;;  %5336 = vmatmul.mubr.msk.f32.gmra.mrb[4].mxu0 %vm273_vm1, %v1852_v17  ;;  %v250_v36 = vld [vmem:[%s5980_s28 + $0x79] sm:$0xff]  ;;  %v1862_v37 = vld [vmem:[%s5980_s28 + $0x8b] sm:$0xff]  ;;  %v251_v38 = vld [vmem:[%s5980_s28 + $0x81] sm:$0xff] }
  0x1c   : > { %5114 = vmatprep.mubr.msk.f32.mxu1 %vm273_vm1, %v241_v18  ;;  %5338 = vmatprep.mubr.msk.f32.mxu0 %vm273_vm1, %v1853_v19  ;;  %v1863_v39 = vld [vmem:[%s5980_s28 + $0x93] sm:$0xff]  ;;  %v252_v40 = vld [vmem:[%s5980_s28 + $0x89] sm:$0xff]  ;;  %v1864_v41 = vld [vmem:[%s5980_s28 + $0x9b] sm:$0xff] }
  0x1d   : > { %v253_v42 = vld [vmem:[%s5980_s28 + $0x91] sm:$0xff]  ;;  %v254_v44 = vld [vmem:[%s5980_s28 + $0x99] sm:$0xff]  ;;  %v255_v46 = vld [vmem:[%s5980_s28 + $0xa1] sm:$0xff] }
  0x1e   : > { %v2277_v43 = vld [vmem:[%s5980_s28 + $0x14] sm:$0xff]  ;;  %v2278_v45 = vld [vmem:[%s5980_s28 + $0x1c] sm:$0xff]  ;;  %v6078_v47 = vld [vmem:[%s5980_s28 + $0x24] sm:$0xff] }
  0x1f   : > { %5115 = vmatmul.mubr.msk.f32.gmra.mrb[6].mxu1 %vm273_vm1, %v242_v20  ;;  %5339 = vmatmul.mubr.msk.f32.gmra.mrb[6].mxu0 %vm273_vm1, %v1854_v21  ;;  %v256_v49 = vld [vmem:[%s5980_s28 + $0xa9] sm:$0xff]  ;;  %v257_v51 = vld [vmem:[%s5980_s28 + $0xb1] sm:$0xff]  ;;  %v258_v53 = vld [vmem:[%s5980_s28 + $0xb9] sm:$0xff] }
  0x20   : > { %5117 = vmatprep.mubr.msk.f32.mxu1 %vm273_vm1, %v243_v22  ;;  %5341 = vmatprep.mubr.msk.f32.mxu0 %vm273_vm1, %v1855_v23  ;;  %v6092_v50 = vld [vmem:[%s5980_s28 + $0x2c] sm:$0xff]  ;;  %v6098_v52 = vld [vmem:[%s5980_s28 + $0x34] sm:$0xff]  ;;  %v6110_v54 = vld [vmem:[%s5980_s28 + $0x3c] sm:$0xff] }
  0x21   : > { %v259_v55 = vld [vmem:[%s5980_s28 + $0xc1] sm:$0xff]  ;;  %v260_v57 = vld [vmem:[%s5980_s28 + $0xc9] sm:$0xff]  ;;  %v261_v59 = vld [vmem:[%s5980_s28 + $0xd1] sm:$0xff] }
  0x22   : > { %v6114_v56 = vld [vmem:[%s5980_s28 + $0x44] sm:$0xff]  ;;  %v6124_v58 = vld [vmem:[%s5980_s28 + $0x4c] sm:$0xff]  ;;  %v6128_v60 = vld [vmem:[%s5980_s28 + $0x54] sm:$0xff] }
  0x23   : > { %5118 = vmatmul.mubr.msk.f32.gmra.mrb[8].mxu1 %vm273_vm1, %v244_v24  ;;  %5342 = vmatmul.mubr.msk.f32.gmra.mrb[8].mxu0 %vm273_vm1, %v1856_v25  ;;  %v262_v61 = vld [vmem:[%s5980_s28 + $0xd9] sm:$0xff]  ;;  %v263_v63 = vld [vmem:[%s5980_s28 + $0xe1] sm:$0xff]  ;;  %v264_v2 = vld [vmem:[%s5980_s28 + $0xe9] sm:$0xff] }
  0x24   : > { %5120 = vmatprep.mubr.msk.f32.mxu1 %vm273_vm1, %v245_v26  ;;  %5344 = vmatprep.mubr.msk.f32.mxu0 %vm273_vm1, %v1857_v27  ;;  %v6138_v62 = vld [vmem:[%s5980_s28 + $0x5c] sm:$0xff]  ;;  %v6142_v0 = vld [vmem:[%s5980_s28 + $0x64] sm:$0xff]  ;;  %v6152_v3 = vld [vmem:[%s5980_s28 + $0x6c] sm:$0xff] }
  0x25   : > { %v265_v4 = vld [vmem:[%s5980_s28 + $0xf1] sm:$0xff]  ;;  %v266_v6 = vld [vmem:[%s5980_s28 + $0xf9] sm:$0xff]  ;;  %v267_v8 = vld [vmem:[%s5980_s28 + $0x101] sm:$0xff] }
  0x26   : > { %v6156_v5 = vld [vmem:[%s5980_s28 + $0x74] sm:$0xff]  ;;  %v6166_v7 = vld [vmem:[%s5980_s28 + $0x7c] sm:$0xff]  ;;  %v6170_v9 = vld [vmem:[%s5980_s28 + $0x84] sm:$0xff] }
  0x27   : > { %5121 = vmatmul.mubr.msk.f32.gmra.mrb[10].mxu1 %vm273_vm1, %v246_v28  ;;  %5345 = vmatmul.mubr.msk.f32.gmra.mrb[10].mxu0 %vm273_vm1, %v1858_v29  ;;  %v6180_v12 = vld [vmem:[%s5980_s28 + $0x8c] sm:$0xff]  ;;  %v6184_v14 = vld [vmem:[%s5980_s28 + $0x94] sm:$0xff]  ;;  %v6194_v16 = vld [vmem:[%s5980_s28 + $0x9c] sm:$0xff] }
  0x28   : > { %5123 = vmatprep.mubr.msk.f32.mxu1 %vm273_vm1, %v247_v30  ;;  %5347 = vmatprep.mubr.msk.f32.mxu0 %vm273_vm1, %v1859_v31  ;;  %v269_v13 = vld [vmem:[%s5980_s28 + $0x111] sm:$0xff]  ;;  %v270_v15 = vld [vmem:[%s5980_s28 + $0x119] sm:$0xff]  ;;  %v6198_v18 = vld [vmem:[%s5980_s28 + $0xa4] sm:$0xff] }
  0x29   : > { %v198_v17 = vld [vmem:[%s5980_s28] sm:$0xff]  ;;  %v199_v19 = vld [vmem:[%s5980_s28 + $0x8] sm:$0xff]  ;;  %v200_v21 = vld [vmem:[%s5980_s28 + $0x10] sm:$0xff] }
  0x2a   : > { %v6208_v20 = vld [vmem:[%s5980_s28 + $0xac] sm:$0xff]  ;;  %v6212_v22 = vld [vmem:[%s5980_s28 + $0xb4] sm:$0xff]  ;;  %v6227_v25 = vld [vmem:[%s5980_s28 + $0xbc] sm:$0xff] }
  0x2b   : > { %5124 = vmatmul.mubr.msk.f32.gmra.mrb[12].mxu1 %vm273_vm1, %v248_v32  ;;  %5348 = vmatmul.mubr.msk.f32.gmra.mrb[12].mxu0 %vm273_vm1, %v1860_v33  ;;  %v6217_v23 = vld [vmem:[%s7182_s1 + $0xc] sm:$0xf]  ;;  %v201_v24 = vld [vmem:[%s5980_s28 + $0x18] sm:$0xff]  ;;  %v202_v26 = vld [vmem:[%s5980_s28 + $0x20] sm:$0xff] }
  0x2c   : > { %5126 = vmatprep.mubr.msk.f32.mxu1 %vm273_vm1, %v249_v34  ;;  %5350 = vmatprep.mubr.msk.f32.mxu0 %vm273_vm1, %v1861_v35  ;;  %v6233_v27 = vld [vmem:[%s5980_s28 + $0xc4] sm:$0xff]  ;;  %v6245_v28 = vld [vmem:[%s5980_s28 + $0xcc] sm:$0xff]  ;;  %v6249_v30 = vld [vmem:[%s5980_s28 + $0xd4] sm:$0xff] }
  0x2d   : > { %v204_v29 = vld [vmem:[%s5980_s28 + $0x30] sm:$0xff]  ;;  %v205_v31 = vld [vmem:[%s5980_s28 + $0x38] sm:$0xff]  ;;  %v206_v33 = vld [vmem:[%s5980_s28 + $0x40] sm:$0xff] }
  0x2e   : > { %v6259_v32 = vld [vmem:[%s5980_s28 + $0xdc] sm:$0xff]  ;;  %v6263_v34 = vld [vmem:[%s5980_s28 + $0xe4] sm:$0xff] }
  0x2f   : > { %5127 = vmatmul.mubr.msk.f32.gmra.mrb[14].mxu1 %vm273_vm1, %v250_v36  ;;  %5351 = vmatmul.mubr.msk.f32.gmra.mrb[14].mxu0 %vm273_vm1, %v1862_v37  ;;  %v207_v35 = vld [vmem:[%s5980_s28 + $0x48] sm:$0xff]  ;;  %v208_v37 = vld [vmem:[%s5980_s28 + $0x50] sm:$0xff] }
  0x30   : > { %5129 = vmatprep.mubr.msk.f32.mxu1 %vm273_vm1, %v251_v38  ;;  %5353 = vmatprep.mubr.msk.f32.mxu0 %vm273_vm1, %v1863_v39  ;;  %v6273_v36 = vld [vmem:[%s5980_s28 + $0xec] sm:$0xff]  ;;  %v6277_v38 = vld [vmem:[%s5980_s28 + $0xf4] sm:$0xff] }
  0x31   : > { %v209_v39 = vld [vmem:[%s5980_s28 + $0x58] sm:$0xff] }
  0x33   : > { %5130 = vmatmul.mubr.msk.f32.gmra.mrb[16].mxu1 %vm273_vm1, %v252_v40  ;;  %5354 = vmatmul.mubr.msk.f32.gmra.mrb[16].mxu0 %vm273_vm1, %v1864_v41  ;;  %v6287_v40 = vld [vmem:[%s5980_s28 + $0xfc] sm:$0xff] }
  0x34   : > { %5132 = vmatprep.mubr.msk.f32.mxu1 %vm273_vm1, %v253_v42  ;;  %5385 = vmatprep.mubr.msk.f32.mxu0 %vm273_vm1, %v2277_v43  ;;  %v210_v41 = vld [vmem:[%s5980_s28 + $0x60] sm:$0xff]  ;;  %v211_v43 = vld [vmem:[%s5980_s28 + $0x68] sm:$0xff] }
  0x35   : > { %v6291_v42 = vld [vmem:[%s5980_s28 + $0x104] sm:$0xff] }
  0x37   : > { %5133 = vmatmul.mubr.msk.f32.gmra.mrb[18].mxu1 %vm273_vm1, %v254_v44  ;;  %5386 = vmatmul.mubr.msk.f32.vlgmr.msra.gmra.mrb[0].mxu0 %vm273_vm1, %v2278_v45  ;;  %v6301_v44 = vld [vmem:[%s5980_s28 + $0x10c] sm:$0xff] }
  0x38   : > { %5440 = vmatpush3.msk.msra.mxu0 %vm382_vm0, %v5995_v10  ;;  %5135 = vmatprep.mubr.msk.f32.mxu1 %vm273_vm1, %v255_v46  ;;  %v268_v10 = vld [vmem:[%s5980_s28 + $0x109] sm:$0xff]  ;;  %v6305_v46 = vld [vmem:[%s5980_s28 + $0x114] sm:$0xff] }
  0x39   : > { %5388 = vmatprep.mubr.msk.f32.mxu0 %vm273_vm1, %v6078_v47  ;;  %5495 = vmatprep.subr.msk.mxu0 %vm382_vm0, %v6083_v48  ;;  %v212_v45 = vld [vmem:[%s5980_s28 + $0x70] sm:$0xff] }
  0x3b   : > { %5136 = vmatmul.mubr.msk.f32.gmra.mrb[20].mxu1 %vm273_vm1, %v256_v49  ;;  %5389 = vmatmul.mubr.msk.f32.gmra.mrb[2].mxu0 %vm273_vm1, %v6092_v50  ;;  %v213_v49 = vld [vmem:[%s5980_s28 + $0x78] sm:$0xff] }
  0x3c   : > { %5138 = vmatprep.mubr.msk.f32.mxu1 %vm273_vm1, %v257_v51  ;;  %5391 = vmatprep.mubr.msk.f32.mxu0 %vm273_vm1, %v6098_v52  ;;  %v6315_v51 = vld [vmem:[%s5980_s28 + $0x11c] sm:$0xff] }
  0x3f   : > { %5139 = vmatmul.mubr.msk.f32.gmra.mrb[22].mxu1 %vm273_vm1, %v258_v53  ;;  %5392 = vmatmul.mubr.msk.f32.gmra.mrb[4].mxu0 %vm273_vm1, %v6110_v54  ;;  %v214_v53 = vld [vmem:[%s5980_s28 + $0x80] sm:$0xff] }
  0x40   : > { %5141 = vmatprep.mubr.msk.f32.mxu1 %vm273_vm1, %v259_v55  ;;  %5394 = vmatprep.mubr.msk.f32.mxu0 %vm273_vm1, %v6114_v56  ;;  %v6319_v55 = vld [vmem:[%s5980_s28 + $0x124] sm:$0xff] }
  0x43   : > { %5142 = vmatmul.mubr.msk.f32.gmra.mrb[24].mxu1 %vm273_vm1, %v260_v57  ;;  %5395 = vmatmul.mubr.msk.f32.gmra.mrb[6].mxu0 %vm273_vm1, %v6124_v58  ;;  %v215_v57 = vld [vmem:[%s5980_s28 + $0x88] sm:$0xff] }
  0x44   : > { %5144 = vmatprep.mubr.msk.f32.mxu1 %vm273_vm1, %v261_v59  ;;  %5397 = vmatprep.mubr.msk.f32.mxu0 %vm273_vm1, %v6128_v60  ;;  %v6329_v59 = vld [vmem:[%s5980_s28 + $0x12c] sm:$0xff] }
  0x47   : > { %5145 = vmatmul.mubr.msk.f32.gmra.mrb[26].mxu1 %vm273_vm1, %v262_v61  ;;  %5398 = vmatmul.mubr.msk.f32.gmra.mrb[8].mxu0 %vm273_vm1, %v6138_v62  ;;  %v216_v61 = vld [vmem:[%s5980_s28 + $0x90] sm:$0xff] }
  0x48   : > { %5147 = vmatprep.mubr.msk.f32.mxu1 %vm273_vm1, %v263_v63  ;;  %5400 = vmatprep.mubr.msk.f32.mxu0 %vm273_vm1, %v6142_v0  ;;  %v217_v63 = vld [vmem:[%s5980_s28 + $0x98] sm:$0xff] }
  0x4b   : > { %5148 = vmatmul.mubr.msk.f32.gmra.mrb[28].mxu1 %vm273_vm1, %v264_v2  ;;  %5401 = vmatmul.mubr.msk.f32.gmra.mrb[10].mxu0 %vm273_vm1, %v6152_v3  ;;  %v218_v2 = vld [vmem:[%s5980_s28 + $0xa0] sm:$0xff] }
  0x4c   : > { %5150 = vmatprep.mubr.msk.f32.mxu1 %vm273_vm1, %v265_v4  ;;  %5403 = vmatprep.mubr.msk.f32.mxu0 %vm273_vm1, %v6156_v5  ;;  %v6343_v4 = vld [vmem:[%s7182_s1 + $0x20] sm:$0xf] }
  0x4f   : > { %5151 = vmatmul.mubr.msk.f32.gmra.mrb[30].mxu1 %vm273_vm1, %v266_v6  ;;  %5404 = vmatmul.mubr.msk.f32.gmra.mrb[12].mxu0 %vm273_vm1, %v6166_v7  ;;  %v220_v6 = vld [vmem:[%s5980_s28 + $0xb0] sm:$0xff] }
  0x50   : > { %5153 = vmatprep.mubr.msk.f32.mxu1 %vm273_vm1, %v267_v8  ;;  %5406 = vmatprep.mubr.msk.f32.mxu0 %vm273_vm1, %v6170_v9  ;;  %v233_v8 = vld [vmem:[%s5980_s28 + $0x118] sm:$0xff] }
  0x53   : > { %5154 = vmatmul.mubr.msk.f32.gmra.mrb[32].mxu1 %vm273_vm1, %v268_v10  ;;  %5407 = vmatmul.mubr.msk.f32.gmra.mrb[14].mxu0 %vm273_vm1, %v6180_v12  ;;  %v988_v10 = vld [vmem:[%s5980_s28 + $0xa] sm:$0xff] }
  0x54   : > { %5156 = vmatprep.mubr.msk.f32.mxu1 %vm273_vm1, %v269_v13  ;;  %5409 = vmatprep.mubr.msk.f32.mxu0 %vm273_vm1, %v6184_v14  ;;  %v6431_v13 = vld [vmem:[%s5980_s28 + $0x1a] sm:$0xff] }
  0x57   : > { %5157 = vmatmul.mubr.msk.f32.gmra.mrb[34].mxu1 %vm273_vm1, %v270_v15  ;;  %5410 = vmatmul.mubr.msk.f32.gmra.mrb[16].mxu0 %vm273_vm1, %v6194_v16  ;;  %v5918_v15 = vmov 0  }
  0x58   : > { %5161 = vmatprep.mubr.msk.f32.mxu1 %vm273_vm1, %v198_v17  ;;  %5412 = vmatprep.mubr.msk.f32.mxu0 %vm273_vm1, %v6198_v18  ;;  %v4076_v17 = vld [vmem:[%s7184_s3] sm:$0xff] }
  0x59   : > { %5909 = vset.pattern.permute.xlu1 %v5918_v15  ;;  %5908 = vset.pattern.permute.xlu0 %v5918_v15  ;;  %v6681_v15 = vld [vmem:[%s5980_s28 + $0xe2] sm:$0xff] }
  0x5a   : > { %4114 = vperm.xlu0 %5908, %v4076_v17   ;;  %v4101_v17 = vld [vmem:[%s7184_s3 + $0xc8] sm:$0xff] }
  0x5b   : > { %5162 = vmatmul.mubr.msk.f32.vlgmr.msra.gmra.mrb[0].mxu1 %vm273_vm1, %v199_v19  ;;  %5413 = vmatmul.mubr.msk.f32.gmra.mrb[18].mxu0 %vm273_vm1, %v6208_v20  ;;  %v6458_v19 = vld [vmem:[%s5980_s28 + $0x32] sm:$0xff] }
  0x5c   : > { %5216 = vmatpush3.msk.msra.mxu1 %vm382_vm0, %v6000_v11  ;;  %5164 = vmatprep.mubr.msk.f32.mxu1 %vm273_vm1, %v200_v21  ;;  %v203_v11 = vld [vmem:[%s5980_s28 + $0x28] sm:$0xff] }
  0x5d   : > { %5415 = vmatprep.mubr.msk.f32.mxu0 %vm273_vm1, %v6212_v22  ;;  %5271 = vmatprep.subr.msk.mxu1 %vm382_vm0, %v6217_v23  ;;  %v4077_v21 = vld [vmem:[%s7184_s3 + $0x8] sm:$0xff] }
  0x5e   : > { %4119 = vperm.xlu0 %5908, %v4077_v21   ;;  %v6697_v21 = vld [vmem:[%s5980_s28 + $0xea] sm:$0xff] }
  0x5f   : > { %5165 = vmatmul.mubr.msk.f32.gmra.mrb[2].mxu1 %vm273_vm1, %v201_v24  ;;  %5416 = vmatmul.mubr.msk.f32.gmra.mrb[20].mxu0 %vm273_vm1, %v6227_v25  ;;  %v4081_v24 = vld [vmem:[%s7184_s3 + $0x28] sm:$0xff] }
  0x60   : > { %5167 = vmatprep.mubr.msk.f32.mxu1 %vm273_vm1, %v202_v26  ;;  %5418 = vmatprep.mubr.msk.f32.mxu0 %vm273_vm1, %v6233_v27  ;;  %v6495_v26 = vld [vmem:[%s5980_s28 + $0x4a] sm:$0xff] }
  0x63   : > { %5168 = vmatmul.mubr.msk.f32.gmra.mrb[4].mxu1 %vm273_vm1, %v203_v11  ;;  %5419 = vmatmul.mubr.msk.f32.gmra.mrb[22].mxu0 %vm273_vm1, %v6245_v28  ;;  %v4083_v11 = vld [vmem:[%s7184_s3 + $0x38] sm:$0xff] }
  0x64   : > { %5170 = vmatprep.mubr.msk.f32.mxu1 %vm273_vm1, %v204_v29  ;;  %5421 = vmatprep.mubr.msk.f32.mxu0 %vm273_vm1, %v6249_v30  ;;  %v6515_v29 = vld [vmem:[%s5980_s28 + $0x5a] sm:$0xff] }
  0x67   : > { %5171 = vmatmul.mubr.msk.f32.gmra.mrb[6].mxu1 %vm273_vm1, %v205_v31  ;;  %5422 = vmatmul.mubr.msk.f32.gmra.mrb[24].mxu0 %vm273_vm1, %v6259_v32  ;;  %v4085_v31 = vld [vmem:[%s7184_s3 + $0x48] sm:$0xff] }
  0x68   : > { %5173 = vmatprep.mubr.msk.f32.mxu1 %vm273_vm1, %v206_v33  ;;  %5424 = vmatprep.mubr.msk.f32.mxu0 %vm273_vm1, %v6263_v34  ;;  %v6535_v33 = vld [vmem:[%s5980_s28 + $0x6a] sm:$0xff] }
  0x6b   : > { %5174 = vmatmul.mubr.msk.f32.gmra.mrb[8].mxu1 %vm273_vm1, %v207_v35  ;;  %5425 = vmatmul.mubr.msk.f32.gmra.mrb[26].mxu0 %vm273_vm1, %v6273_v36  ;;  %v4087_v35 = vld [vmem:[%s7184_s3 + $0x58] sm:$0xff] }
  0x6c   : > { %5176 = vmatprep.mubr.msk.f32.mxu1 %vm273_vm1, %v208_v37  ;;  %5427 = vmatprep.mubr.msk.f32.mxu0 %vm273_vm1, %v6277_v38  ;;  %v6555_v37 = vld [vmem:[%s5980_s28 + $0x7a] sm:$0xff] }
  0x6f   : > { %5177 = vmatmul.mubr.msk.f32.gmra.mrb[10].mxu1 %vm273_vm1, %v209_v39  ;;  %5428 = vmatmul.mubr.msk.f32.gmra.mrb[28].mxu0 %vm273_vm1, %v6287_v40  ;;  %v2741_v39 = vld [vmem:[%s5980_s28 + $0x134] sm:$0xff] }
  0x70   : > { %5179 = vmatprep.mubr.msk.f32.mxu1 %vm273_vm1, %v210_v41  ;;  %5430 = vmatprep.mubr.msk.f32.mxu0 %vm273_vm1, %v6291_v42  ;;  %v4088_v41 = vld [vmem:[%s7184_s3 + $0x60] sm:$0xff] }
  0x73   : > { %5180 = vmatmul.mubr.msk.f32.gmra.mrb[12].mxu1 %vm273_vm1, %v211_v43  ;;  %5431 = vmatmul.mubr.msk.f32.gmra.mrb[30].mxu0 %vm273_vm1, %v6301_v44  ;;  %v2742_v43 = vld [vmem:[%s5980_s28 + $0x13c] sm:$0xff] }
  0x74   : > { %5182 = vmatprep.mubr.msk.f32.mxu1 %vm273_vm1, %v212_v45  ;;  %5433 = vmatprep.mubr.msk.f32.mxu0 %vm273_vm1, %v6305_v46  ;;  %v3137_v45 = vld [vmem:[%s5980_s28 + $0x25] sm:$0xff] }
  0x77   : > { %5183 = vmatmul.mubr.msk.f32.gmra.mrb[14].mxu1 %vm273_vm1, %v213_v49  ;;  %5434 = vmatmul.mubr.msk.f32.gmra.mrb[32].mxu0 %vm273_vm1, %v6315_v51  ;;  %v4090_v49 = vld [vmem:[%s7184_s3 + $0x70] sm:$0xff] }
  0x78   : > { %5185 = vmatprep.mubr.msk.f32.mxu1 %vm273_vm1, %v214_v53  ;;  %5436 = vmatprep.mubr.msk.f32.mxu0 %vm273_vm1, %v6319_v55  ;;  %v3138_v53 = vld [vmem:[%s5980_s28 + $0x2d] sm:$0xff] }
  0x7b   : > { %5186 = vmatmul.mubr.msk.f32.gmra.mrb[16].mxu1 %vm273_vm1, %v215_v57  ;;  %5437 = vmatmul.mubr.msk.f32.gmra.mrb[34].mxu0 %vm273_vm1, %v6329_v59  ;;  %v3139_v57 = vld [vmem:[%s5980_s28 + $0x35] sm:$0xff] }
  0x7c   : > { %5188 = vmatprep.mubr.msk.f32.mxu1 %vm273_vm1, %v216_v61  ;;  %5441 = vmatprep.mubr.msk.f32.mxu0 %vm273_vm1, %v6078_v47  ;;  %v219_v47 = vld [vmem:[%s5980_s28 + $0xa8] sm:$0xff]  ;;  %v4092_v61 = vld [vmem:[%s7184_s3 + $0x80] sm:$0xff] }
  0x7f   : > { %5189 = vmatmul.mubr.msk.f32.gmra.mrb[18].mxu1 %vm273_vm1, %v217_v63  ;;  %5442 = vmatmul.mubr.msk.f32.vlgmr.msra.gmra.mrb[0].mxu0 %vm273_vm1, %v6092_v50  ;;  %v222_v50 = vld [vmem:[%s5980_s28 + $0xc0] sm:$0xff]  ;;  %v6616_v63 = vld [vmem:[%s5980_s28 + $0xaa] sm:$0xff] }
  0x80   : > { %5496 = vmatpush3.msk.msra.mxu0 %vm382_vm0, %v6083_v48  ;;  %5191 = vmatprep.mubr.msk.f32.mxu1 %vm273_vm1, %v218_v2  ;;  %v221_v48 = vld [vmem:[%s5980_s28 + $0xb8] sm:$0xff] }
  0x81   : > { %5444 = vmatprep.mubr.msk.f32.mxu0 %vm273_vm1, %v6098_v52  ;;  %5551 = vmatprep.subr.msk.mxu0 %vm382_vm0, %v6343_v4  ;;  %v223_v52 = vld [vmem:[%s5980_s28 + $0xc8] sm:$0xff]  ;;  %v3140_v2 = vld [vmem:[%s5980_s28 + $0x3d] sm:$0xff] }
  0x83   : > { %5192 = vmatmul.mubr.msk.f32.gmra.mrb[20].mxu1 %vm273_vm1, %v219_v47  ;;  %5445 = vmatmul.mubr.msk.f32.gmra.mrb[2].mxu0 %vm273_vm1, %v6110_v54  ;;  %v224_v54 = vld [vmem:[%s5980_s28 + $0xd0] sm:$0xff] }
  0x84   : > { %5194 = vmatprep.mubr.msk.f32.mxu1 %vm273_vm1, %v220_v6  ;;  %5447 = vmatprep.mubr.msk.f32.mxu0 %vm273_vm1, %v6114_v56  ;;  %v225_v56 = vld [vmem:[%s5980_s28 + $0xd8] sm:$0xff]  ;;  %v3141_v6 = vld [vmem:[%s5980_s28 + $0x45] sm:$0xff] }
  0x85   : > { %v6621_v47 = vld [vmem:[%s5980_s28 + $0xb2] sm:$0xff] }
  0x87   : > { %5195 = vmatmul.mubr.msk.f32.gmra.mrb[22].mxu1 %vm273_vm1, %v221_v48  ;;  %5448 = vmatmul.mubr.msk.f32.gmra.mrb[4].mxu0 %vm273_vm1, %v6124_v58  ;;  %v226_v58 = vld [vmem:[%s5980_s28 + $0xe0] sm:$0xff]  ;;  %v4094_v48 = vld [vmem:[%s7184_s3 + $0x90] sm:$0xff] }
  0x88   : > { %5197 = vmatprep.mubr.msk.f32.mxu1 %vm273_vm1, %v222_v50  ;;  %5450 = vmatprep.mubr.msk.f32.mxu0 %vm273_vm1, %v6128_v60  ;;  %v227_v60 = vld [vmem:[%s5980_s28 + $0xe8] sm:$0xff]  ;;  %v6637_v50 = vld [vmem:[%s5980_s28 + $0xba] sm:$0xff] }
  0x8b   : > { %5198 = vmatmul.mubr.msk.f32.gmra.mrb[24].mxu1 %vm273_vm1, %v223_v52  ;;  %5451 = vmatmul.mubr.msk.f32.gmra.mrb[6].mxu0 %vm273_vm1, %v6138_v62  ;;  %v228_v62 = vld [vmem:[%s5980_s28 + $0xf0] sm:$0xff] }
  0x8c   : > { %5200 = vmatprep.mubr.msk.f32.mxu1 %vm273_vm1, %v224_v54  ;;  %5453 = vmatprep.mubr.msk.f32.mxu0 %vm273_vm1, %v6142_v0  ;;  %v229_v0 = vld [vmem:[%s5980_s28 + $0xf8] sm:$0xff]  ;;  %v3142_v52 = vld [vmem:[%s5980_s28 + $0x4d] sm:$0xff]  ;;  %v6641_v54 = vld [vmem:[%s5980_s28 + $0xc2] sm:$0xff] }
  0x8f   : > { %5201 = vmatmul.mubr.msk.f32.gmra.mrb[26].mxu1 %vm273_vm1, %v225_v56  ;;  %5454 = vmatmul.mubr.msk.f32.gmra.mrb[8].mxu0 %vm273_vm1, %v6152_v3  ;;  %v230_v3 = vld [vmem:[%s5980_s28 + $0x100] sm:$0xff]  ;;  %v3143_v56 = vld [vmem:[%s5980_s28 + $0x55] sm:$0xff] }
  0x90   : > { %5203 = vmatprep.mubr.msk.f32.mxu1 %vm273_vm1, %v226_v58  ;;  %5456 = vmatprep.mubr.msk.f32.mxu0 %vm273_vm1, %v6156_v5  ;;  %v231_v5 = vld [vmem:[%s5980_s28 + $0x108] sm:$0xff] }
  0x91   : > { %v4097_v58 = vld [vmem:[%s7184_s3 + $0xa8] sm:$0xff] }
  0x93   : > { %5204 = vmatmul.mubr.msk.f32.gmra.mrb[28].mxu1 %vm273_vm1, %v227_v60  ;;  %5457 = vmatmul.mubr.msk.f32.gmra.mrb[10].mxu0 %vm273_vm1, %v6166_v7  ;;  %v232_v7 = vld [vmem:[%s5980_s28 + $0x110] sm:$0xff]  ;;  %v4096_v60 = vld [vmem:[%s7184_s3 + $0xa0] sm:$0xff] }
  0x94   : > { %5206 = vmatprep.mubr.msk.f32.mxu1 %vm273_vm1, %v228_v62  ;;  %5459 = vmatprep.mubr.msk.f32.mxu0 %vm273_vm1, %v6170_v9  ;;  %v987_v9 = vld [vmem:[%s5980_s28 + $0x2] sm:$0xff]  ;;  %v6657_v62 = vld [vmem:[%s5980_s28 + $0xca] sm:$0xff] }
  0x97   : > { %5207 = vmatmul.mubr.msk.f32.gmra.mrb[30].mxu1 %vm273_vm1, %v229_v0  ;;  %5460 = vmatmul.mubr.msk.f32.gmra.mrb[12].mxu0 %vm273_vm1, %v6180_v12  ;;  %v6421_v12 = vld [vmem:[%s5980_s28 + $0x12] sm:$0xff]  ;;  %v3144_v0 = vld [vmem:[%s5980_s28 + $0x5d] sm:$0xff] }
  0x98   : > { %5209 = vmatprep.mubr.msk.f32.mxu1 %vm273_vm1, %v230_v3  ;;  %5462 = vmatprep.mubr.msk.f32.mxu0 %vm273_vm1, %v6184_v14  ;;  %v6436_v14 = vld [vmem:[%s5980_s28 + $0x22] sm:$0xff]  ;;  %v6661_v3 = vld [vmem:[%s5980_s28 + $0xd2] sm:$0xff] }
  0x9b   : > { %5210 = vmatmul.mubr.msk.f32.gmra.mrb[32].mxu1 %vm273_vm1, %v231_v5  ;;  %5463 = vmatmul.mubr.msk.f32.gmra.mrb[14].mxu0 %vm273_vm1, %v6194_v16  ;;  %v4078_v16 = vld [vmem:[%s7184_s3 + $0x10] sm:$0xff]  ;;  %v3145_v5 = vld [vmem:[%s5980_s28 + $0x65] sm:$0xff] }
  0x9c   : > { %5212 = vmatprep.mubr.msk.f32.mxu1 %vm273_vm1, %v232_v7  ;;  %5465 = vmatprep.mubr.msk.f32.mxu0 %vm273_vm1, %v6198_v18  ;;  %v6455_v18 = vld [vmem:[%s5980_s28 + $0x2a] sm:$0xff]  ;;  %v4099_v7 = vld [vmem:[%s7184_s3 + $0xb8] sm:$0xff] }
  0x9d   : > { %4124 = vperm.xlu1 %5909, %v4078_v16   ;;  %v3147_v16 = vld [vmem:[%s5980_s28 + $0x75] sm:$0xff] }
  0x9f   : > { %5213 = vmatmul.mubr.msk.f32.gmra.mrb[34].mxu1 %vm273_vm1, %v233_v8  ;;  %5466 = vmatmul.mubr.msk.f32.gmra.mrb[16].mxu0 %vm273_vm1, %v6208_v20  ;;  %v4079_v20 = vld [vmem:[%s7184_s3 + $0x18] sm:$0xff]  ;;  %v4098_v8 = vld [vmem:[%s7184_s3 + $0xb0] sm:$0xff] }
  0xa0   : > { %5217 = vmatprep.mubr.msk.f32.mxu1 %vm273_vm1, %v987_v9  ;;  %5468 = vmatprep.mubr.msk.f32.mxu0 %vm273_vm1, %v6212_v22  ;;  %v6475_v22 = vld [vmem:[%s5980_s28 + $0x3a] sm:$0xff] }
  0xa1   : > { %4129 = vperm.xlu1 %5909, %v4079_v20   ;;  %v6677_v9 = vld [vmem:[%s5980_s28 + $0xda] sm:$0xff] }
  0xa2   : > { %v4100_v20 = vld [vmem:[%s7184_s3 + $0xc0] sm:$0xff] }
  0xa3   : > { %5218 = vmatmul.mubr.msk.f32.vlgmr.msra.gmra.mrb[0].mxu1 %vm273_vm1, %v988_v10  ;;  %5469 = vmatmul.mubr.msk.f32.gmra.mrb[18].mxu0 %vm273_vm1, %v6227_v25  ;;  %v4080_v25 = vld [vmem:[%s7184_s3 + $0x20] sm:$0xff]  ;;  %v3146_v10 = vld [vmem:[%s5980_s28 + $0x6d] sm:$0xff] }
  0xa4   : > { %5272 = vmatpush3.msk.msra.mxu1 %vm382_vm0, %v6217_v23  ;;  %5220 = vmatprep.mubr.msk.f32.mxu1 %vm273_vm1, %v6421_v12  ;;  %v6478_v23 = vld [vmem:[%s5980_s28 + $0x42] sm:$0xff] }
  0xa5   : > { %5471 = vmatprep.mubr.msk.f32.mxu0 %vm273_vm1, %v6233_v27  ;;  %5607 = vmatprep.subr.msk.mxu1 %vm382_vm0, %v5958_v1  ;;  %v6498_v27 = vld [vmem:[%s5980_s28 + $0x52] sm:$0xff] }
  0xa6   : > { %4139 = vperm.xlu1 %5909, %v4081_v24   ;;  %4134 = vperm.xlu0 %5908, %v4080_v25   ;;  %v3148_v24 = vld [vmem:[%s5980_s28 + $0x7d] sm:$0xff]  ;;  %v6701_v25 = vld [vmem:[%s5980_s28 + $0xf2] sm:$0xff] }
  0xa7   : > { %5221 = vmatmul.mubr.msk.f32.gmra.mrb[2].mxu1 %vm273_vm1, %v6431_v13  ;;  %5472 = vmatmul.mubr.msk.f32.gmra.mrb[20].mxu0 %vm273_vm1, %v6245_v28  ;;  %v4082_v28 = vld [vmem:[%s7184_s3 + $0x30] sm:$0xff] }
  0xa8   : > { %5223 = vmatprep.mubr.msk.f32.mxu1 %vm273_vm1, %v6436_v14  ;;  %5474 = vmatprep.mubr.msk.f32.mxu0 %vm273_vm1, %v6249_v30  ;;  %v6518_v30 = vld [vmem:[%s5980_s28 + $0x62] sm:$0xff] }
  0xaa   : > { %4149 = vperm.xlu1 %5909, %v4083_v11   ;;  %4144 = vperm.xlu0 %5908, %v4082_v28   ;;  %v3149_v11 = vld [vmem:[%s5980_s28 + $0x85] sm:$0xff]  ;;  %v4103_v28 = vld [vmem:[%s7184_s3 + $0xd8] sm:$0xff] }
  0xab   : > { %5224 = vmatmul.mubr.msk.f32.gmra.mrb[4].mxu1 %vm273_vm1, %v6455_v18  ;;  %5475 = vmatmul.mubr.msk.f32.gmra.mrb[22].mxu0 %vm273_vm1, %v6259_v32  ;;  %v4084_v32 = vld [vmem:[%s7184_s3 + $0x40] sm:$0xff] }
  0xac   : > { %5226 = vmatprep.mubr.msk.f32.mxu1 %vm273_vm1, %v6458_v19  ;;  %5477 = vmatprep.mubr.msk.f32.mxu0 %vm273_vm1, %v6263_v34  ;;  %v6538_v34 = vld [vmem:[%s5980_s28 + $0x72] sm:$0xff] }
  0xae   : > { %4159 = vperm.xlu1 %5909, %v4085_v31   ;;  %4154 = vperm.xlu0 %5908, %v4084_v32   ;;  %v4102_v31 = vld [vmem:[%s7184_s3 + $0xd0] sm:$0xff]  ;;  %v6717_v32 = vld [vmem:[%s5980_s28 + $0xfa] sm:$0xff] }
  0xaf   : > { %5227 = vmatmul.mubr.msk.f32.gmra.mrb[6].mxu1 %vm273_vm1, %v6475_v22  ;;  %5478 = vmatmul.mubr.msk.f32.gmra.mrb[24].mxu0 %vm273_vm1, %v6273_v36  ;;  %v4086_v36 = vld [vmem:[%s7184_s3 + $0x50] sm:$0xff] }
  0xb0   : > { %5229 = vmatprep.mubr.msk.f32.mxu1 %vm273_vm1, %v6478_v23  ;;  %5480 = vmatprep.mubr.msk.f32.mxu0 %vm273_vm1, %v6277_v38  ;;  %v6558_v38 = vld [vmem:[%s5980_s28 + $0x82] sm:$0xff] }
  0xb2   : > { %4169 = vperm.xlu1 %5909, %v4087_v35   ;;  %4164 = vperm.xlu0 %5908, %v4086_v36   ;;  %v3150_v35 = vld [vmem:[%s5980_s28 + $0x8d] sm:$0xff]  ;;  %v6721_v36 = vld [vmem:[%s5980_s28 + $0x102] sm:$0xff] }
  0xb3   : > { %5230 = vmatmul.mubr.msk.f32.gmra.mrb[8].mxu1 %vm273_vm1, %v6495_v26  ;;  %5481 = vmatmul.mubr.msk.f32.gmra.mrb[26].mxu0 %vm273_vm1, %v6287_v40  ;;  %v4089_v40 = vld [vmem:[%s7184_s3 + $0x68] sm:$0xff] }
  0xb4   : > { %5232 = vmatprep.mubr.msk.f32.mxu1 %vm273_vm1, %v6498_v27  ;;  %5483 = vmatprep.mubr.msk.f32.mxu0 %vm273_vm1, %v6291_v42  ;;  %v6575_v42 = vld [vmem:[%s5980_s28 + $0x8a] sm:$0xff] }
  0xb6   : > { %4179 = vperm.xlu1 %5909, %v4089_v40   ;;  %4174 = vperm.xlu0 %5908, %v4088_v41   ;;  %v4105_v40 = vld [vmem:[%s7184_s3 + $0xe8] sm:$0xff]  ;;  %v4104_v41 = vld [vmem:[%s7184_s3 + $0xe0] sm:$0xff] }
  0xb7   : > { %5233 = vmatmul.mubr.msk.f32.gmra.mrb[10].mxu1 %vm273_vm1, %v6515_v29  ;;  %5484 = vmatmul.mubr.msk.f32.gmra.mrb[28].mxu0 %vm273_vm1, %v6301_v44  ;;  %v6579_v44 = vld [vmem:[%s5980_s28 + $0x92] sm:$0xff] }
  0xb8   : > { %5235 = vmatprep.mubr.msk.f32.mxu1 %vm273_vm1, %v6518_v30  ;;  %5486 = vmatprep.mubr.msk.f32.mxu0 %vm273_vm1, %v6305_v46  ;;  %v4091_v46 = vld [vmem:[%s7184_s3 + $0x78] sm:$0xff] }
  0xba   : > { %4189 = vperm.xlu1 %5909, %v4091_v46   ;;  %4184 = vperm.xlu0 %5908, %v4090_v49   ;;  %v6741_v46 = vld [vmem:[%s5980_s28 + $0x112] sm:$0xff]  ;;  %v3153_v49 = vld [vmem:[%s5980_s28 + $0xa5] sm:$0xff] }
  0xbb   : > { %5236 = vmatmul.mubr.msk.f32.gmra.mrb[12].mxu1 %vm273_vm1, %v6535_v33  ;;  %5487 = vmatmul.mubr.msk.f32.gmra.mrb[30].mxu0 %vm273_vm1, %v6315_v51  ;;  %v6595_v51 = vld [vmem:[%s5980_s28 + $0x9a] sm:$0xff] }
  0xbc   : > { %5238 = vmatprep.mubr.msk.f32.mxu1 %vm273_vm1, %v6538_v34  ;;  %5489 = vmatprep.mubr.msk.f32.mxu0 %vm273_vm1, %v6319_v55  ;;  %v6599_v55 = vld [vmem:[%s5980_s28 + $0xa2] sm:$0xff] }
  0xbe   : > { %4194 = vperm.xlu0 %5908, %v4092_v61   ;;  %v3154_v61 = vld [vmem:[%s5980_s28 + $0xad] sm:$0xff] }
  0xbf   : > { %5239 = vmatmul.mubr.msk.f32.gmra.mrb[14].mxu1 %vm273_vm1, %v6555_v37  ;;  %5490 = vmatmul.mubr.msk.f32.gmra.mrb[32].mxu0 %vm273_vm1, %v6329_v59  ;;  %v4093_v59 = vld [vmem:[%s7184_s3 + $0x88] sm:$0xff] }
  0xc0   : > { %5241 = vmatprep.mubr.msk.f32.mxu1 %vm273_vm1, %v6558_v38  ;;  %5492 = vmatprep.mubr.msk.f32.mxu0 %vm273_vm1, %v2741_v39  ;;  %v3151_v39 = vld [vmem:[%s5980_s28 + $0x95] sm:$0xff] }
  0xc1   : > { %4199 = vperm.xlu1 %5909, %v4093_v59   ;;  %v6757_v59 = vld [vmem:[%s5980_s28 + $0x11a] sm:$0xff] }
  0xc2   : > { %4204 = vperm.xlu0 %5908, %v4094_v48   ;;  %v3156_v48 = vld [vmem:[%s5980_s28 + $0xbd] sm:$0xff] }
  0xc3   : > { %5242 = vmatmul.mubr.msk.f32.gmra.mrb[16].mxu1 %vm273_vm1, %v6575_v42  ;;  %5493 = vmatmul.mubr.msk.f32.gmra.mrb[34].mxu0 %vm273_vm1, %v2742_v43  ;;  %v6737_v43 = vld [vmem:[%s5980_s28 + $0x10a] sm:$0xff] }
  0xc4   : > { %5244 = vmatprep.mubr.msk.f32.mxu1 %vm273_vm1, %v6579_v44  ;;  %5497 = vmatprep.mubr.msk.f32.mxu0 %vm273_vm1, %v3137_v45  ;;  %v3152_v45 = vld [vmem:[%s5980_s28 + $0x9d] sm:$0xff] }
  0xc6   : > { %4214 = vperm.xlu0 %5908, %v4096_v60   ;;  %v3159_v60 = vld [vmem:[%s5980_s28 + $0xd5] sm:$0xff] }
  0xc7   : > { %5245 = vmatmul.mubr.msk.f32.gmra.mrb[18].mxu1 %vm273_vm1, %v6595_v51  ;;  %5498 = vmatmul.mubr.msk.f32.vlgmr.msra.gmra.mrb[0].mxu0 %vm273_vm1, %v3138_v53  ;;  %v4107_v53 = vld [vmem:[%s7184_s3 + $0xf8] sm:$0xff] }
  0xc8   : > { %5552 = vmatpush3.msk.msra.mxu0 %vm382_vm0, %v6343_v4  ;;  %5247 = vmatprep.mubr.msk.f32.mxu1 %vm273_vm1, %v6599_v55  ;;  %v4095_v4 = vld [vmem:[%s7184_s3 + $0x98] sm:$0xff] }
  0xc9   : > { %5500 = vmatprep.mubr.msk.f32.mxu0 %vm273_vm1, %v3139_v57  ;;  %4209 = vperm.xlu1 %5909, %v4095_v4   ;;  %v4106_v57 = vld [vmem:[%s7184_s3 + $0xf0] sm:$0xff]  ;;  %v4108_v4 = vld [vmem:[%s7184_s3 + $0x100] sm:$0xff] }
  0xca   : > { %4224 = vperm.xlu0 %5908, %v4098_v8   ;;  %v3582_v8 = vld [vmem:[%s5980_s28 + $0x9e] sm:$0xff] }
  0xcb   : > { %5248 = vmatmul.mubr.msk.f32.gmra.mrb[20].mxu1 %vm273_vm1, %v6616_v63  ;;  %5501 = vmatmul.mubr.msk.f32.gmra.mrb[2].mxu0 %vm273_vm1, %v3140_v2  ;;  %v3155_v2 = vld [vmem:[%s5980_s28 + $0xb5] sm:$0xff] }
  0xcc   : > { %5250 = vmatprep.mubr.msk.f32.mxu1 %vm273_vm1, %v6621_v47  ;;  %5503 = vmatprep.mubr.msk.f32.mxu0 %vm273_vm1, %v3141_v6  ;;  %v4109_v6 = vld [vmem:[%s7184_s3 + $0x108] sm:$0xff] }
  0xcd   : > { %4219 = vperm.xlu1 %5909, %v4097_v58   ;;  %v3158_v58 = vld [vmem:[%s5980_s28 + $0xcd] sm:$0xff] }
  0xce   : > { %4234 = vperm.xlu0 %5908, %v4100_v20   ;;  %v3585_v20 = vld [vmem:[%s5980_s28 + $0xb6] sm:$0xff] }
  0xcf   : > { %5251 = vmatmul.mubr.msk.f32.gmra.mrb[22].mxu1 %vm273_vm1, %v6637_v50  ;;  %5504 = vmatmul.mubr.msk.f32.gmra.mrb[4].mxu0 %vm273_vm1, %v3142_v52  ;;  %v3157_v52 = vld [vmem:[%s5980_s28 + $0xc5] sm:$0xff] }
  0xd0   : > { %5253 = vmatprep.mubr.msk.f32.mxu1 %vm273_vm1, %v6641_v54  ;;  %5506 = vmatprep.mubr.msk.f32.mxu0 %vm273_vm1, %v3143_v56  ;;  %v4111_v56 = vld [vmem:[%s7184_s3 + $0x118] sm:$0xff] }
  0xd1   : > { %4229 = vperm.xlu1 %5909, %v4099_v7   ;;  %v3581_v7 = vld [vmem:[%s5980_s28 + $0x96] sm:$0xff] }
  0xd2   : > { %4244 = vperm.xlu0 %5908, %v4102_v31   ;;  %v3588_v31 = vld [vmem:[%s5980_s28 + $0xce] sm:$0xff] }
  0xd3   : > { %5254 = vmatmul.mubr.msk.f32.gmra.mrb[24].mxu1 %vm273_vm1, %v6657_v62  ;;  %5507 = vmatmul.mubr.msk.f32.gmra.mrb[6].mxu0 %vm273_vm1, %v3144_v0  ;;  %v3578_v0 = vld [vmem:[%s5980_s28 + $0x7e] sm:$0xff] }
  0xd4   : > { %5256 = vmatprep.mubr.msk.f32.mxu1 %vm273_vm1, %v6661_v3  ;;  %5509 = vmatprep.mubr.msk.f32.mxu0 %vm273_vm1, %v3145_v5  ;;  %v3580_v5 = vld [vmem:[%s5980_s28 + $0x8e] sm:$0xff] }
  0xd5   : > { %4239 = vperm.xlu1 %5909, %v4101_v17   ;;  %v1865_v17 = vld [vmem:[%s5980_s28 + $0xa3] sm:$0xff] }
  0xd6   : > { %4254 = vperm.xlu0 %5908, %v4104_v41   ;;  %v3591_v41 = vld [vmem:[%s5980_s28 + $0xe6] sm:$0xff] }
  0xd7   : > { %5257 = vmatmul.mubr.msk.f32.gmra.mrb[26].mxu1 %vm273_vm1, %v6677_v9  ;;  %5510 = vmatmul.mubr.msk.f32.gmra.mrb[8].mxu0 %vm273_vm1, %v3146_v10  ;;  %v3583_v10 = vld [vmem:[%s5980_s28 + $0xa6] sm:$0xff] }
  0xd8   : > { %5259 = vmatprep.mubr.msk.f32.mxu1 %vm273_vm1, %v6681_v15  ;;  %5512 = vmatprep.mubr.msk.f32.mxu0 %vm273_vm1, %v3147_v16  ;;  %v3584_v16 = vld [vmem:[%s5980_s28 + $0xae] sm:$0xff] }
  0xd9   : > { %4249 = vperm.xlu1 %5909, %v4103_v28   ;;  %v1868_v28 = vld [vmem:[%s5980_s28 + $0xbb] sm:$0xff] }
  0xda   : > { %4264 = vperm.xlu0 %5908, %v4106_v57   ;;  %v3594_v57 = vld [vmem:[%s5980_s28 + $0xfe] sm:$0xff] }
  0xdb   : > { %5260 = vmatmul.mubr.msk.f32.gmra.mrb[28].mxu1 %vm273_vm1, %v6697_v21  ;;  %5513 = vmatmul.mubr.msk.f32.gmra.mrb[10].mxu0 %vm273_vm1, %v3148_v24  ;;  %v3586_v24 = vld [vmem:[%s5980_s28 + $0xbe] sm:$0xff] }
  0xdc   : > { %5262 = vmatprep.mubr.msk.f32.mxu1 %vm273_vm1, %v6701_v25  ;;  %5515 = vmatprep.mubr.msk.f32.mxu0 %vm273_vm1, %v3149_v11  ;;  %v3587_v11 = vld [vmem:[%s5980_s28 + $0xc6] sm:$0xff] }
  0xdd   : > { %4259 = vperm.xlu1 %5909, %v4105_v40   ;;  %v1871_v40 = vld [vmem:[%s5980_s28 + $0xd3] sm:$0xff] }
  0xde   : > { %4274 = vperm.xlu0 %5908, %v4108_v4   ;;  %v1877_v4 = vld [vmem:[%s5980_s28 + $0x103] sm:$0xff] }
  0xdf   : > { %5263 = vmatmul.mubr.msk.f32.gmra.mrb[30].mxu1 %vm273_vm1, %v6717_v32  ;;  %5516 = vmatmul.mubr.msk.f32.gmra.mrb[12].mxu0 %vm273_vm1, %v3150_v35  ;;  %v3589_v35 = vld [vmem:[%s5980_s28 + $0xd6] sm:$0xff] }
  0xe0   : > { %5265 = vmatprep.mubr.msk.f32.mxu1 %vm273_vm1, %v6721_v36  ;;  %5518 = vmatprep.mubr.msk.f32.mxu0 %vm273_vm1, %v3151_v39  ;;  %v3590_v39 = vld [vmem:[%s5980_s28 + $0xde] sm:$0xff] }
  0xe1   : > { %4269 = vperm.xlu1 %5909, %v4107_v53   ;;  %v1874_v53 = vld [vmem:[%s5980_s28 + $0xeb] sm:$0xff] }
  0xe3   : > { %5266 = vmatmul.mubr.msk.f32.gmra.mrb[32].mxu1 %vm273_vm1, %v6737_v43  ;;  %5519 = vmatmul.mubr.msk.f32.gmra.mrb[14].mxu0 %vm273_vm1, %v3152_v45  ;;  %v3592_v45 = vld [vmem:[%s5980_s28 + $0xee] sm:$0xff] }
  0xe4   : > { %5268 = vmatprep.mubr.msk.f32.mxu1 %vm273_vm1, %v6741_v46  ;;  %5521 = vmatprep.mubr.msk.f32.mxu0 %vm273_vm1, %v3153_v49  ;;  %v3593_v49 = vld [vmem:[%s5980_s28 + $0xf6] sm:$0xff] }
  0xe5   : > { %4279 = vperm.xlu1 %5909, %v4109_v6   ;;  %v3596_v6 = vld [vmem:[%s5980_s28 + $0x10e] sm:$0xff] }
  0xe7   : > { %5269 = vmatmul.mubr.msk.f32.gmra.mrb[34].mxu1 %vm273_vm1, %v6757_v59  ;;  %5522 = vmatmul.mubr.msk.f32.gmra.mrb[16].mxu0 %vm273_vm1, %v3154_v61  ;;  %v3595_v61 = vld [vmem:[%s5980_s28 + $0x106] sm:$0xff] }
  0xe8   : > { %5273 = vmatprep.mubr.msk.f32.mxu1 %vm273_vm1, %v6421_v12  ;;  %5524 = vmatprep.mubr.msk.f32.mxu0 %vm273_vm1, %v3155_v2  ;;  %v4110_v12 = vld [vmem:[%s7184_s3 + $0x110] sm:$0xff]  ;;  %v1876_v2 = vld [vmem:[%s5980_s28 + $0xfb] sm:$0xff] }
  0xe9   : > { %4289 = vperm.xlu1 %5909, %v4111_v56   ;;  %4284 = vperm.xlu0 %5908, %v4110_v12   ;;  %v3598_v56 = vld [vmem:[%s5980_s28 + $0x11e] sm:$0xff]  ;;  %v1879_v12 = vld [vmem:[%s5980_s28 + $0x113] sm:$0xff] }
  0xeb   : > { %5274 = vmatmul.mubr.msk.f32.vlgmr.msra.gmra.mrb[0].mxu1 %vm273_vm1, %v6431_v13  ;;  %5525 = vmatmul.mubr.msk.f32.gmra.mrb[18].mxu0 %vm273_vm1, %v3156_v48  ;;  %v3161_v13 = vld [vmem:[%s5980_s28 + $0xe5] sm:$0xff]  ;;  %v3597_v48 = vld [vmem:[%s5980_s28 + $0x116] sm:$0xff] }
  0xec   : > { %5608 = vmatpush3.msk.msra.mxu1 %vm382_vm0, %v5958_v1  ;;  %5276 = vmatprep.mubr.msk.f32.mxu1 %vm273_vm1, %v6436_v14  ;;  %v3160_v1 = vld [vmem:[%s5980_s28 + $0xdd] sm:$0xff]  ;;  %v3162_v14 = vld [vmem:[%s5980_s28 + $0xed] sm:$0xff] }
  0xed   : > { %5527 = vmatprep.mubr.msk.f32.mxu0 %vm273_vm1, %v3157_v52  ;;  %v1878_v52 = vld [vmem:[%s5980_s28 + $0x10b] sm:$0xff] }
  0xef   : > { %5277 = vmatmul.mubr.msk.f32.gmra.mrb[2].mxu1 %vm273_vm1, %v6455_v18  ;;  %5528 = vmatmul.mubr.msk.f32.gmra.mrb[20].mxu0 %vm273_vm1, %v3158_v58  ;;  %v3163_v18 = vld [vmem:[%s5980_s28 + $0xf5] sm:$0xff]  ;;  %v3599_v58 = vld [vmem:[%s5980_s28 + $0x126] sm:$0xff] }
  0xf0   : > { %5279 = vmatprep.mubr.msk.f32.mxu1 %vm273_vm1, %v6458_v19  ;;  %5530 = vmatprep.mubr.msk.f32.mxu0 %vm273_vm1, %v3159_v60  ;;  %v3164_v19 = vld [vmem:[%s5980_s28 + $0xfd] sm:$0xff] }
  0xf1   : > { %v1880_v60 = vld [vmem:[%s5980_s28 + $0x11b] sm:$0xff] }
  0xf3   : > { %5280 = vmatmul.mubr.msk.f32.gmra.mrb[4].mxu1 %vm273_vm1, %v6475_v22  ;;  %5531 = vmatmul.mubr.msk.f32.gmra.mrb[22].mxu0 %vm273_vm1, %v3160_v1  ;;  %v3165_v22 = vld [vmem:[%s5980_s28 + $0x105] sm:$0xff]  ;;  %v3600_v1 = vld [vmem:[%s5980_s28 + $0x12e] sm:$0xff] }
  0xf4   : > { %5282 = vmatprep.mubr.msk.f32.mxu1 %vm273_vm1, %v6478_v23  ;;  %5533 = vmatprep.mubr.msk.f32.mxu0 %vm273_vm1, %v3161_v13  ;;  %v3166_v23 = vld [vmem:[%s5980_s28 + $0x10d] sm:$0xff]  ;;  %v1881_v13 = vld [vmem:[%s5980_s28 + $0x123] sm:$0xff] }
  0xf7   : > { %5283 = vmatmul.mubr.msk.f32.gmra.mrb[6].mxu1 %vm273_vm1, %v6495_v26  ;;  %5534 = vmatmul.mubr.msk.f32.gmra.mrb[24].mxu0 %vm273_vm1, %v3162_v14  ;;  %v3167_v26 = vld [vmem:[%s5980_s28 + $0x115] sm:$0xff] }
  0xf8   : > { %5285 = vmatprep.mubr.msk.f32.mxu1 %vm273_vm1, %v6498_v27  ;;  %5536 = vmatprep.mubr.msk.f32.mxu0 %vm273_vm1, %v3163_v18  ;;  %v3168_v27 = vld [vmem:[%s5980_s28 + $0x11d] sm:$0xff]  ;;  %v1882_v18 = vld [vmem:[%s5980_s28 + $0x12b] sm:$0xff] }
  0xf9   : > { %v3601_v14 = vld [vmem:[%s5980_s28 + $0x136] sm:$0xff] }
  0xfb   : > { %5286 = vmatmul.mubr.msk.f32.gmra.mrb[8].mxu1 %vm273_vm1, %v6515_v29  ;;  %5537 = vmatmul.mubr.msk.f32.gmra.mrb[26].mxu0 %vm273_vm1, %v3164_v19  ;;  %v3169_v29 = vld [vmem:[%s5980_s28 + $0x125] sm:$0xff] }
  0xfc   : > { %5288 = vmatprep.mubr.msk.f32.mxu1 %vm273_vm1, %v6518_v30  ;;  %5539 = vmatprep.mubr.msk.f32.mxu0 %vm273_vm1, %v3165_v22  ;;  %v3170_v30 = vld [vmem:[%s5980_s28 + $0x12d] sm:$0xff]  ;;  %v3602_v19 = vld [vmem:[%s5980_s28 + $0x13e] sm:$0xff] }
  0xff   : > { %5289 = vmatmul.mubr.msk.f32.gmra.mrb[10].mxu1 %vm273_vm1, %v6535_v33  ;;  %5540 = vmatmul.mubr.msk.f32.gmra.mrb[28].mxu0 %vm273_vm1, %v3166_v23  ;;  %v3171_v33 = vld [vmem:[%s5980_s28 + $0x135] sm:$0xff]  ;;  %v4115_v23 = vpop.permute.xlu0 %4114 }
 0x100   : > { %5291 = vmatprep.mubr.msk.f32.mxu1 %vm273_vm1, %v6538_v34  ;;  %5542 = vmatprep.mubr.msk.f32.mxu0 %vm273_vm1, %v3167_v26  ;;  %v3172_v34 = vld [vmem:[%s5980_s28 + $0x13d] sm:$0xff] }
 0x103   : > { %5292 = vmatmul.mubr.msk.f32.gmra.mrb[12].mxu1 %vm273_vm1, %v6555_v37  ;;  %5543 = vmatmul.mubr.msk.f32.gmra.mrb[30].mxu0 %vm273_vm1, %v3168_v27  ;;  %v3567_v37 = vld [vmem:[%s5980_s28 + $0x26] sm:$0xff] }
 0x104   : > { %5294 = vmatprep.mubr.msk.f32.mxu1 %vm273_vm1, %v6558_v38  ;;  %5545 = vmatprep.mubr.msk.f32.mxu0 %vm273_vm1, %v3169_v29  ;;  %v3568_v38 = vld [vmem:[%s5980_s28 + $0x2e] sm:$0xff] }
 0x107   : > { %5295 = vmatmul.mubr.msk.f32.gmra.mrb[14].mxu1 %vm273_vm1, %v6575_v42  ;;  %5546 = vmatmul.mubr.msk.f32.gmra.mrb[32].mxu0 %vm273_vm1, %v3170_v30  ;;  %v3569_v42 = vld [vmem:[%s5980_s28 + $0x36] sm:$0xff] }
 0x108   : > { %5297 = vmatprep.mubr.msk.f32.mxu1 %vm273_vm1, %v6579_v44  ;;  %5548 = vmatprep.mubr.msk.f32.mxu0 %vm273_vm1, %v3171_v33  ;;  %v3570_v44 = vld [vmem:[%s5980_s28 + $0x3e] sm:$0xff]  ;;  %v4120_v33 = vpop.permute.xlu0 %4119 }
 0x10b   : > { %5298 = vmatmul.mubr.msk.f32.gmra.mrb[16].mxu1 %vm273_vm1, %v6595_v51  ;;  %5549 = vmatmul.mubr.msk.f32.gmra.mrb[34].mxu0 %vm273_vm1, %v3172_v34  ;;  %v3571_v51 = vld [vmem:[%s5980_s28 + $0x46] sm:$0xff] }
 0x10c   : > { %5300 = vmatprep.mubr.msk.f32.mxu1 %vm273_vm1, %v6599_v55  ;;  %5553 = vmatprep.mubr.msk.f32.mxu0 %vm273_vm1, %v3567_v37  ;;  %v3572_v55 = vld [vmem:[%s5980_s28 + $0x4e] sm:$0xff] }
 0x10f   : > { %5301 = vmatmul.mubr.msk.f32.gmra.mrb[18].mxu1 %vm273_vm1, %v6616_v63  ;;  %5554 = vmatmul.mubr.msk.f32.vlgmr.msra.gmra.mrb[0].mxu0 %vm273_vm1, %v3568_v38  ;;  %v3573_v63 = vld [vmem:[%s5980_s28 + $0x56] sm:$0xff] }
 0x110   : > { %5303 = vmatprep.mubr.msk.f32.mxu1 %vm273_vm1, %v6621_v47  ;;  %5556 = vmatprep.mubr.msk.f32.mxu0 %vm273_vm1, %v3569_v42  ;;  %v3574_v47 = vld [vmem:[%s5980_s28 + $0x5e] sm:$0xff] }
 0x113   : > { %5304 = vmatmul.mubr.msk.f32.gmra.mrb[20].mxu1 %vm273_vm1, %v6637_v50  ;;  %5557 = vmatmul.mubr.msk.f32.gmra.mrb[2].mxu0 %vm273_vm1, %v3570_v44  ;;  %v3575_v50 = vld [vmem:[%s5980_s28 + $0x66] sm:$0xff] }
 0x114   : > { %5306 = vmatprep.mubr.msk.f32.mxu1 %vm273_vm1, %v6641_v54  ;;  %5559 = vmatprep.mubr.msk.f32.mxu0 %vm273_vm1, %v3571_v51  ;;  %v3576_v54 = vld [vmem:[%s5980_s28 + $0x6e] sm:$0xff] }
 0x117   : > { %5307 = vmatmul.mubr.msk.f32.gmra.mrb[22].mxu1 %vm273_vm1, %v6657_v62  ;;  %5560 = vmatmul.mubr.msk.f32.gmra.mrb[4].mxu0 %vm273_vm1, %v3572_v55  ;;  %v3577_v62 = vld [vmem:[%s5980_s28 + $0x76] sm:$0xff] }
 0x118   : > { %5309 = vmatprep.mubr.msk.f32.mxu1 %vm273_vm1, %v6661_v3  ;;  %5562 = vmatprep.mubr.msk.f32.mxu0 %vm273_vm1, %v3573_v63  ;;  %v3579_v3 = vld [vmem:[%s5980_s28 + $0x86] sm:$0xff] }
 0x11b   : > { %5310 = vmatmul.mubr.msk.f32.gmra.mrb[24].mxu1 %vm273_vm1, %v6677_v9  ;;  %5563 = vmatmul.mubr.msk.f32.gmra.mrb[6].mxu0 %vm273_vm1, %v3574_v47  ;;  %v1451_v9 = vld [vmem:[%s5980_s28 + $0x122] sm:$0xff] }
 0x11c   : > { %5312 = vmatprep.mubr.msk.f32.mxu1 %vm273_vm1, %v6681_v15  ;;  %5565 = vmatprep.mubr.msk.f32.mxu0 %vm273_vm1, %v3575_v50  ;;  %v1452_v15 = vld [vmem:[%s5980_s28 + $0x12a] sm:$0xff]  ;;  %v6993_v22 = vpop.permute.xlu1 %4124 }
 0x11f   : > { %5313 = vmatmul.mubr.msk.f32.gmra.mrb[26].mxu1 %vm273_vm1, %v6697_v21  ;;  %5566 = vmatmul.mubr.msk.f32.gmra.mrb[8].mxu0 %vm273_vm1, %v3576_v54  ;;  %v1866_v21 = vld [vmem:[%s5980_s28 + $0xab] sm:$0xff] }
 0x120   : > { %5315 = vmatprep.mubr.msk.f32.mxu1 %vm273_vm1, %v6701_v25  ;;  %5568 = vmatprep.mubr.msk.f32.mxu0 %vm273_vm1, %v3577_v62  ;;  %v1867_v25 = vld [vmem:[%s5980_s28 + $0xb3] sm:$0xff]  ;;  %v4130_v29 = vpop.permute.xlu1 %4129 }
 0x123   : > { %5316 = vmatmul.mubr.msk.f32.gmra.mrb[28].mxu1 %vm273_vm1, %v6717_v32  ;;  %5569 = vmatmul.mubr.msk.f32.gmra.mrb[10].mxu0 %vm273_vm1, %v3578_v0  ;;  %v1869_v32 = vld [vmem:[%s5980_s28 + $0xc3] sm:$0xff] }
 0x124   : > { %5318 = vmatprep.mubr.msk.f32.mxu1 %vm273_vm1, %v6721_v36  ;;  %5571 = vmatprep.mubr.msk.f32.mxu0 %vm273_vm1, %v3579_v3  ;;  %v1870_v36 = vld [vmem:[%s5980_s28 + $0xcb] sm:$0xff] }
 0x125   : > { %v6995_v42 = vpop.permute.xlu1 %4139  ;;  %v6997_v44 = vpop.permute.xlu0 %4134 }
 0x127   : > { %5319 = vmatmul.mubr.msk.f32.gmra.mrb[30].mxu1 %vm273_vm1, %v6737_v43  ;;  %5572 = vmatmul.mubr.msk.f32.gmra.mrb[12].mxu0 %vm273_vm1, %v3580_v5  ;;  %v1872_v43 = vld [vmem:[%s5980_s28 + $0xdb] sm:$0xff] }
 0x128   : > { %5321 = vmatprep.mubr.msk.f32.mxu1 %vm273_vm1, %v6741_v46  ;;  %5574 = vmatprep.mubr.msk.f32.mxu0 %vm273_vm1, %v3581_v7  ;;  %v1873_v46 = vld [vmem:[%s5980_s28 + $0xe3] sm:$0xff] }
 0x129   : > { %v6999_v63 = vpop.permute.xlu1 %4149  ;;  %v7003_v50 = vpop.permute.xlu0 %4144 }
 0x12b   : > { %5322 = vmatmul.mubr.msk.f32.gmra.mrb[32].mxu1 %vm273_vm1, %v6757_v59  ;;  %5575 = vmatmul.mubr.msk.f32.gmra.mrb[14].mxu0 %vm273_vm1, %v3582_v8  ;;  %v1875_v59 = vld [vmem:[%s5980_s28 + $0xf3] sm:$0xff] }
 0x12c   : > { %5324 = vmatprep.mubr.msk.f32.mxu1 %vm273_vm1, %v1451_v9  ;;  %5577 = vmatprep.mubr.msk.f32.mxu0 %vm273_vm1, %v3583_v10 }
 0x12d   : > { %v7011_v3 = vpop.permute.xlu1 %4159  ;;  %v7013_v5 = vpop.permute.xlu0 %4154 }
 0x12f   : > { %5325 = vmatmul.mubr.msk.f32.gmra.mrb[34].mxu1 %vm273_vm1, %v1452_v15  ;;  %5578 = vmatmul.mubr.msk.f32.gmra.mrb[16].mxu0 %vm273_vm1, %v3584_v16 }
 0x130   : > { %5356 = vmatprep.mubr.msk.f32.mxu1 %vm273_vm1, %v1865_v17  ;;  %5580 = vmatprep.mubr.msk.f32.mxu0 %vm273_vm1, %v3585_v20 }
 0x131   : > { %v7019_v9 = vpop.permute.xlu1 %4169  ;;  %v7023_v15 = vpop.permute.xlu0 %4164 }
 0x133   : > { %5357 = vmatmul.mubr.msk.f32.vlgmr.msra.gmra.mrb[18].mxu1 %vm273_vm1, %v1866_v21  ;;  %5581 = vmatmul.mubr.msk.f32.gmra.mrb[18].mxu0 %vm273_vm1, %v3586_v24 }
 0x134   : > { %5359 = vmatprep.mubr.msk.f32.mxu1 %vm273_vm1, %v1867_v25  ;;  %5583 = vmatprep.mubr.msk.f32.mxu0 %vm273_vm1, %v3587_v11  ;;  %v7038_v11 = vld [vmem:[%s7183_s2] ss:$0 sm:$0xff] }
 0x135   : > { %v7031_v21 = vpop.permute.xlu1 %4179  ;;  %v7033_v24 = vpop.permute.xlu0 %4174 }
 0x137   : > { %5360 = vmatmul.mubr.msk.f32.gmra.mrb[20].mxu1 %vm273_vm1, %v1868_v28  ;;  %5584 = vmatmul.mubr.msk.f32.gmra.mrb[20].mxu0 %vm273_vm1, %v3588_v31 }
 0x138   : > { %5362 = vmatprep.mubr.msk.f32.mxu1 %vm273_vm1, %v1869_v32  ;;  %5586 = vmatprep.mubr.msk.f32.mxu0 %vm273_vm1, %v3589_v35 }
 0x13b   : > { %5363 = vmatmul.mubr.msk.f32.gmra.mrb[22].mxu1 %vm273_vm1, %v1870_v36  ;;  %5587 = vmatmul.mubr.msk.f32.gmra.mrb[22].mxu0 %vm273_vm1, %v3590_v39  ;;  %v7042_v36 = vpop.permute.xlu1 %4189 }
 0x13c   : > { %5365 = vmatprep.mubr.msk.f32.mxu1 %vm273_vm1, %v1871_v40  ;;  %5589 = vmatprep.mubr.msk.f32.mxu0 %vm273_vm1, %v3591_v41  ;;  %v7045_v41 = vpop.permute.xlu0 %4184 }
 0x13f   : > { %5366 = vmatmul.mubr.msk.f32.gmra.mrb[24].mxu1 %vm273_vm1, %v1872_v43  ;;  %5590 = vmatmul.mubr.msk.f32.gmra.mrb[24].mxu0 %vm273_vm1, %v3592_v45 }
 0x140   : > { %5368 = vmatprep.mubr.msk.f32.mxu1 %vm273_vm1, %v1873_v46  ;;  %5592 = vmatprep.mubr.msk.f32.mxu0 %vm273_vm1, %v3593_v49 }
 0x143   : > { %5369 = vmatmul.mubr.msk.f32.gmra.mrb[26].mxu1 %vm273_vm1, %v1874_v53  ;;  %5593 = vmatmul.mubr.msk.f32.gmra.mrb[26].mxu0 %vm273_vm1, %v3594_v57 }
 0x144   : > { %5371 = vmatprep.mubr.msk.f32.mxu1 %vm273_vm1, %v1875_v59  ;;  %5595 = vmatprep.mubr.msk.f32.mxu0 %vm273_vm1, %v3595_v61 }
 0x147   : > { %5372 = vmatmul.mubr.msk.f32.gmra.mrb[28].mxu1 %vm273_vm1, %v1876_v2  ;;  %5596 = vmatmul.mubr.msk.f32.gmra.mrb[28].mxu0 %vm273_vm1, %v3596_v6 }
 0x148   : > { %5374 = vmatprep.mubr.msk.f32.mxu1 %vm273_vm1, %v1877_v4  ;;  %5598 = vmatprep.mubr.msk.f32.mxu0 %vm273_vm1, %v3597_v48 }
 0x14b   : > { %5375 = vmatmul.mubr.msk.f32.gmra.mrb[30].mxu1 %vm273_vm1, %v1878_v52  ;;  %5599 = vmatmul.mubr.msk.f32.gmra.mrb[30].mxu0 %vm273_vm1, %v3598_v56  ;;  %v7055_v56 = vpop.permute.xlu1 %4199 }
 0x14c   : > { %5377 = vmatprep.mubr.msk.f32.mxu1 %vm273_vm1, %v1879_v12  ;;  %5601 = vmatprep.mubr.msk.f32.mxu0 %vm273_vm1, %v3599_v58 }
 0x14f   : > { %5378 = vmatmul.mubr.msk.f32.gmra.mrb[32].mxu1 %vm273_vm1, %v1880_v60  ;;  %5602 = vmatmul.mubr.msk.f32.gmra.mrb[32].mxu0 %vm273_vm1, %v3600_v1  ;;  %v7058_v60 = vpop.permute.xlu0 %4194 }
 0x150   : > { %5380 = vmatprep.mubr.msk.f32.mxu1 %vm273_vm1, %v1881_v13  ;;  %5604 = vmatprep.mubr.msk.f32.mxu0 %vm273_vm1, %v3601_v14 }
 0x153   : > { %5381 = vmatmul.mubr.msk.f32.gmra.mrb[34].mxu1 %vm273_vm1, %v1882_v18  ;;  %5605 = vmatmul.mubr.msk.f32.gmra.mrb[34].mxu0 %vm273_vm1, %v3602_v19 }
 0x1be   : > { %v5275_v26 = vpop.f32.mrb[0].mxu1 }
 0x1bf   : > { %v1632_v27 = vpop.f32.mrb[1].mxu1 }
 0x1c2   : > { %v5278_v30 = vpop.f32.mrb[2].mxu1 }
 0x1c3   : > { %v1642_v34 = vpop.f32.mrb[3].mxu1 }
 0x1c6   : > { %v5281_v37 = vpop.f32.mrb[4].mxu1 }
 0x1c7   : > { %v1652_v38 = vpop.f32.mrb[5].mxu1 }
 0x1ca   : > { %v5284_v51 = vpop.f32.mrb[6].mxu1 }
 0x1cb   : > { %v1662_v55 = vpop.f32.mrb[7].mxu1 }
 0x1ce   : > { %v7001_v47 = vpop.f32.mrb[8].mxu1 }
 0x1cf   : > { %v7005_v54 = vpop.f32.mrb[9].mxu1 }
 0x1d2   : > { %v7007_v62 = vpop.f32.mrb[10].mxu1 }
 0x1d3   : > { %v7009_v0 = vpop.f32.mrb[11].mxu1 }
 0x1d6   : > { %v7015_v7 = vpop.f32.mrb[12].mxu1 }
 0x1d7   : > { %v7017_v8 = vpop.f32.mrb[13].mxu1 }
 0x1da   : > { %v7021_v10 = vpop.f32.mrb[14].mxu1 }
 0x1db   : > { %v7025_v16 = vpop.f32.mrb[15].mxu1 }
 0x1de   : > { %v7027_v17 = vpop.f32.mrb[16].mxu1 }
 0x1df   : > { %v7029_v20 = vpop.f32.mrb[17].mxu1 }
 0x1e2   : > { %v5555_v25 = vpop.f32.mrb[0].mxu0 }
 0x1e3   : > { %v5609_v28 = vadd.f32 %v5555_v25, %v5275_v26  ;;  %v3782_v31 = vpop.f32.mrb[1].mxu0 }
 0x1e4   : > { %v5610_v32 = vadd.f32 %v3782_v31, %v1632_v27 }
 0x1e5   : > { %v4005_v35 = vadd.f32 %v5609_v28, %v7038_v11  ;;  %v7071_v28 = vpop.permute.xlu0 %4204 }
 0x1e6   : > { %v4004_v39 = vadd.f32 %v5610_v32, %v7038_v11  ;;  %v5558_v40 = vpop.f32.mrb[2].mxu0 }
 0x1e7   : > { %v4041_v43 = vmax.f32 %v4005_v35, 0.0  ;;  %v5611_v45 = vadd.f32 %v5558_v40, %v5278_v30  ;;  %v3792_v46 = vpop.f32.mrb[3].mxu0 }
 0x1e8   : > { %v4040_v49 = vmax.f32 %v4004_v39, 0.0  ;;  %v5612_v53 = vadd.f32 %v3792_v46, %v1642_v34 }
 0x1e9   : > { %v4293_v57 = vmul.f32 %v4120_v33, %v4041_v43  ;;  %v4007_v59 = vadd.f32 %v5611_v45, %v7038_v11 }
 0x1ea   : > { %v4292_v61 = vmul.f32 %v4115_v23, %v4040_v49  ;;  %v4006_v2 = vadd.f32 %v5612_v53, %v7038_v11  ;;  %v5561_v6 = vpop.f32.mrb[4].mxu0  ;;  %v7087_v53 = vpop.permute.xlu0 %4214 }
 0x1eb   : > { %4329 = vst [vmem:[%s7050_s22 + $0x8] sm:$0xff] %v4293_v57  ;;  %v4043_v4 = vmax.f32 %v4007_v59, 0.0  ;;  %v5613_v48 = vadd.f32 %v5561_v6, %v5281_v37  ;;  %v3802_v52 = vpop.f32.mrb[5].mxu0  ;;  %v7067_v37 = vpop.permute.xlu1 %4209 }
 0x1ec   : > { %4328 = vst [vmem:[%s7050_s22] sm:$0xff] %v4292_v61  ;;  %v4042_v12 = vmax.f32 %v4006_v2, 0.0  ;;  %v5614_v58 = vadd.f32 %v3802_v52, %v1652_v38 }
 0x1ed   : > { %v4295_v1 = vmul.f32 %v4130_v29, %v4043_v4  ;;  %v4009_v13 = vadd.f32 %v5613_v48, %v7038_v11 }
 0x1ee   : > { %v4294_v14 = vmul.f32 %v6993_v22, %v4042_v12  ;;  %v4008_v18 = vadd.f32 %v5614_v58, %v7038_v11  ;;  %v5564_v19 = vpop.f32.mrb[6].mxu0 }
 0x1ef   : > { %4331 = vst [vmem:[%s7050_s22 + $0x18] sm:$0xff] %v4295_v1  ;;  %v4045_v23 = vmax.f32 %v4009_v13, 0.0  ;;  %v5615_v26 = vadd.f32 %v5564_v19, %v5284_v51  ;;  %v3812_v27 = vpop.f32.mrb[7].mxu0  ;;  %v7083_v49 = vpop.permute.xlu1 %4219 }
 0x1f0   : > { %4330 = vst [vmem:[%s7050_s22 + $0x10] sm:$0xff] %v4294_v14  ;;  %v4044_v30 = vmax.f32 %v4008_v18, 0.0  ;;  %v5616_v33 = vadd.f32 %v3812_v27, %v1662_v55  ;;  %v7103_v13 = vpop.permute.xlu0 %4224 }
 0x1f1   : > { %v4297_v34 = vmul.f32 %v6995_v42, %v4045_v23  ;;  %v4011_v29 = vadd.f32 %v5615_v26, %v7038_v11 }
 0x1f2   : > { %v4296_v22 = vmul.f32 %v6997_v44, %v4044_v30  ;;  %v4010_v38 = vadd.f32 %v5616_v33, %v7038_v11  ;;  %v5567_v25 = vpop.f32.mrb[8].mxu0 }
 0x1f3   : > { %4333 = vst [vmem:[%s7050_s22 + $0x28] sm:$0xff] %v4297_v34  ;;  %v4047_v51 = vmax.f32 %v4011_v29, 0.0  ;;  %v5617_v31 = vadd.f32 %v5567_v25, %v7001_v47  ;;  %v3822_v55 = vpop.f32.mrb[9].mxu0  ;;  %v7099_v12 = vpop.permute.xlu1 %4229 }
 0x1f4   : > { %4332 = vst [vmem:[%s7050_s22 + $0x20] sm:$0xff] %v4296_v22  ;;  %v4046_v42 = vmax.f32 %v4010_v38, 0.0  ;;  %v5618_v32 = vadd.f32 %v3822_v55, %v7005_v54 }
 0x1f5   : > { %v4299_v35 = vmul.f32 %v6999_v63, %v4047_v51  ;;  %v4013_v44 = vadd.f32 %v5617_v31, %v7038_v11 }
 0x1f6   : > { %v4298_v39 = vmul.f32 %v7003_v50, %v4046_v42  ;;  %v4012_v40 = vadd.f32 %v5618_v32, %v7038_v11  ;;  %v5570_v43 = vpop.f32.mrb[10].mxu0 }
 0x1f7   : > { %4335 = vst [vmem:[%s7050_s22 + $0x38] sm:$0xff] %v4299_v35  ;;  %v4049_v45 = vmax.f32 %v4013_v44, 0.0  ;;  %v5619_v46 = vadd.f32 %v5570_v43, %v7007_v62  ;;  %v3832_v47 = vpop.f32.mrb[11].mxu0  ;;  %v7117_v29 = vpop.permute.xlu1 %4239 }
 0x1f8   : > { %4334 = vst [vmem:[%s7050_s22 + $0x30] sm:$0xff] %v4298_v39  ;;  %v4048_v54 = vmax.f32 %v4012_v40, 0.0  ;;  %v5620_v63 = vadd.f32 %v3832_v47, %v7009_v0 }
 0x1f9   : > { %v4301_v50 = vmul.f32 %v7011_v3, %v4049_v45  ;;  %v4015_v57 = vadd.f32 %v5619_v46, %v7038_v11 }
 0x1fa   : > { %v4300_v59 = vmul.f32 %v7013_v5, %v4048_v54  ;;  %v4014_v61 = vadd.f32 %v5620_v63, %v7038_v11  ;;  %v5573_v62 = vpop.f32.mrb[12].mxu0 }
 0x1fb   : > { %4337 = vst [vmem:[%s7050_s22 + $0x48] sm:$0xff] %v4301_v50  ;;  %v4051_v2 = vmax.f32 %v4015_v57, 0.0  ;;  %v5621_v6 = vadd.f32 %v5573_v62, %v7015_v7  ;;  %v3842_v4 = vpop.f32.mrb[13].mxu0  ;;  %v4250_v57 = vpop.permute.xlu1 %4249 }
 0x1fc   : > { %4336 = vst [vmem:[%s7050_s22 + $0x40] sm:$0xff] %v4300_v59  ;;  %v4050_v0 = vmax.f32 %v4014_v61, 0.0  ;;  %v5622_v48 = vadd.f32 %v3842_v4, %v7017_v8 }
 0x1fd   : > { %v4303_v3 = vmul.f32 %v7019_v9, %v4051_v2  ;;  %v4017_v52 = vadd.f32 %v5621_v6, %v7038_v11 }
 0x1fe   : > { %v4302_v5 = vmul.f32 %v7023_v15, %v4050_v0  ;;  %v4016_v58 = vadd.f32 %v5622_v48, %v7038_v11  ;;  %v5576_v1 = vpop.f32.mrb[14].mxu0 }
 0x1ff   : > { %4339 = vst [vmem:[%s7050_s22 + $0x58] sm:$0xff] %v4303_v3  ;;  %v4053_v7 = vmax.f32 %v4017_v52, 0.0  ;;  %v5623_v14 = vadd.f32 %v5576_v1, %v7021_v10  ;;  %v3852_v8 = vpop.f32.mrb[15].mxu0 }
 0x200   : > { %4338 = vst [vmem:[%s7050_s22 + $0x50] sm:$0xff] %v4302_v5  ;;  %v4052_v9 = vmax.f32 %v4016_v58, 0.0  ;;  %v5624_v18 = vadd.f32 %v3852_v8, %v7025_v16 }
 0x201   : > { %v4305_v19 = vmul.f32 %v7031_v21, %v4053_v7  ;;  %v4019_v15 = vadd.f32 %v5623_v14, %v7038_v11  ;;  %v7119_v21 = vpop.permute.xlu0 %4234 }
 0x202   : > { %v4304_v23 = vmul.f32 %v7033_v24, %v4052_v9  ;;  %v4018_v26 = vadd.f32 %v5624_v18, %v7038_v11  ;;  %v5579_v27 = vpop.f32.mrb[16].mxu0 }
 0x203   : > { %4341 = vst [vmem:[%s7050_s22 + $0x68] sm:$0xff] %v4305_v19  ;;  %v4055_v30 = vmax.f32 %v4019_v15, 0.0  ;;  %v5625_v33 = vadd.f32 %v5579_v27, %v7027_v17  ;;  %v3862_v10 = vpop.f32.mrb[17].mxu0 }
 0x204   : > { %4340 = vst [vmem:[%s7050_s22 + $0x60] sm:$0xff] %v4304_v23  ;;  %v4054_v34 = vmax.f32 %v4018_v26, 0.0  ;;  %v5626_v16 = vadd.f32 %v3862_v10, %v7029_v20  ;;  %v4260_v26 = vpop.permute.xlu1 %4259 }
 0x205   : > { %v4307_v24 = vmul.f32 %v7042_v36, %v4055_v30  ;;  %v4021_v22 = vadd.f32 %v5625_v33, %v7038_v11 }
 0x206   : > { %v4306_v38 = vmul.f32 %v7045_v41, %v4054_v34  ;;  %v4020_v25 = vadd.f32 %v5626_v16, %v7038_v11  ;;  %v5358_v51 = vpop.f32.mrb[18].mxu1  ;;  %v5582_v17 = vpop.f32.mrb[18].mxu0 }
 0x207   : > { %4343 = vst [vmem:[%s7050_s22 + $0x78] sm:$0xff] %v4307_v24  ;;  %v4057_v31 = vmax.f32 %v4021_v22, 0.0  ;;  %v5627_v55 = vadd.f32 %v5582_v17, %v5358_v51  ;;  %v2152_v42 = vpop.f32.mrb[19].mxu1  ;;  %v3872_v20 = vpop.f32.mrb[19].mxu0 }
 0x208   : > { %4342 = vst [vmem:[%s7050_s22 + $0x70] sm:$0xff] %v4306_v38  ;;  %v4056_v32 = vmax.f32 %v4020_v25, 0.0  ;;  %v5628_v35 = vadd.f32 %v3872_v20, %v2152_v42 }
 0x209   : > { %v4309_v36 = vmul.f32 %v7055_v56, %v4057_v31  ;;  %v4023_v44 = vadd.f32 %v5627_v55, %v7038_v11  ;;  %v7133_v56 = vpop.permute.xlu0 %4244 }
 0x20a   : > { %v4308_v41 = vmul.f32 %v7058_v60, %v4056_v32  ;;  %v4022_v39 = vadd.f32 %v5628_v35, %v7038_v11  ;;  %v5361_v40 = vpop.f32.mrb[20].mxu1  ;;  %v5585_v43 = vpop.f32.mrb[20].mxu0 }
 0x20b   : > { %4345 = vst [vmem:[%s7050_s22 + $0x88] sm:$0xff] %v4309_v36  ;;  %v4059_v45 = vmax.f32 %v4023_v44, 0.0  ;;  %v5629_v46 = vadd.f32 %v5585_v43, %v5361_v40  ;;  %v2162_v47 = vpop.f32.mrb[21].mxu1  ;;  %v3882_v54 = vpop.f32.mrb[21].mxu0 }
 0x20c   : > { %4344 = vst [vmem:[%s7050_s22 + $0x80] sm:$0xff] %v4308_v41  ;;  %v4058_v63 = vmax.f32 %v4022_v39, 0.0  ;;  %v5630_v50 = vadd.f32 %v3882_v54, %v2162_v47  ;;  %v4270_v39 = vpop.permute.xlu1 %4269 }
 0x20d   : > { %v4311_v59 = vmul.f32 %v7067_v37, %v4059_v45  ;;  %v4025_v60 = vadd.f32 %v5629_v46, %v7038_v11 }
 0x20e   : > { %v4310_v61 = vmul.f32 %v7071_v28, %v4058_v63  ;;  %v4024_v62 = vadd.f32 %v5630_v50, %v7038_v11  ;;  %v5364_v2 = vpop.f32.mrb[22].mxu1  ;;  %v5588_v6 = vpop.f32.mrb[22].mxu0 }
 0x20f   : > { %4347 = vst [vmem:[%s7050_s22 + $0x98] sm:$0xff] %v4311_v59  ;;  %v4061_v4 = vmax.f32 %v4025_v60, 0.0  ;;  %v5631_v0 = vadd.f32 %v5588_v6, %v5364_v2  ;;  %v2172_v48 = vpop.f32.mrb[23].mxu1  ;;  %v3892_v3 = vpop.f32.mrb[23].mxu0 }
 0x210   : > { %4346 = vst [vmem:[%s7050_s22 + $0x90] sm:$0xff] %v4310_v61  ;;  %v4060_v52 = vmax.f32 %v4024_v62, 0.0  ;;  %v5632_v5 = vadd.f32 %v3892_v3, %v2172_v48 }
 0x211   : > { %v4313_v37 = vmul.f32 %v7083_v49, %v4061_v4  ;;  %v4027_v58 = vadd.f32 %v5631_v0, %v7038_v11  ;;  %v4255_v49 = vpop.permute.xlu0 %4254 }
 0x212   : > { %v4312_v28 = vmul.f32 %v7087_v53, %v4060_v52  ;;  %v4026_v1 = vadd.f32 %v5632_v5, %v7038_v11  ;;  %v5367_v7 = vpop.f32.mrb[24].mxu1  ;;  %v5591_v14 = vpop.f32.mrb[24].mxu0 }
 0x213   : > { %4349 = vst [vmem:[%s7050_s22 + $0xa8] sm:$0xff] %v4313_v37  ;;  %v4063_v8 = vmax.f32 %v4027_v58, 0.0  ;;  %v5633_v9 = vadd.f32 %v5591_v14, %v5367_v7  ;;  %v2182_v18 = vpop.f32.mrb[25].mxu1  ;;  %v3902_v19 = vpop.f32.mrb[25].mxu0 }
 0x214   : > { %4348 = vst [vmem:[%s7050_s22 + $0xa0] sm:$0xff] %v4312_v28  ;;  %v4062_v15 = vmax.f32 %v4026_v1, 0.0  ;;  %v5634_v23 = vadd.f32 %v3902_v19, %v2182_v18  ;;  %v4280_v58 = vpop.permute.xlu1 %4279 }
 0x215   : > { %v4315_v27 = vmul.f32 %v7099_v12, %v4063_v8  ;;  %v4029_v53 = vadd.f32 %v5633_v9, %v7038_v11 }
 0x216   : > { %v4314_v30 = vmul.f32 %v7103_v13, %v4062_v15  ;;  %v4028_v33 = vadd.f32 %v5634_v23, %v7038_v11  ;;  %v5370_v10 = vpop.f32.mrb[26].mxu1  ;;  %v5594_v34 = vpop.f32.mrb[26].mxu0 }
 0x217   : > { %4351 = vst [vmem:[%s7050_s22 + $0xb8] sm:$0xff] %v4315_v27  ;;  %v4065_v16 = vmax.f32 %v4029_v53, 0.0  ;;  %v5635_v24 = vadd.f32 %v5594_v34, %v5370_v10  ;;  %v2192_v22 = vpop.f32.mrb[27].mxu1  ;;  %v3912_v38 = vpop.f32.mrb[27].mxu0 }
 0x218   : > { %4350 = vst [vmem:[%s7050_s22 + $0xb0] sm:$0xff] %v4314_v30  ;;  %v4064_v25 = vmax.f32 %v4028_v33, 0.0  ;;  %v5636_v51 = vadd.f32 %v3912_v38, %v2192_v22 }
 0x219   : > { %v4317_v12 = vmul.f32 %v7117_v29, %v4065_v16  ;;  %v4031_v17 = vadd.f32 %v5635_v24, %v7038_v11  ;;  %v4265_v29 = vpop.permute.xlu0 %4264  ;;  %v4290_v16 = vpop.permute.xlu1 %4289 }
 0x21a   : > { %v4316_v13 = vmul.f32 %v7119_v21, %v4064_v25  ;;  %v4030_v31 = vadd.f32 %v5636_v51, %v7038_v11  ;;  %v5373_v55 = vpop.f32.mrb[28].mxu1  ;;  %v5597_v42 = vpop.f32.mrb[28].mxu0 }
 0x21b   : > { %4353 = vst [vmem:[%s7050_s22 + $0xc8] sm:$0xff] %v4317_v12  ;;  %v4067_v20 = vmax.f32 %v4031_v17, 0.0  ;;  %v5637_v32 = vadd.f32 %v5597_v42, %v5373_v55  ;;  %v2202_v35 = vpop.f32.mrb[29].mxu1  ;;  %v3922_v36 = vpop.f32.mrb[29].mxu0 }
 0x21c   : > { %4352 = vst [vmem:[%s7050_s22 + $0xc0] sm:$0xff] %v4316_v13  ;;  %v4066_v44 = vmax.f32 %v4030_v31, 0.0  ;;  %v5638_v41 = vadd.f32 %v3922_v36, %v2202_v35 }
 0x21d   : > { %v4319_v40 = vmul.f32 %v4250_v57, %v4067_v20  ;;  %v4033_v43 = vadd.f32 %v5637_v32, %v7038_v11  ;;  %v4275_v28 = vpop.permute.xlu0 %4274 }
 0x21e   : > { %v4318_v21 = vmul.f32 %v7133_v56, %v4066_v44  ;;  %v4032_v45 = vadd.f32 %v5638_v41, %v7038_v11  ;;  %v5376_v46 = vpop.f32.mrb[30].mxu1  ;;  %v5600_v47 = vpop.f32.mrb[30].mxu0 }
 0x21f   : > { %4355 = vst [vmem:[%s7050_s22 + $0xd8] sm:$0xff] %v4319_v40  ;;  %v4069_v54 = vmax.f32 %v4033_v43, 0.0  ;;  %v5639_v63 = vadd.f32 %v5600_v47, %v5376_v46  ;;  %v2212_v50 = vpop.f32.mrb[31].mxu1  ;;  %v3932_v59 = vpop.f32.mrb[31].mxu0 }
 0x220   : > { %4354 = vst [vmem:[%s7050_s22 + $0xd0] sm:$0xff] %v4318_v21  ;;  %v4068_v60 = vmax.f32 %v4032_v45, 0.0  ;;  %v5640_v61 = vadd.f32 %v3932_v59, %v2212_v50 }
 0x221   : > { %v4321_v62 = vmul.f32 %v4260_v26, %v4069_v54  ;;  %v4035_v57 = vadd.f32 %v5639_v63, %v7038_v11  ;;  %v4285_v22 = vpop.permute.xlu0 %4284 }
 0x222   : > { %v4320_v2 = vmul.f32 %v4255_v49, %v4068_v60  ;;  %v4034_v56 = vadd.f32 %v5640_v61, %v7038_v11  ;;  %v5379_v6 = vpop.f32.mrb[32].mxu1  ;;  %v5603_v4 = vpop.f32.mrb[32].mxu0 }
 0x223   : > { %4357 = vst [vmem:[%s7050_s22 + $0xe8] sm:$0xff] %v4321_v62  ;;  %v4071_v0 = vmax.f32 %v4035_v57, 0.0  ;;  %v5641_v48 = vadd.f32 %v5603_v4, %v5379_v6  ;;  %v2222_v3 = vpop.f32.mrb[33].mxu1  ;;  %v3942_v52 = vpop.f32.mrb[33].mxu0 }
 0x224   : > { %4356 = vst [vmem:[%s7050_s22 + $0xe0] sm:$0xff] %v4320_v2  ;;  %v4070_v5 = vmax.f32 %v4034_v56, 0.0  ;;  %v5642_v37 = vadd.f32 %v3942_v52, %v2222_v3 }
 0x225   : > { %v4323_v1 = vmul.f32 %v4270_v39, %v4071_v0  ;;  %v4037_v7 = vadd.f32 %v5641_v48, %v7038_v11 }
 0x226   : > { %v4322_v14 = vmul.f32 %v4265_v29, %v4070_v5  ;;  %v4036_v8 = vadd.f32 %v5642_v37, %v7038_v11  ;;  %v5382_v9 = vpop.f32.mrb[34].mxu1  ;;  %v5606_v18 = vpop.f32.mrb[34].mxu0 }
 0x227   : > { %4359 = vst [vmem:[%s7050_s22 + $0xf8] sm:$0xff] %v4323_v1  ;;  %v4073_v19 = vmax.f32 %v4037_v7, 0.0  ;;  %v5643_v15 = vadd.f32 %v5606_v18, %v5382_v9  ;;  %v2232_v23 = vpop.f32.mrb[35].mxu1  ;;  %v3952_v26 = vpop.f32.mrb[35].mxu0 }
 0x228   : > { %4358 = vst [vmem:[%s7050_s22 + $0xf0] sm:$0xff] %v4322_v14  ;;  %v4072_v49 = vmax.f32 %v4036_v8, 0.0  ;;  %v5644_v27 = vadd.f32 %v3952_v26, %v2232_v23 }
 0x229   : > { %v4325_v53 = vmul.f32 %v4280_v58, %v4073_v19  ;;  %v4039_v30 = vadd.f32 %v5643_v15, %v7038_v11 }
 0x22a   : > { %v4324_v33 = vmul.f32 %v4275_v28, %v4072_v49  ;;  %v4038_v10 = vadd.f32 %v5644_v27, %v7038_v11 }
 0x22b   : > { %4361 = vst [vmem:[%s7050_s22 + $0x108] sm:$0xff] %v4325_v53  ;;  %v4075_v34 = vmax.f32 %v4039_v30, 0.0 }
 0x22c   : > { %4360 = vst [vmem:[%s7050_s22 + $0x100] sm:$0xff] %v4324_v33  ;;  %v4074_v24 = vmax.f32 %v4038_v10, 0.0 }
 0x22d   : > { %v4327_v38 = vmul.f32 %v4290_v16, %v4075_v34 }
 0x22e   : > { %v4326_v25 = vmul.f32 %v4285_v22, %v4074_v24 }
 0x22f   : > { %4363 = vst [vmem:[%s7050_s22 + $0x118] sm:$0xff] %v4327_v38 }
 0x230   : > { %4362 = vst [vmem:[%s7050_s22 + $0x110] sm:$0xff] %v4326_v25 }
 0x231 PF: > { %s14_s15 = sadd.s32 1, %s5916_s15  }
 0x232   : > { %p11_p4 = scmp.ge.s32.totalorder %s14_s15, 6  }
 0x234   :  { %13 = sbr.rel (!%p11_p4) target bundleno = 1 (0x1), region = 74 }

// kernel: perception_loss.5
= control target key start
LH: loop header
LB: loop body
LE: loop exit
PB: predicated region body
PF: predicated region fallthrough
CT: control target
= control target key end

     0   :  { %s5572_s15 = smov 0   ;;  %s6875_s0 = inlined_call_operand.vmem [shape: f32[4,326,128], index: 0, kind: input, shape index: {}]   ;;  %s6876_s1 = inlined_call_operand.vmem [shape: f32[9,128,128], index: 1, kind: input, shape index: {}]   ;;  %s6877_s2 = inlined_call_operand.vmem [shape: f32[1,128], index: 2, kind: input, shape index: {}]   ;;  %s6878_s3 = inlined_call_operand.vmem [shape: f32[288,1], index: 3, kind: input, shape index: {}]   ;;  %s6879_s4 = inlined_call_operand.vmem [shape: f32[4,288,128], index: 4, kind: output, shape index: {}]  }
   0x1 LB: > { %s3553_s16 = sadd.s32 4294967295, %s5544_s15   ;;  %p3557_p0 = scmp.ge.s32.totalorder %s5544_s15, 1  ;;  %s5544_s15 = sphi %s5572_s15, %s14_s15  }
   0x2   : > { %p162_p1 = scmp.lt.s32.totalorder %s5544_s15, 5 }
   0x4   : > { %p163_p2 = pnand %p3557_p0, %p162_p1 }
   0x5   : > { %v3560_v0 = vld [vmem:[%s6876_s1 + $0x80] sm:$0xff] (!%p163_p2)  ;;  %v3561_v1 = vld [vmem:[%s6876_s1 + $0x88] sm:$0xff] (!%p163_p2)  ;;  %p188_p3 = scmp.lt.s32.totalorder (!%p163_p2), %s3553_s16, 3  ;;  %v3562_v5 = vld [vmem:[%s6876_s1 + $0x90] sm:$0xff] (!%p163_p2) }
   0x6   : > { %166 = sbr.rel (%p163_p2) target bundleno = 584 (0x248), region = 36  ;;  %v3608_v2 = vld [vmem:[%s6876_s1 + $0x200] sm:$0xff] (!%p163_p2)  ;;  %v4933_v3 = vpack.c.bf16 (!%p163_p2), %v3561_v1, %v3560_v0  ;;  %v3609_v4 = vld [vmem:[%s6876_s1 + $0x208] sm:$0xff] (!%p163_p2)  ;;  %v3563_v6 = vld [vmem:[%s6876_s1 + $0x98] sm:$0xff] (!%p163_p2) }
   0x7   : > { %v5598_v7 = vpack.c.bf16 (!%p163_p2), %v3609_v4, %v3608_v2  ;;  %v4937_v8 = vpack.c.bf16 (!%p163_p2), %v3563_v6, %v3562_v5  ;;  %v3610_v9 = vld [vmem:[%s6876_s1 + $0x210] sm:$0xff] (!%p163_p2)  ;;  %v3611_v10 = vld [vmem:[%s6876_s1 + $0x218] sm:$0xff] (!%p163_p2)  ;;  %v3564_v11 = vld [vmem:[%s6876_s1 + $0xa0] sm:$0xff] (!%p163_p2) }
   0x8   : > { %4934 = vmatprep.subr.bf16.mxu1 (!%p163_p2), %v4933_v3  ;;  %v5611_v12 = vpack.c.bf16 (!%p163_p2), %v3611_v10, %v3610_v9  ;;  %v3565_v13 = vld [vmem:[%s6876_s1 + $0xa8] sm:$0xff] (!%p163_p2)  ;;  %v3612_v14 = vld [vmem:[%s6876_s1 + $0x220] sm:$0xff] (!%p163_p2)  ;;  %v3566_v18 = vld [vmem:[%s6876_s1 + $0xb0] sm:$0xff] (!%p163_p2) }
   0x9   : > { %v3613_v15 = vld [vmem:[%s6876_s1 + $0x228] sm:$0xff] (!%p163_p2)  ;;  %5062 = vmatprep.subr.bf16.mxu0 (!%p163_p2), %v5598_v7  ;;  %4936 = vmatpush3.bf16.msra.mxu1 (!%p163_p2), %v4933_v3  ;;  %v4941_v16 = vpack.c.bf16 (!%p163_p2), %v3565_v13, %v3564_v11  ;;  %v3567_v19 = vld [vmem:[%s6876_s1 + $0xb8] sm:$0xff] (!%p163_p2)  ;;  %v3614_v20 = vld [vmem:[%s6876_s1 + $0x230] sm:$0xff] (!%p163_p2) }
   0xa   : > { %5064 = vmatpush3.bf16.msra.mxu0 (!%p163_p2), %v5598_v7  ;;  %4938 = vmatprep.subr.bf16.mxu1 (!%p163_p2), %v4937_v8  ;;  %v5626_v17 = vpack.c.bf16 (!%p163_p2), %v3613_v15, %v3612_v14  ;;  %v3615_v21 = vld [vmem:[%s6876_s1 + $0x238] sm:$0xff] (!%p163_p2)  ;;  %v4945_v22 = vpack.c.bf16 (!%p163_p2), %v3567_v19, %v3566_v18  ;;  %v3568_v24 = vld [vmem:[%s6876_s1 + $0xc0] sm:$0xff] (!%p163_p2)  ;;  %v3569_v25 = vld [vmem:[%s6876_s1 + $0xc8] sm:$0xff] (!%p163_p2) }
   0xb   : > { %5066 = vmatprep.subr.bf16.mxu0 (!%p163_p2), %v5611_v12  ;;  %v5647_v23 = vpack.c.bf16 (!%p163_p2), %v3615_v21, %v3614_v20  ;;  %v3616_v27 = vld [vmem:[%s6876_s1 + $0x240] sm:$0xff] (!%p163_p2)  ;;  %v3617_v28 = vld [vmem:[%s6876_s1 + $0x248] sm:$0xff] (!%p163_p2)  ;;  %v4949_v30 = vpack.c.bf16 (!%p163_p2), %v3569_v25, %v3568_v24  ;;  %v3570_v32 = vld [vmem:[%s6876_s1 + $0xd0] sm:$0xff] (!%p163_p2) }
   0xc   : > { %v5665_v31 = vpack.c.bf16 (!%p163_p2), %v3617_v28, %v3616_v27  ;;  %v3571_v33 = vld [vmem:[%s6876_s1 + $0xd8] sm:$0xff] (!%p163_p2)  ;;  %v3618_v34 = vld [vmem:[%s6876_s1 + $0x250] sm:$0xff] (!%p163_p2)  ;;  %v3572_v38 = vld [vmem:[%s6876_s1 + $0xe0] sm:$0xff] (!%p163_p2) }
   0xd   : > { %s6881_s16 = smov (!%p188_p3, %s3553_s16), 3  ;;  %4940 = vmatpush3.bf16.msra.mxu1 %v4937_v8  ;;  %v3619_v35 = vld [vmem:[%s6876_s1 + $0x258] sm:$0xff]  ;;  %v4953_v36 = vpack.c.bf16 %v3571_v33, %v3570_v32  ;;  %v3573_v39 = vld [vmem:[%s6876_s1 + $0xe8] sm:$0xff]  ;;  %v3620_v40 = vld [vmem:[%s6876_s1 + $0x260] sm:$0xff] }
   0xe   : > { %s5525_s17 = smul.u32 328, %s6881_s16  ;;  %5068 = vmatpush3.bf16.msra.mxu0 %v5611_v12  ;;  %4942 = vmatprep.subr.bf16.mxu1 %v4941_v16  ;;  %v5681_v37 = vpack.c.bf16 %v3619_v35, %v3618_v34  ;;  %v3621_v41 = vld [vmem:[%s6876_s1 + $0x268] sm:$0xff]  ;;  %v4957_v42 = vpack.c.bf16 %v3573_v39, %v3572_v38  ;;  %v3574_v44 = vld [vmem:[%s6876_s1 + $0xf0] sm:$0xff]  ;;  %v3575_v45 = vld [vmem:[%s6876_s1 + $0xf8] sm:$0xff] }
   0xf   : > { %5070 = vmatprep.subr.bf16.mxu0 %v5626_v17  ;;  %v5697_v43 = vpack.c.bf16 %v3621_v41, %v3620_v40  ;;  %v3622_v46 = vld [vmem:[%s6876_s1 + $0x270] sm:$0xff]  ;;  %v3623_v47 = vld [vmem:[%s6876_s1 + $0x278] sm:$0xff]  ;;  %v4961_v48 = vpack.c.bf16 %v3575_v45, %v3574_v44  ;;  %v234_v50 = vld [vmem:[%s6876_s1] sm:$0xff]  ;;  %s5526_s10 = smul.u32 288, %s6881_s16 }
  0x10   : > { %s5643_s28 = scalar_lea.vmem %s6875_s0, %s5525_s17  ;;  %v5713_v49 = vpack.c.bf16 %v3623_v47, %v3622_v46  ;;  %v235_v51 = vld [vmem:[%s6876_s1 + $0x8] sm:$0xff]  ;;  %v3624_v52 = vld [vmem:[%s6876_s1 + $0x280] sm:$0xff]  ;;  %v3626_v56 = vld [vmem:[%s6876_s1 + $0x290] sm:$0xff] }
  0x11   : > { %v250_v26 = vld [vmem:[%s5643_s28 + $0x1] sm:$0xff]  ;;  %v1461_v29 = vld [vmem:[%s5643_s28 + $0x13] sm:$0xff]  ;;  %4944 = vmatpush3.bf16.msra.mxu1 %v4941_v16  ;;  %v4965_v54 = vpack.c.bf16 %v235_v51, %v234_v50  ;;  %v251_v58 = vld [vmem:[%s5643_s28 + $0x9] sm:$0xff]  ;;  %s6763_s13 = scalar_lea.vmem %s6879_s4, %s5526_s10 }
  0x12   : > { %4191 = vmatprep.mubr.f32.mxu1 %v250_v26  ;;  %4535 = vmatprep.mubr.f32.mxu0 %v1461_v29  ;;  %v3625_v53 = vld [vmem:[%s6876_s1 + $0x288] sm:$0xff]  ;;  %v3627_v57 = vld [vmem:[%s6876_s1 + $0x298] sm:$0xff]  ;;  %v236_v59 = vld [vmem:[%s6876_s1 + $0x10] sm:$0xff] }
  0x13   : > { %5072 = vmatpush3.bf16.msra.mxu0 %v5626_v17  ;;  %4946 = vmatprep.subr.bf16.mxu1 %v4945_v22  ;;  %v5093_v55 = vpack.c.bf16 %v3625_v53, %v3624_v52  ;;  %v237_v60 = vld [vmem:[%s6876_s1 + $0x18] sm:$0xff]  ;;  %v5097_v63 = vpack.c.bf16 %v3627_v57, %v3626_v56  ;;  %v1463_v0 = vld [vmem:[%s5643_s28 + $0x23] sm:$0xff]  ;;  %v1464_v8 = vld [vmem:[%s5643_s28 + $0x2b] sm:$0xff] }
  0x14   : > { %5074 = vmatprep.subr.bf16.mxu0 %v5647_v23  ;;  %v1462_v61 = vld [vmem:[%s5643_s28 + $0x1b] sm:$0xff]  ;;  %v252_v62 = vld [vmem:[%s5643_s28 + $0x11] sm:$0xff]  ;;  %v4969_v1 = vpack.c.bf16 %v237_v60, %v236_v59  ;;  %v3629_v3 = vld [vmem:[%s6876_s1 + $0x2a8] sm:$0xff] }
  0x15   : > { %4948 = vmatpush3.bf16.msra.mxu1 %v4945_v22  ;;  %v3628_v2 = vld [vmem:[%s6876_s1 + $0x2a0] sm:$0xff]  ;;  %v239_v6 = vld [vmem:[%s6876_s1 + $0x28] sm:$0xff]  ;;  %v1465_v10 = vld [vmem:[%s5643_s28 + $0x33] sm:$0xff] }
  0x16   : > { %4950 = vmatprep.subr.bf16.mxu1 %v4949_v30  ;;  %v253_v4 = vld [vmem:[%s5643_s28 + $0x19] sm:$0xff]  ;;  %v254_v9 = vld [vmem:[%s5643_s28 + $0x21] sm:$0xff]  ;;  %v5101_v11 = vpack.c.bf16 %v3629_v3, %v3628_v2  ;;  %v3630_v13 = vld [vmem:[%s6876_s1 + $0x2b0] sm:$0xff] }
  0x17   : > { %5076 = vmatpush3.bf16.msra.mxu0 %v5647_v23  ;;  %v238_v5 = vld [vmem:[%s6876_s1 + $0x20] sm:$0xff]  ;;  %v3631_v14 = vld [vmem:[%s6876_s1 + $0x2b8] sm:$0xff]  ;;  %v255_v16 = vld [vmem:[%s5643_s28 + $0x29] sm:$0xff] }
  0x18   : > { %5078 = vmatprep.subr.bf16.mxu0 %v5665_v31  ;;  %v4973_v15 = vpack.c.bf16 %v239_v6, %v238_v5  ;;  %v240_v18 = vld [vmem:[%s6876_s1 + $0x30] sm:$0xff]  ;;  %v241_v19 = vld [vmem:[%s6876_s1 + $0x38] sm:$0xff]  ;;  %v1467_v22 = vld [vmem:[%s5643_s28 + $0x43] sm:$0xff]  ;;  %v5105_v24 = vpack.c.bf16 %v3631_v14, %v3630_v13 }
  0x19   : > { %4952 = vmatpush3.bf16.msra.mxu1 %v4949_v30  ;;  %v1466_v20 = vld [vmem:[%s5643_s28 + $0x3b] sm:$0xff]  ;;  %v256_v21 = vld [vmem:[%s5643_s28 + $0x31] sm:$0xff]  ;;  %v3633_v26 = vld [vmem:[%s6876_s1 + $0x2c8] sm:$0xff]  ;;  %v4977_v27 = vpack.c.bf16 %v241_v19, %v240_v18 }
  0x1a   : > { %4954 = vmatprep.subr.bf16.mxu1 %v4953_v36  ;;  %v3632_v25 = vld [vmem:[%s6876_s1 + $0x2c0] sm:$0xff]  ;;  %v243_v30 = vld [vmem:[%s6876_s1 + $0x48] sm:$0xff]  ;;  %v1469_v34 = vld [vmem:[%s5643_s28 + $0x53] sm:$0xff] }
  0x1b   : > { %5080 = vmatpush3.bf16.msra.mxu0 %v5665_v31  ;;  %v257_v28 = vld [vmem:[%s5643_s28 + $0x39] sm:$0xff]  ;;  %v1468_v32 = vld [vmem:[%s5643_s28 + $0x4b] sm:$0xff]  ;;  %v258_v33 = vld [vmem:[%s5643_s28 + $0x41] sm:$0xff]  ;;  %v5109_v35 = vpack.c.bf16 %v3633_v26, %v3632_v25 }
  0x1c   : > { %5082 = vmatprep.subr.bf16.mxu0 %v5681_v37  ;;  %v242_v29 = vld [vmem:[%s6876_s1 + $0x40] sm:$0xff]  ;;  %v3635_v38 = vld [vmem:[%s6876_s1 + $0x2d8] sm:$0xff]  ;;  %v259_v40 = vld [vmem:[%s5643_s28 + $0x49] sm:$0xff] }
  0x1d   : > { %4956 = vmatpush3.bf16.msra.mxu1 %v4953_v36  ;;  %v3634_v36 = vld [vmem:[%s6876_s1 + $0x2d0] sm:$0xff]  ;;  %v4981_v39 = vpack.c.bf16 %v243_v30, %v242_v29  ;;  %v1470_v44 = vld [vmem:[%s5643_s28 + $0x5b] sm:$0xff]  ;;  %v1471_v46 = vld [vmem:[%s5643_s28 + $0x63] sm:$0xff] }
  0x1e   : > { %4958 = vmatprep.subr.bf16.mxu1 %v4957_v42  ;;  %v244_v41 = vld [vmem:[%s6876_s1 + $0x50] sm:$0xff]  ;;  %v5113_v47 = vpack.c.bf16 %v3635_v38, %v3634_v36  ;;  %v3637_v50 = vld [vmem:[%s6876_s1 + $0x2e8] sm:$0xff]  ;;  %v261_v52 = vld [vmem:[%s5643_s28 + $0x59] sm:$0xff] }
  0x1f   : > { %5084 = vmatpush3.bf16.msra.mxu0 %v5681_v37  ;;  %v260_v45 = vld [vmem:[%s5643_s28 + $0x51] sm:$0xff]  ;;  %v246_v53 = vld [vmem:[%s6876_s1 + $0x60] sm:$0xff]  ;;  %v3641_v6 = vld [vmem:[%s6876_s1 + $0x308] sm:$0xff] }
  0x20   : > { %5086 = vmatprep.subr.bf16.mxu0 %v5697_v43  ;;  %v262_v56 = vld [vmem:[%s5643_s28 + $0x61] sm:$0xff]  ;;  %v1473_v57 = vld [vmem:[%s5643_s28 + $0x73] sm:$0xff]  ;;  %v1476_v13 = vld [vmem:[%s5643_s28 + $0x8b] sm:$0xff] }
  0x21   : > { %4960 = vmatpush3.bf16.msra.mxu1 %v4957_v42  ;;  %v245_v42 = vld [vmem:[%s6876_s1 + $0x58] sm:$0xff]  ;;  %v3638_v59 = vld [vmem:[%s6876_s1 + $0x2f0] sm:$0xff]  ;;  %v1475_v3 = vld [vmem:[%s5643_s28 + $0x83] sm:$0xff] }
  0x22   : > { %4962 = vmatprep.subr.bf16.mxu1 %v4961_v48  ;;  %v4985_v51 = vpack.c.bf16 %v245_v42, %v244_v41  ;;  %v3639_v60 = vld [vmem:[%s6876_s1 + $0x2f8] sm:$0xff]  ;;  %v3640_v5 = vld [vmem:[%s6876_s1 + $0x300] sm:$0xff]  ;;  %v267_v19 = vld [vmem:[%s5643_s28 + $0x89] sm:$0xff] }
  0x23   : > { %5088 = vmatpush3.bf16.msra.mxu0 %v5697_v43  ;;  %v264_v2 = vld [vmem:[%s5643_s28 + $0x71] sm:$0xff]  ;;  %v266_v14 = vld [vmem:[%s5643_s28 + $0x81] sm:$0xff]  ;;  %v269_v26 = vld [vmem:[%s5643_s28 + $0x99] sm:$0xff] }
  0x24   : > { %5090 = vmatprep.subr.bf16.mxu0 %v5713_v49  ;;  %v3643_v25 = vld [vmem:[%s6876_s1 + $0x318] sm:$0xff]  ;;  %v5875_v29 = vld [vmem:[%s5643_s28 + $0x24] sm:$0xff] }
  0x25   : > { %4964 = vmatpush3.bf16.msra.mxu1 %v4961_v48  ;;  %v3636_v48 = vld [vmem:[%s6876_s1 + $0x2e0] sm:$0xff]  ;;  %v272_v36 = vld [vmem:[%s5643_s28 + $0xb1] sm:$0xff] }
  0x26   : > { %4966 = vmatprep.subr.bf16.mxu1 %v4965_v54  ;;  %v5890_v38 = vld [vmem:[%s5643_s28 + $0x34] sm:$0xff] }
  0x27   : > { %5092 = vmatpush3.bf16.msra.mxu0 %v5713_v49  ;;  %v3647_v41 = vld [vmem:[%s6876_s1 + $0x338] sm:$0xff] }
  0x28   : > { %5094 = vmatprep.subr.bf16.mxu0 %v5093_v55  ;;  %4192 = vmatmul.mubr.f32.vlgmr.msra.gmra.mrb[0].mxu1 %v251_v58  ;;  %v5117_v58 = vpack.c.bf16 %v3637_v50, %v3636_v48  ;;  %v273_v42 = vld [vmem:[%s5643_s28 + $0xb9] sm:$0xff]  ;;  %v3649_v50 = vld [vmem:[%s6876_s1 + $0x348] sm:$0xff] }
  0x29   : > { %4968 = vmatpush3.bf16.msra.mxu1 %v4965_v54  ;;  %4194 = vmatprep.mubr.f32.mxu1 %v252_v62  ;;  %v247_v54 = vld [vmem:[%s6876_s1 + $0x68] sm:$0xff]  ;;  %v3648_v48 = vld [vmem:[%s6876_s1 + $0x340] sm:$0xff] }
  0x2a   : > { %4536 = vmatmul.mubr.f32.vlgmr.msra.gmra.mrb[0].mxu0 %v1462_v61  ;;  %4970 = vmatprep.subr.bf16.mxu1 %v4969_v1  ;;  %v4989_v61 = vpack.c.bf16 %v247_v54, %v246_v53  ;;  %v263_v62 = vld [vmem:[%s5643_s28 + $0x69] sm:$0xff]  ;;  %v276_v53 = vld [vmem:[%s5643_s28 + $0xd1] sm:$0xff] }
  0x2b   : > { %5096 = vmatpush3.bf16.msra.mxu0 %v5093_v55  ;;  %4538 = vmatprep.mubr.f32.mxu0 %v1463_v0  ;;  %v1472_v55 = vld [vmem:[%s5643_s28 + $0x6b] sm:$0xff]  ;;  %v249_v0 = vld [vmem:[%s6876_s1 + $0x78] sm:$0xff] }
  0x2c   : > { %5098 = vmatprep.subr.bf16.mxu0 %v5097_v63  ;;  %4195 = vmatmul.mubr.f32.gmra.mrb[2].mxu1 %v253_v4  ;;  %v5121_v4 = vpack.c.bf16 %v3639_v60, %v3638_v59  ;;  %v5922_v54 = vld [vmem:[%s5643_s28 + $0x54] sm:$0xff]  ;;  %v5934_v59 = vld [vmem:[%s5643_s28 + $0x5c] sm:$0xff] }
  0x2d   : > { %4197 = vmatprep.mubr.f32.mxu1 %v254_v9  ;;  %4972 = vmatpush3.bf16.msra.mxu1 %v4969_v1  ;;  %v1474_v1 = vld [vmem:[%s5643_s28 + $0x7b] sm:$0xff] }
  0x2e   : > { %4539 = vmatmul.mubr.f32.gmra.mrb[2].mxu0 %v1464_v8  ;;  %4974 = vmatprep.subr.bf16.mxu1 %v4973_v15  ;;  %v265_v9 = vld [vmem:[%s5643_s28 + $0x79] sm:$0xff]  ;;  %v278_v60 = vld [vmem:[%s5643_s28 + $0xe1] sm:$0xff] }
  0x2f   : > { %5100 = vmatpush3.bf16.msra.mxu0 %v5097_v63  ;;  %4541 = vmatprep.mubr.f32.mxu0 %v1465_v10  ;;  %v248_v63 = vld [vmem:[%s6876_s1 + $0x70] sm:$0xff]  ;;  %v3576_v10 = vld [vmem:[%s6876_s1 + $0x100] sm:$0xff] }
  0x30   : > { %5102 = vmatprep.subr.bf16.mxu0 %v5101_v11  ;;  %4198 = vmatmul.mubr.f32.gmra.mrb[4].mxu1 %v255_v16  ;;  %v4993_v8 = vpack.c.bf16 %v249_v0, %v248_v63  ;;  %v5125_v16 = vpack.c.bf16 %v3641_v6, %v3640_v5  ;;  %v3652_v63 = vld [vmem:[%s6876_s1 + $0x360] sm:$0xff]  ;;  %v3653_v0 = vld [vmem:[%s6876_s1 + $0x368] sm:$0xff]  ;;  %v3654_v6 = vld [vmem:[%s6876_s1 + $0x370] sm:$0xff] }
  0x31   : > { %4200 = vmatprep.mubr.f32.mxu1 %v256_v21  ;;  %4976 = vmatpush3.bf16.msra.mxu1 %v4973_v15  ;;  %v1477_v15 = vld [vmem:[%s5643_s28 + $0x93] sm:$0xff]  ;;  %v5149_v5 = vpack.c.bf16 %v3653_v0, %v3652_v63  ;;  %v3585_v63 = vld [vmem:[%s6876_s1 + $0x148] sm:$0xff] }
  0x32   : > { %4542 = vmatmul.mubr.f32.gmra.mrb[4].mxu0 %v1466_v20  ;;  %4978 = vmatprep.subr.bf16.mxu1 %v4977_v27  ;;  %v1478_v20 = vld [vmem:[%s5643_s28 + $0x9b] sm:$0xff]  ;;  %v268_v21 = vld [vmem:[%s5643_s28 + $0x91] sm:$0xff] }
  0x33   : > { %5104 = vmatpush3.bf16.msra.mxu0 %v5101_v11  ;;  %4544 = vmatprep.mubr.f32.mxu0 %v1467_v22  ;;  %v3577_v11 = vld [vmem:[%s6876_s1 + $0x108] sm:$0xff]  ;;  %v1795_v22 = vld [vmem:[%s5643_s28 + $0x14] sm:$0xff] }
  0x34   : > { %5106 = vmatprep.subr.bf16.mxu0 %v5105_v24  ;;  %4201 = vmatmul.mubr.f32.gmra.mrb[6].mxu1 %v257_v28  ;;  %v5858_v18 = vpack.c.bf16 %v3577_v11, %v3576_v10  ;;  %v270_v28 = vld [vmem:[%s5643_s28 + $0xa1] sm:$0xff]  ;;  %v205_v0 = vld [vmem:[%s5643_s28 + $0x38] sm:$0xff] }
  0x35   : > { %4203 = vmatprep.mubr.f32.mxu1 %v258_v33  ;;  %4980 = vmatpush3.bf16.msra.mxu1 %v4977_v27  ;;  %v1796_v27 = vld [vmem:[%s5643_s28 + $0x1c] sm:$0xff]  ;;  %v3645_v33 = vld [vmem:[%s6876_s1 + $0x328] sm:$0xff] }
  0x36   : > { %4545 = vmatmul.mubr.f32.gmra.mrb[6].mxu0 %v1468_v32  ;;  %4982 = vmatprep.subr.bf16.mxu1 %v4981_v39  ;;  %v3644_v32 = vld [vmem:[%s6876_s1 + $0x320] sm:$0xff] }
  0x37   : > { %4547 = vmatprep.mubr.f32.mxu0 %v1469_v34  ;;  %5108 = vmatpush3.bf16.msra.mxu0 %v5105_v24  ;;  %v3642_v24 = vld [vmem:[%s6876_s1 + $0x310] sm:$0xff]  ;;  %v5966_v10 = vld [vmem:[%s5643_s28 + $0x7c] sm:$0xff] }
  0x38   : > { %5110 = vmatprep.subr.bf16.mxu0 %v5109_v35  ;;  %4204 = vmatmul.mubr.f32.gmra.mrb[8].mxu1 %v259_v40  ;;  %v5129_v30 = vpack.c.bf16 %v3643_v25, %v3642_v24  ;;  %v271_v34 = vld [vmem:[%s5643_s28 + $0xa9] sm:$0xff]  ;;  %v282_v11 = vld [vmem:[%s5643_s28 + $0x101] sm:$0xff]  ;;  %v285_v25 = vld [vmem:[%s5643_s28 + $0x119] sm:$0xff] }
  0x39   : > { %4206 = vmatprep.mubr.f32.mxu1 %v260_v45  ;;  %4984 = vmatpush3.bf16.msra.mxu1 %v4981_v39  ;;  %v5133_v39 = vpack.c.bf16 %v3645_v33, %v3644_v32  ;;  %v3646_v40 = vld [vmem:[%s6876_s1 + $0x330] sm:$0xff]  ;;  %v274_v45 = vld [vmem:[%s5643_s28 + $0xc1] sm:$0xff]  ;;  %v3579_v32 = vld [vmem:[%s6876_s1 + $0x118] sm:$0xff] }
  0x3a   : > { %4548 = vmatmul.mubr.f32.gmra.mrb[8].mxu0 %v1470_v44  ;;  %4986 = vmatprep.subr.bf16.mxu1 %v4985_v51  ;;  %v5902_v44 = vld [vmem:[%s5643_s28 + $0x3c] sm:$0xff]  ;;  %v199_v33 = vld [vmem:[%s5643_s28 + $0x8] sm:$0xff] }
  0x3b   : > { %4550 = vmatprep.mubr.f32.mxu0 %v1471_v46  ;;  %5112 = vmatpush3.bf16.msra.mxu0 %v5109_v35  ;;  %v5886_v35 = vld [vmem:[%s5643_s28 + $0x2c] sm:$0xff]  ;;  %v5906_v46 = vld [vmem:[%s5643_s28 + $0x44] sm:$0xff] }
  0x3c   : > { %5114 = vmatprep.subr.bf16.mxu0 %v5113_v47  ;;  %4207 = vmatmul.mubr.f32.gmra.mrb[10].mxu1 %v261_v52  ;;  %v5918_v52 = vld [vmem:[%s5643_s28 + $0x4c] sm:$0xff] }
  0x3d   : > { %4209 = vmatprep.mubr.f32.mxu1 %v262_v56  ;;  %4988 = vmatpush3.bf16.msra.mxu1 %v4985_v51  ;;  %v275_v51 = vld [vmem:[%s5643_s28 + $0xc9] sm:$0xff] }
  0x3e   : > { %4551 = vmatmul.mubr.f32.gmra.mrb[10].mxu0 %v1472_v55  ;;  %4990 = vmatprep.subr.bf16.mxu1 %v4989_v61  ;;  %v5141_v55 = vpack.c.bf16 %v3649_v50, %v3648_v48  ;;  %v3650_v56 = vld [vmem:[%s6876_s1 + $0x350] sm:$0xff]  ;;  %v202_v48 = vld [vmem:[%s5643_s28 + $0x20] sm:$0xff] }
  0x3f   : > { %4553 = vmatprep.mubr.f32.mxu0 %v1473_v57  ;;  %5116 = vmatpush3.bf16.msra.mxu0 %v5113_v47  ;;  %v5137_v47 = vpack.c.bf16 %v3647_v41, %v3646_v40  ;;  %v3651_v57 = vld [vmem:[%s6876_s1 + $0x358] sm:$0xff]  ;;  %v3580_v41 = vld [vmem:[%s6876_s1 + $0x120] sm:$0xff] }
  0x40   : > { %5118 = vmatprep.subr.bf16.mxu0 %v5117_v58  ;;  %4210 = vmatmul.mubr.f32.gmra.mrb[12].mxu1 %v263_v62  ;;  %v5145_v62 = vpack.c.bf16 %v3651_v57, %v3650_v56  ;;  %v6032_v50 = vld [vmem:[%s5643_s28 + $0xc4] sm:$0xff]  ;;  %v6044_v56 = vld [vmem:[%s5643_s28 + $0xcc] sm:$0xff] }
  0x41   : > { %4212 = vmatprep.mubr.f32.mxu1 %v264_v2  ;;  %4992 = vmatpush3.bf16.msra.mxu1 %v4989_v61  ;;  %v5938_v61 = vld [vmem:[%s5643_s28 + $0x64] sm:$0xff]  ;;  %v5950_v2 = vld [vmem:[%s5643_s28 + $0x6c] sm:$0xff] }
  0x42   : > { %4554 = vmatmul.mubr.f32.gmra.mrb[12].mxu0 %v1474_v1  ;;  %4994 = vmatprep.subr.bf16.mxu1 %v4993_v8  ;;  %v279_v1 = vld [vmem:[%s5643_s28 + $0xe9] sm:$0xff] }
  0x43   : > { %4556 = vmatprep.mubr.f32.mxu0 %v1475_v3  ;;  %5120 = vmatpush3.bf16.msra.mxu0 %v5117_v58  ;;  %v277_v58 = vld [vmem:[%s5643_s28 + $0xd9] sm:$0xff]  ;;  %v280_v3 = vld [vmem:[%s5643_s28 + $0xf1] sm:$0xff] }
  0x44   : > { %5122 = vmatprep.subr.bf16.mxu0 %v5121_v4  ;;  %4213 = vmatmul.mubr.f32.gmra.mrb[14].mxu1 %v265_v9  ;;  %v281_v9 = vld [vmem:[%s5643_s28 + $0xf9] sm:$0xff]  ;;  %v204_v57 = vld [vmem:[%s5643_s28 + $0x30] sm:$0xff] }
  0x45   : > { %4215 = vmatprep.mubr.f32.mxu1 %v266_v14  ;;  %4996 = vmatpush3.bf16.msra.mxu1 %v4993_v8  ;;  %v3655_v8 = vld [vmem:[%s6876_s1 + $0x378] sm:$0xff] }
  0x46   : > { %4557 = vmatmul.mubr.f32.gmra.mrb[14].mxu0 %v1476_v13  ;;  %4998 = vmatprep.subr.bf16.mxu1 %v5858_v18  ;;  %v5970_v13 = vld [vmem:[%s5643_s28 + $0x84] sm:$0xff]  ;;  %v5153_v14 = vpack.c.bf16 %v3655_v8, %v3654_v6  ;;  %v3586_v8 = vld [vmem:[%s6876_s1 + $0x150] sm:$0xff] }
  0x47   : > { %4559 = vmatprep.mubr.f32.mxu0 %v1477_v15  ;;  %5124 = vmatpush3.bf16.msra.mxu0 %v5121_v4  ;;  %v5954_v4 = vld [vmem:[%s5643_s28 + $0x74] sm:$0xff]  ;;  %v3656_v15 = vld [vmem:[%s6876_s1 + $0x380] sm:$0xff] }
  0x48   : > { %5126 = vmatprep.subr.bf16.mxu0 %v5125_v16  ;;  %4216 = vmatmul.mubr.f32.gmra.mrb[16].mxu1 %v267_v19  ;;  %v283_v19 = vld [vmem:[%s5643_s28 + $0x109] sm:$0xff] }
  0x49   : > { %4218 = vmatprep.mubr.f32.mxu1 %v268_v21  ;;  %v284_v21 = vld [vmem:[%s5643_s28 + $0x111] sm:$0xff] }
  0x4a   : > { %4560 = vmatmul.mubr.f32.gmra.mrb[16].mxu0 %v1478_v20  ;;  %v5982_v20 = vld [vmem:[%s5643_s28 + $0x8c] sm:$0xff] }
  0x4b   : > { %4621 = vmatprep.mubr.f32.mxu0 %v1795_v22  ;;  %v5986_v22 = vld [vmem:[%s5643_s28 + $0x94] sm:$0xff] }
  0x4c   : > { %4219 = vmatmul.mubr.f32.gmra.mrb[18].mxu1 %v269_v26  ;;  %v5994_v26 = vld [vmem:[%s5643_s28 + $0x9c] sm:$0xff] }
  0x4d   : > { %4221 = vmatprep.mubr.f32.mxu1 %v270_v28  ;;  %v5998_v28 = vld [vmem:[%s5643_s28 + $0xa4] sm:$0xff] }
  0x4e   : > { %4622 = vmatmul.mubr.f32.vlgmr.msra.gmra.mrb[0].mxu0 %v1796_v27  ;;  %v198_v27 = vld [vmem:[%s5643_s28] sm:$0xff] }
  0x4f   : > { %5128 = vmatpush3.bf16.msra.mxu0 %v5125_v16  ;;  %4624 = vmatprep.mubr.f32.mxu0 %v5875_v29  ;;  %v3657_v16 = vld [vmem:[%s6876_s1 + $0x388] sm:$0xff] }
  0x50   : > { %5130 = vmatprep.subr.bf16.mxu0 %v5129_v30  ;;  %4222 = vmatmul.mubr.f32.gmra.mrb[20].mxu1 %v271_v34  ;;  %v5988_v24 = vpack.c.bf16 %v3657_v16, %v3656_v15  ;;  %v6011_v34 = vld [vmem:[%s5643_s28 + $0xac] sm:$0xff]  ;;  %v6080_v16 = vld [vmem:[%s5643_s28 + $0xf4] sm:$0xff] }
  0x51   : > { %4224 = vmatprep.mubr.f32.mxu1 %v272_v36  ;;  %v200_v36 = vld [vmem:[%s5643_s28 + $0x10] sm:$0xff] }
  0x52   : > { %4625 = vmatmul.mubr.f32.gmra.mrb[2].mxu0 %v5886_v35  ;;  %v208_v15 = vld [vmem:[%s5643_s28 + $0x50] sm:$0xff] }
  0x53   : > { %4627 = vmatprep.mubr.f32.mxu0 %v5890_v38  ;;  %5132 = vmatpush3.bf16.msra.mxu0 %v5129_v30  ;;  %v3578_v30 = vld [vmem:[%s6876_s1 + $0x110] sm:$0xff] }
  0x54   : > { %5134 = vmatprep.subr.bf16.mxu0 %v5133_v39  ;;  %4225 = vmatmul.mubr.f32.gmra.mrb[22].mxu1 %v273_v42  ;;  %v5001_v40 = vpack.c.bf16 %v3579_v32, %v3578_v30  ;;  %v3581_v42 = vld [vmem:[%s6876_s1 + $0x128] sm:$0xff]  ;;  %v6092_v30 = vld [vmem:[%s5643_s28 + $0xfc] sm:$0xff] }
  0x55   : > { %4227 = vmatprep.mubr.f32.mxu1 %v274_v45  ;;  %v201_v45 = vld [vmem:[%s5643_s28 + $0x18] sm:$0xff]  ;;  %v210_v32 = vld [vmem:[%s5643_s28 + $0x60] sm:$0xff] }
  0x56   : > { %4628 = vmatmul.mubr.f32.gmra.mrb[4].mxu0 %v5902_v44 }
  0x57   : > { %4630 = vmatprep.mubr.f32.mxu0 %v5906_v46  ;;  %5136 = vmatpush3.bf16.msra.mxu0 %v5133_v39  ;;  %v6015_v39 = vld [vmem:[%s5643_s28 + $0xb4] sm:$0xff] }
  0x58   : > { %5138 = vmatprep.subr.bf16.mxu0 %v5137_v47  ;;  %4228 = vmatmul.mubr.f32.gmra.mrb[24].mxu1 %v275_v51  ;;  %v5005_v51 = vpack.c.bf16 %v3581_v42, %v3580_v41  ;;  %v3591_v41 = vld [vmem:[%s6876_s1 + $0x178] sm:$0xff]  ;;  %v211_v42 = vld [vmem:[%s5643_s28 + $0x68] sm:$0xff] }
  0x59   : > { %4230 = vmatprep.mubr.f32.mxu1 %v276_v53  ;;  %v3582_v53 = vld [vmem:[%s6876_s1 + $0x130] sm:$0xff] }
  0x5a   : > { %4631 = vmatmul.mubr.f32.gmra.mrb[6].mxu0 %v5918_v52 }
  0x5b   : > { %4633 = vmatprep.mubr.f32.mxu0 %v5922_v54  ;;  %5140 = vmatpush3.bf16.msra.mxu0 %v5137_v47  ;;  %v6028_v47 = vld [vmem:[%s5643_s28 + $0xbc] sm:$0xff] }
  0x5c   : > { %5142 = vmatprep.subr.bf16.mxu0 %v5141_v55  ;;  %4231 = vmatmul.mubr.f32.gmra.mrb[26].mxu1 %v277_v58  ;;  %v6048_v58 = vld [vmem:[%s5643_s28 + $0xd4] sm:$0xff] }
  0x5d   : > { %4233 = vmatprep.mubr.f32.mxu1 %v278_v60 }
  0x5e   : > { %4634 = vmatmul.mubr.f32.gmra.mrb[8].mxu0 %v5934_v59 }
  0x5f   : > { %4636 = vmatprep.mubr.f32.mxu0 %v5938_v61  ;;  %5144 = vmatpush3.bf16.msra.mxu0 %v5141_v55  ;;  %v203_v55 = vld [vmem:[%s5643_s28 + $0x28] sm:$0xff] }
  0x60   : > { %5146 = vmatprep.subr.bf16.mxu0 %v5145_v62  ;;  %4234 = vmatmul.mubr.f32.gmra.mrb[28].mxu1 %v279_v1  ;;  %v6060_v1 = vld [vmem:[%s5643_s28 + $0xdc] sm:$0xff] }
  0x61   : > { %4236 = vmatprep.mubr.f32.mxu1 %v280_v3  ;;  %v206_v3 = vld [vmem:[%s5643_s28 + $0x40] sm:$0xff] }
  0x62   : > { %4637 = vmatmul.mubr.f32.gmra.mrb[10].mxu0 %v5950_v2 }
  0x63   : > { %4639 = vmatprep.mubr.f32.mxu0 %v5954_v4  ;;  %5148 = vmatpush3.bf16.msra.mxu0 %v5145_v62  ;;  %v3584_v62 = vld [vmem:[%s6876_s1 + $0x140] sm:$0xff] }
  0x64   : > { %5150 = vmatprep.subr.bf16.mxu0 %v5149_v5  ;;  %4237 = vmatmul.mubr.f32.gmra.mrb[30].mxu1 %v281_v9  ;;  %v5013_v6 = vpack.c.bf16 %v3585_v63, %v3584_v62  ;;  %v3587_v9 = vld [vmem:[%s6876_s1 + $0x158] sm:$0xff]  ;;  %v214_v62 = vld [vmem:[%s5643_s28 + $0x80] sm:$0xff] }
  0x65   : > { %4239 = vmatprep.mubr.f32.mxu1 %v282_v11  ;;  %v207_v11 = vld [vmem:[%s5643_s28 + $0x48] sm:$0xff] }
  0x66   : > { %4640 = vmatmul.mubr.f32.gmra.mrb[12].mxu0 %v5966_v10  ;;  %v6128_v63 = vld [vmem:[%s5643_s28 + $0x124] sm:$0xff] }
  0x67   : > { %4642 = vmatprep.mubr.f32.mxu0 %v5970_v13  ;;  %5152 = vmatpush3.bf16.msra.mxu0 %v5149_v5  ;;  %v6064_v5 = vld [vmem:[%s5643_s28 + $0xe4] sm:$0xff] }
  0x68   : > { %5154 = vmatprep.subr.bf16.mxu0 %v5153_v14  ;;  %4240 = vmatmul.mubr.f32.gmra.mrb[32].mxu1 %v283_v19  ;;  %v5017_v19 = vpack.c.bf16 %v3587_v9, %v3586_v8  ;;  %v216_v8 = vld [vmem:[%s5643_s28 + $0x90] sm:$0xff] }
  0x69   : > { %4242 = vmatprep.mubr.f32.mxu1 %v284_v21  ;;  %v3588_v21 = vld [vmem:[%s6876_s1 + $0x160] sm:$0xff]  ;;  %v3658_v9 = vld [vmem:[%s6876_s1 + $0x390] sm:$0xff] }
  0x6a   : > { %4643 = vmatmul.mubr.f32.gmra.mrb[14].mxu0 %v5982_v20 }
  0x6b   : > { %4645 = vmatprep.mubr.f32.mxu0 %v5986_v22  ;;  %5156 = vmatpush3.bf16.msra.mxu0 %v5153_v14  ;;  %v6076_v14 = vld [vmem:[%s5643_s28 + $0xec] sm:$0xff] }
  0x6c   : > { %5158 = vmatprep.subr.bf16.mxu0 %v5988_v24  ;;  %4243 = vmatmul.mubr.f32.gmra.mrb[34].mxu1 %v285_v25  ;;  %v3589_v25 = vld [vmem:[%s6876_s1 + $0x168] sm:$0xff] }
  0x6d   : > { %4277 = vmatprep.mubr.f32.mxu1 %v198_v27  ;;  %v209_v27 = vld [vmem:[%s5643_s28 + $0x58] sm:$0xff] }
  0x6e   : > { %4646 = vmatmul.mubr.f32.gmra.mrb[16].mxu0 %v5994_v26 }
  0x6f   : > { %4648 = vmatprep.mubr.f32.mxu0 %v5998_v28 }
  0x70   : > { %4278 = vmatmul.mubr.f32.vlgmr.msra.gmra.mrb[0].mxu1 %v199_v33  ;;  %v6096_v33 = vld [vmem:[%s5643_s28 + $0x104] sm:$0xff] }
  0x71   : > { %5000 = vmatpush3.bf16.msra.mxu1 %v5858_v18  ;;  %4280 = vmatprep.mubr.f32.mxu1 %v200_v36  ;;  %v3583_v18 = vld [vmem:[%s6876_s1 + $0x138] sm:$0xff]  ;;  %v5021_v36 = vpack.c.bf16 %v3589_v25, %v3588_v21  ;;  %v3660_v25 = vld [vmem:[%s6876_s1 + $0x3a0] sm:$0xff] }
  0x72   : > { %4649 = vmatmul.mubr.f32.gmra.mrb[18].mxu0 %v6011_v34  ;;  %5002 = vmatprep.subr.bf16.mxu1 %v5001_v40  ;;  %v5009_v60 = vpack.c.bf16 %v3583_v18, %v3582_v53  ;;  %v3592_v18 = vld [vmem:[%s6876_s1 + $0x180] sm:$0xff] }
  0x73   : > { %4651 = vmatprep.mubr.f32.mxu0 %v6015_v39 }
  0x74   : > { %4281 = vmatmul.mubr.f32.gmra.mrb[2].mxu1 %v201_v45  ;;  %v6108_v45 = vld [vmem:[%s5643_s28 + $0x10c] sm:$0xff] }
  0x75   : > { %4283 = vmatprep.mubr.f32.mxu1 %v202_v48  ;;  %5004 = vmatpush3.bf16.msra.mxu1 %v5001_v40  ;;  %v3590_v40 = vld [vmem:[%s6876_s1 + $0x170] sm:$0xff] }
  0x76   : > { %4652 = vmatmul.mubr.f32.gmra.mrb[20].mxu0 %v6028_v47  ;;  %5006 = vmatprep.subr.bf16.mxu1 %v5005_v51  ;;  %v212_v48 = vld [vmem:[%s5643_s28 + $0x70] sm:$0xff]  ;;  %v5025_v53 = vpack.c.bf16 %v3591_v41, %v3590_v40 }
  0x77   : > { %4654 = vmatprep.mubr.f32.mxu0 %v6032_v50  ;;  %v3662_v40 = vld [vmem:[%s6876_s1 + $0x3b0] sm:$0xff] }
  0x78   : > { %4284 = vmatmul.mubr.f32.gmra.mrb[4].mxu1 %v203_v55  ;;  %v3593_v55 = vld [vmem:[%s6876_s1 + $0x188] sm:$0xff] }
  0x79   : > { %4286 = vmatprep.mubr.f32.mxu1 %v204_v57  ;;  %5008 = vmatpush3.bf16.msra.mxu1 %v5005_v51  ;;  %v6112_v51 = vld [vmem:[%s5643_s28 + $0x114] sm:$0xff] }
  0x7a   : > { %4655 = vmatmul.mubr.f32.gmra.mrb[22].mxu0 %v6044_v56  ;;  %5010 = vmatprep.subr.bf16.mxu1 %v5009_v60  ;;  %v213_v57 = vld [vmem:[%s5643_s28 + $0x78] sm:$0xff] }
  0x7b   : > { %4657 = vmatprep.mubr.f32.mxu0 %v6048_v58 }
  0x7c   : > { %4287 = vmatmul.mubr.f32.gmra.mrb[6].mxu1 %v205_v0  ;;  %v6130_v0 = vpack.c.bf16 %v3593_v55, %v3592_v18  ;;  %v3666_v18 = vld [vmem:[%s6876_s1 + $0x3d0] sm:$0xff]  ;;  %v3667_v55 = vld [vmem:[%s6876_s1 + $0x3d8] sm:$0xff] }
  0x7d   : > { %4289 = vmatprep.mubr.f32.mxu1 %v206_v3  ;;  %5012 = vmatpush3.bf16.msra.mxu1 %v5009_v60  ;;  %v6124_v60 = vld [vmem:[%s5643_s28 + $0x11c] sm:$0xff]  ;;  %v215_v3 = vld [vmem:[%s5643_s28 + $0x88] sm:$0xff] }
  0x7e   : > { %4658 = vmatmul.mubr.f32.gmra.mrb[24].mxu0 %v6060_v1  ;;  %5014 = vmatprep.subr.bf16.mxu1 %v5013_v6 }
  0x7f   : > { %4660 = vmatprep.mubr.f32.mxu0 %v6064_v5 }
  0x80   : > { %4290 = vmatmul.mubr.f32.gmra.mrb[8].mxu1 %v207_v11  ;;  %v3659_v11 = vld [vmem:[%s6876_s1 + $0x398] sm:$0xff] }
  0x81   : > { %4292 = vmatprep.mubr.f32.mxu1 %v208_v15  ;;  %5016 = vmatpush3.bf16.msra.mxu1 %v5013_v6  ;;  %v6136_v6 = vld [vmem:[%s5643_s28 + $0x12c] sm:$0xff]  ;;  %v217_v15 = vld [vmem:[%s5643_s28 + $0x98] sm:$0xff]  ;;  %v5161_v21 = vpack.c.bf16 %v3659_v11, %v3658_v9 }
  0x82   : > { %4661 = vmatmul.mubr.f32.gmra.mrb[26].mxu0 %v6076_v14  ;;  %5018 = vmatprep.subr.bf16.mxu1 %v5017_v19  ;;  %v3670_v9 = vld [vmem:[%s6876_s1 + $0x3f0] sm:$0xff]  ;;  %v3671_v11 = vld [vmem:[%s6876_s1 + $0x3f8] sm:$0xff] }
  0x83   : > { %4663 = vmatprep.mubr.f32.mxu0 %v6080_v16 }
  0x84   : > { %4293 = vmatmul.mubr.f32.gmra.mrb[10].mxu1 %v209_v27  ;;  %v3661_v27 = vld [vmem:[%s6876_s1 + $0x3a8] sm:$0xff] }
  0x85   : > { %4295 = vmatprep.mubr.f32.mxu1 %v210_v32  ;;  %5020 = vmatpush3.bf16.msra.mxu1 %v5017_v19  ;;  %v218_v19 = vld [vmem:[%s5643_s28 + $0xa0] sm:$0xff]  ;;  %v219_v32 = vld [vmem:[%s5643_s28 + $0xa8] sm:$0xff] }
  0x86   : > { %4664 = vmatmul.mubr.f32.gmra.mrb[28].mxu0 %v6092_v30  ;;  %5022 = vmatprep.subr.bf16.mxu1 %v5021_v36 }
  0x87   : > { %4666 = vmatprep.mubr.f32.mxu0 %v6096_v33 }
  0x88   : > { %4296 = vmatmul.mubr.f32.gmra.mrb[12].mxu1 %v211_v42  ;;  %v3664_v42 = vld [vmem:[%s6876_s1 + $0x3c0] sm:$0xff] }
  0x89   : > { %4298 = vmatprep.mubr.f32.mxu1 %v212_v48  ;;  %5024 = vmatpush3.bf16.msra.mxu1 %v5021_v36  ;;  %v5165_v36 = vpack.c.bf16 %v3661_v27, %v3660_v25  ;;  %v3665_v48 = vld [vmem:[%s6876_s1 + $0x3c8] sm:$0xff]  ;;  %v233_v27 = vld [vmem:[%s5643_s28 + $0x118] sm:$0xff] }
  0x8a   : > { %4667 = vmatmul.mubr.f32.gmra.mrb[30].mxu0 %v6108_v45  ;;  %5026 = vmatprep.subr.bf16.mxu1 %v5025_v53 }
  0x8b   : > { %4669 = vmatprep.mubr.f32.mxu0 %v6112_v51 }
  0x8c   : > { %4299 = vmatmul.mubr.f32.gmra.mrb[14].mxu1 %v213_v57  ;;  %v5177_v57 = vpack.c.bf16 %v3667_v55, %v3666_v18  ;;  %v6298_v18 = vld [vmem:[%s5643_s28 + $0x42] sm:$0xff] }
  0x8d   : > { %4301 = vmatprep.mubr.f32.mxu1 %v214_v62  ;;  %5028 = vmatpush3.bf16.msra.mxu1 %v5025_v53  ;;  %v5173_v53 = vpack.c.bf16 %v3665_v48, %v3664_v42  ;;  %v3668_v62 = vld [vmem:[%s6876_s1 + $0x3e0] sm:$0xff]  ;;  %v6276_v42 = vld [vmem:[%s5643_s28 + $0x32] sm:$0xff] }
  0x8e   : > { %4670 = vmatmul.mubr.f32.gmra.mrb[32].mxu0 %v6124_v60  ;;  %5030 = vmatprep.subr.bf16.mxu1 %v6130_v0 }
  0x8f   : > { %4672 = vmatprep.mubr.f32.mxu0 %v6128_v63 }
  0x90   : > { %4302 = vmatmul.mubr.f32.gmra.mrb[16].mxu1 %v215_v3  ;;  %v3669_v3 = vld [vmem:[%s6876_s1 + $0x3e8] sm:$0xff] }
  0x91   : > { %4304 = vmatprep.mubr.f32.mxu1 %v216_v8  ;;  %v5181_v8 = vpack.c.bf16 %v3669_v3, %v3668_v62  ;;  %v6320_v62 = vld [vmem:[%s5643_s28 + $0x52] sm:$0xff] }
  0x92   : > { %4673 = vmatmul.mubr.f32.gmra.mrb[34].mxu0 %v6136_v6 }
  0x93   : > { %4707 = vmatprep.mubr.f32.mxu0 %v5875_v29  ;;  %v220_v29 = vld [vmem:[%s5643_s28 + $0xb0] sm:$0xff] }
  0x94   : > { %4305 = vmatmul.mubr.f32.gmra.mrb[18].mxu1 %v217_v15  ;;  %v5185_v15 = vpack.c.bf16 %v3671_v11, %v3670_v9  ;;  %v6342_v9 = vld [vmem:[%s5643_s28 + $0x62] sm:$0xff] }
  0x95   : > { %4307 = vmatprep.mubr.f32.mxu1 %v218_v19  ;;  %v3672_v19 = vld [vmem:[%s6876_s1 + $0x400] sm:$0xff] }
  0x96   : > { %4708 = vmatmul.mubr.f32.vlgmr.msra.gmra.mrb[0].mxu0 %v5886_v35  ;;  %v3663_v35 = vld [vmem:[%s6876_s1 + $0x3b8] sm:$0xff] }
  0x97   : > { %5160 = vmatpush3.bf16.msra.mxu0 %v5988_v24  ;;  %4710 = vmatprep.mubr.f32.mxu0 %v5890_v38  ;;  %v221_v24 = vld [vmem:[%s5643_s28 + $0xb8] sm:$0xff]  ;;  %v222_v38 = vld [vmem:[%s5643_s28 + $0xc0] sm:$0xff]  ;;  %v5169_v41 = vpack.c.bf16 %v3663_v35, %v3662_v40  ;;  %v3597_v40 = vld [vmem:[%s6876_s1 + $0x1a8] sm:$0xff] }
  0x98   : > { %5162 = vmatprep.subr.bf16.mxu0 %v5161_v21  ;;  %4308 = vmatmul.mubr.f32.gmra.mrb[20].mxu1 %v219_v32  ;;  %v793_v32 = vld [vmem:[%s5643_s28 + $0x2] sm:$0xff] }
  0x99   : > { %4310 = vmatprep.mubr.f32.mxu1 %v220_v29 }
  0x9a   : > { %4711 = vmatmul.mubr.f32.gmra.mrb[2].mxu0 %v5902_v44  ;;  %v223_v44 = vld [vmem:[%s5643_s28 + $0xc8] sm:$0xff] }
  0x9b   : > { %4713 = vmatprep.mubr.f32.mxu0 %v5906_v46  ;;  %5164 = vmatpush3.bf16.msra.mxu0 %v5161_v21  ;;  %v224_v46 = vld [vmem:[%s5643_s28 + $0xd0] sm:$0xff]  ;;  %v3673_v21 = vld [vmem:[%s6876_s1 + $0x408] sm:$0xff] }
  0x9c   : > { %5166 = vmatprep.subr.bf16.mxu0 %v5165_v36  ;;  %4311 = vmatmul.mubr.f32.gmra.mrb[22].mxu1 %v221_v24  ;;  %v6221_v25 = vpack.c.bf16 %v3673_v21, %v3672_v19  ;;  %v5546_v24 = vmov 0   ;;  %v6364_v19 = vld [vmem:[%s5643_s28 + $0x72] sm:$0xff] }
  0x9d   : > { %4313 = vmatprep.mubr.f32.mxu1 %v222_v38  ;;  %5537 = vset.pattern.permute.xlu1 %v5546_v24  ;;  %v6269_v38 = vld [vmem:[%s5643_s28 + $0x2a] sm:$0xff] }
  0x9e   : > { %4714 = vmatmul.mubr.f32.gmra.mrb[4].mxu0 %v5918_v52  ;;  %v225_v52 = vld [vmem:[%s5643_s28 + $0xd8] sm:$0xff]  ;;  %5536 = vset.pattern.permute.xlu0 %v5546_v24  ;;  %v2464_v24 = vld [vmem:[%s5643_s28 + $0x2d] sm:$0xff] }
  0x9f   : > { %4716 = vmatprep.mubr.f32.mxu0 %v5922_v54  ;;  %5168 = vmatpush3.bf16.msra.mxu0 %v5165_v36  ;;  %v226_v54 = vld [vmem:[%s5643_s28 + $0xe0] sm:$0xff] }
  0xa0   : > { %5170 = vmatprep.subr.bf16.mxu0 %v5169_v41  ;;  %4314 = vmatmul.mubr.f32.gmra.mrb[24].mxu1 %v223_v44  ;;  %v3596_v36 = vld [vmem:[%s6876_s1 + $0x1a0] sm:$0xff]  ;;  %v3601_v44 = vld [vmem:[%s6876_s1 + $0x1c8] sm:$0xff] }
  0xa1   : > { %4316 = vmatprep.mubr.f32.mxu1 %v224_v46  ;;  %v5037_v35 = vpack.c.bf16 %v3597_v40, %v3596_v36  ;;  %v6291_v46 = vld [vmem:[%s5643_s28 + $0x3a] sm:$0xff] }
  0xa2   : > { %4717 = vmatmul.mubr.f32.gmra.mrb[6].mxu0 %v5934_v59  ;;  %v227_v59 = vld [vmem:[%s5643_s28 + $0xe8] sm:$0xff]  ;;  %v3225_v36 = vld [vmem:[%s6878_s3 + $0x78] sm:$0xff] }
  0xa3   : > { %4719 = vmatprep.mubr.f32.mxu0 %v5938_v61  ;;  %5172 = vmatpush3.bf16.msra.mxu0 %v5169_v41  ;;  %v228_v61 = vld [vmem:[%s5643_s28 + $0xf0] sm:$0xff]  ;;  %v3210_v41 = vld [vmem:[%s6878_s3] sm:$0xff] }
  0xa4   : > { %5174 = vmatprep.subr.bf16.mxu0 %v5173_v53  ;;  %4317 = vmatmul.mubr.f32.gmra.mrb[26].mxu1 %v225_v52  ;;  %v3603_v52 = vld [vmem:[%s6876_s1 + $0x1d8] sm:$0xff] }
  0xa5   : > { %4319 = vmatprep.mubr.f32.mxu1 %v226_v54  ;;  %3248 = vperm.xlu0 %5536, %v3210_v41   ;;  %v6313_v54 = vld [vmem:[%s5643_s28 + $0x4a] sm:$0xff]  ;;  %v6413_v40 = vld [vmem:[%s5643_s28 + $0x9a] sm:$0xff] }
  0xa6   : > { %4720 = vmatmul.mubr.f32.gmra.mrb[8].mxu0 %v5950_v2  ;;  %v229_v2 = vld [vmem:[%s5643_s28 + $0xf8] sm:$0xff]  ;;  %v3676_v41 = vld [vmem:[%s6876_s1 + $0x420] sm:$0xff] }
  0xa7   : > { %4722 = vmatprep.mubr.f32.mxu0 %v5954_v4  ;;  %5176 = vmatpush3.bf16.msra.mxu0 %v5173_v53  ;;  %v230_v4 = vld [vmem:[%s5643_s28 + $0x100] sm:$0xff]  ;;  %v3211_v53 = vld [vmem:[%s6878_s3 + $0x8] sm:$0xff] }
  0xa8   : > { %5178 = vmatprep.subr.bf16.mxu0 %v5177_v57  ;;  %4320 = vmatmul.mubr.f32.gmra.mrb[28].mxu1 %v227_v59  ;;  %v3605_v59 = vld [vmem:[%s6876_s1 + $0x1e8] sm:$0xff] }
  0xa9   : > { %4322 = vmatprep.mubr.f32.mxu1 %v228_v61  ;;  %3253 = vperm.xlu0 %5536, %v3211_v53   ;;  %v6335_v61 = vld [vmem:[%s5643_s28 + $0x5a] sm:$0xff] }
  0xaa   : > { %4723 = vmatmul.mubr.f32.gmra.mrb[10].mxu0 %v5966_v10  ;;  %v231_v10 = vld [vmem:[%s5643_s28 + $0x108] sm:$0xff]  ;;  %v2466_v53 = vld [vmem:[%s5643_s28 + $0x3d] sm:$0xff] }
  0xab   : > { %4725 = vmatprep.mubr.f32.mxu0 %v5970_v13  ;;  %5180 = vmatpush3.bf16.msra.mxu0 %v5177_v57  ;;  %v232_v13 = vld [vmem:[%s5643_s28 + $0x110] sm:$0xff]  ;;  %v3214_v57 = vld [vmem:[%s6878_s3 + $0x20] sm:$0xff] }
  0xac   : > { %5182 = vmatprep.subr.bf16.mxu0 %v5181_v8  ;;  %4323 = vmatmul.mubr.f32.gmra.mrb[30].mxu1 %v229_v2  ;;  %v3607_v2 = vld [vmem:[%s6876_s1 + $0x1f8] sm:$0xff] }
  0xad   : > { %4325 = vmatprep.mubr.f32.mxu1 %v230_v4  ;;  %3268 = vperm.xlu0 %5536, %v3214_v57   ;;  %v6357_v4 = vld [vmem:[%s5643_s28 + $0x6a] sm:$0xff]  ;;  %v3229_v57 = vld [vmem:[%s6878_s3 + $0x98] sm:$0xff] }
  0xae   : > { %4726 = vmatmul.mubr.f32.gmra.mrb[12].mxu0 %v5982_v20  ;;  %v3594_v20 = vld [vmem:[%s6876_s1 + $0x190] sm:$0xff] }
  0xaf   : > { %4728 = vmatprep.mubr.f32.mxu0 %v5986_v22  ;;  %5184 = vmatpush3.bf16.msra.mxu0 %v5181_v8  ;;  %v3595_v22 = vld [vmem:[%s6876_s1 + $0x198] sm:$0xff]  ;;  %v3216_v8 = vld [vmem:[%s6878_s3 + $0x30] sm:$0xff] }
  0xb0   : > { %5186 = vmatprep.subr.bf16.mxu0 %v5185_v15  ;;  %4326 = vmatmul.mubr.f32.gmra.mrb[32].mxu1 %v231_v10  ;;  %v5033_v29 = vpack.c.bf16 %v3595_v22, %v3594_v20  ;;  %v3220_v10 = vld [vmem:[%s6878_s3 + $0x50] sm:$0xff]  ;;  %v2164_v20 = vld [vmem:[%s5643_s28 + $0x13c] sm:$0xff] }
  0xb1   : > { %4328 = vmatprep.mubr.f32.mxu1 %v232_v13  ;;  %3278 = vperm.xlu0 %5536, %v3216_v8   ;;  %v6380_v13 = vld [vmem:[%s5643_s28 + $0x82] sm:$0xff]  ;;  %v6397_v22 = vld [vmem:[%s5643_s28 + $0x92] sm:$0xff] }
  0xb2   : > { %4729 = vmatmul.mubr.f32.gmra.mrb[14].mxu0 %v5994_v26  ;;  %v794_v26 = vld [vmem:[%s5643_s28 + $0xa] sm:$0xff]  ;;  %v2469_v8 = vld [vmem:[%s5643_s28 + $0x55] sm:$0xff] }
  0xb3   : > { %4731 = vmatprep.mubr.f32.mxu0 %v5998_v28  ;;  %5188 = vmatpush3.bf16.msra.mxu0 %v5185_v15  ;;  %v6238_v28 = vld [vmem:[%s5643_s28 + $0x12] sm:$0xff]  ;;  %v3218_v15 = vld [vmem:[%s6878_s3 + $0x40] sm:$0xff] }
  0xb4   : > { %5190 = vmatprep.subr.bf16.mxu0 %v6221_v25  ;;  %4329 = vmatmul.mubr.f32.gmra.mrb[34].mxu1 %v233_v27  ;;  %v2163_v27 = vld [vmem:[%s5643_s28 + $0x134] sm:$0xff] }
  0xb5   : > { %4363 = vmatprep.mubr.f32.mxu1 %v793_v32  ;;  %3288 = vperm.xlu0 %5536, %v3218_v15   ;;  %v6390_v32 = vld [vmem:[%s5643_s28 + $0x8a] sm:$0xff] }
  0xb6   : > { %4732 = vmatmul.mubr.f32.gmra.mrb[16].mxu0 %v6011_v34  ;;  %v6249_v34 = vld [vmem:[%s5643_s28 + $0x1a] sm:$0xff]  ;;  %v6480_v15 = vld [vmem:[%s5643_s28 + $0xca] sm:$0xff] }
  0xb7   : > { %4734 = vmatprep.mubr.f32.mxu0 %v6015_v39  ;;  %v6254_v39 = vld [vmem:[%s5643_s28 + $0x22] sm:$0xff] }
  0xb8   : > { %4364 = vmatmul.mubr.f32.vlgmr.msra.gmra.mrb[0].mxu1 %v794_v26  ;;  %v2463_v26 = vld [vmem:[%s5643_s28 + $0x25] sm:$0xff] }
  0xb9   : > { %5032 = vmatpush3.bf16.msra.mxu1 %v6130_v0  ;;  %4366 = vmatprep.mubr.f32.mxu1 %v6238_v28  ;;  %v3599_v0 = vld [vmem:[%s6876_s1 + $0x1b8] sm:$0xff] }
  0xba   : > { %4735 = vmatmul.mubr.f32.gmra.mrb[18].mxu0 %v6028_v47  ;;  %5034 = vmatprep.subr.bf16.mxu1 %v5033_v29  ;;  %v3598_v47 = vld [vmem:[%s6876_s1 + $0x1b0] sm:$0xff] }
  0xbb   : > { %4737 = vmatprep.mubr.f32.mxu0 %v6032_v50  ;;  %v3212_v50 = vld [vmem:[%s6878_s3 + $0x10] sm:$0xff]  ;;  %v5041_v48 = vpack.c.bf16 %v3599_v0, %v3598_v47  ;;  %3298 = vperm.xlu0 %5536, %v3220_v10   ;;  %v6420_v47 = vld [vmem:[%s5643_s28 + $0xa2] sm:$0xff] }
  0xbc   : > { %4367 = vmatmul.mubr.f32.gmra.mrb[2].mxu1 %v6249_v34  ;;  %3258 = vperm.xlu1 %5537, %v3212_v50   ;;  %v2465_v0 = vld [vmem:[%s5643_s28 + $0x35] sm:$0xff] }
  0xbd   : > { %4369 = vmatprep.mubr.f32.mxu1 %v6254_v39  ;;  %5036 = vmatpush3.bf16.msra.mxu1 %v5033_v29  ;;  %v3675_v29 = vld [vmem:[%s6876_s1 + $0x418] sm:$0xff] }
  0xbe   : > { %4738 = vmatmul.mubr.f32.gmra.mrb[20].mxu0 %v6044_v56  ;;  %5038 = vmatprep.subr.bf16.mxu1 %v5037_v35  ;;  %v3600_v56 = vld [vmem:[%s6876_s1 + $0x1c0] sm:$0xff]  ;;  %v6487_v10 = vld [vmem:[%s5643_s28 + $0xd2] sm:$0xff] }
  0xbf   : > { %4740 = vmatprep.mubr.f32.mxu0 %v6048_v58  ;;  %v3213_v58 = vld [vmem:[%s6878_s3 + $0x18] sm:$0xff]  ;;  %v5045_v55 = vpack.c.bf16 %v3601_v44, %v3600_v56  ;;  %v3227_v56 = vld [vmem:[%s6878_s3 + $0x88] sm:$0xff] }
  0xc0   : > { %4370 = vmatmul.mubr.f32.gmra.mrb[4].mxu1 %v6269_v38  ;;  %3263 = vperm.xlu1 %5537, %v3213_v58   ;;  %v6435_v44 = vld [vmem:[%s5643_s28 + $0xaa] sm:$0xff]  ;;  %v3226_v58 = vld [vmem:[%s6878_s3 + $0x80] sm:$0xff] }
  0xc1   : > { %4372 = vmatprep.mubr.f32.mxu1 %v6276_v42  ;;  %5040 = vmatpush3.bf16.msra.mxu1 %v5037_v35  ;;  %v3224_v35 = vld [vmem:[%s6878_s3 + $0x70] sm:$0xff] }
  0xc2   : > { %4741 = vmatmul.mubr.f32.gmra.mrb[22].mxu0 %v6060_v1  ;;  %5042 = vmatprep.subr.bf16.mxu1 %v5041_v48  ;;  %v3602_v1 = vld [vmem:[%s6876_s1 + $0x1d0] sm:$0xff] }
  0xc3   : > { %4743 = vmatprep.mubr.f32.mxu0 %v6064_v5  ;;  %v3215_v5 = vld [vmem:[%s6878_s3 + $0x28] sm:$0xff]  ;;  %v5049_v3 = vpack.c.bf16 %v3603_v52, %v3602_v1 }
  0xc4   : > { %4373 = vmatmul.mubr.f32.gmra.mrb[6].mxu1 %v6291_v46  ;;  %3273 = vperm.xlu1 %5537, %v3215_v5   ;;  %v2467_v1 = vld [vmem:[%s5643_s28 + $0x45] sm:$0xff]  ;;  %v3678_v5 = vld [vmem:[%s6876_s1 + $0x430] sm:$0xff] }
  0xc5   : > { %4375 = vmatprep.mubr.f32.mxu1 %v6298_v18  ;;  %5044 = vmatpush3.bf16.msra.mxu1 %v5041_v48  ;;  %v3677_v48 = vld [vmem:[%s6876_s1 + $0x428] sm:$0xff] }
  0xc6   : > { %4744 = vmatmul.mubr.f32.gmra.mrb[24].mxu0 %v6076_v14  ;;  %5046 = vmatprep.subr.bf16.mxu1 %v5045_v55  ;;  %v3604_v14 = vld [vmem:[%s6876_s1 + $0x1e0] sm:$0xff]  ;;  %v5197_v52 = vpack.c.bf16 %v3677_v48, %v3676_v41  ;;  %v3685_v41 = vld [vmem:[%s6876_s1 + $0x468] sm:$0xff] }
  0xc7   : > { %4746 = vmatprep.mubr.f32.mxu0 %v6080_v16  ;;  %v3217_v16 = vld [vmem:[%s6878_s3 + $0x38] sm:$0xff]  ;;  %v5053_v11 = vpack.c.bf16 %v3605_v59, %v3604_v14  ;;  %v3228_v14 = vld [vmem:[%s6878_s3 + $0x90] sm:$0xff]  ;;  %v3235_v48 = vld [vmem:[%s6878_s3 + $0xc8] sm:$0xff] }
  0xc8   : > { %4376 = vmatmul.mubr.f32.gmra.mrb[8].mxu1 %v6313_v54  ;;  %3283 = vperm.xlu1 %5537, %v3217_v16   ;;  %v2468_v59 = vld [vmem:[%s5643_s28 + $0x4d] sm:$0xff]  ;;  %v6465_v16 = vld [vmem:[%s5643_s28 + $0xc2] sm:$0xff] }
  0xc9   : > { %4378 = vmatprep.mubr.f32.mxu1 %v6320_v62  ;;  %5048 = vmatpush3.bf16.msra.mxu1 %v5045_v55  ;;  %v6443_v55 = vld [vmem:[%s5643_s28 + $0xb2] sm:$0xff] }
  0xca   : > { %4747 = vmatmul.mubr.f32.gmra.mrb[26].mxu0 %v6092_v30  ;;  %5050 = vmatprep.subr.bf16.mxu1 %v5049_v3  ;;  %v3606_v30 = vld [vmem:[%s6876_s1 + $0x1f0] sm:$0xff] }
  0xcb   : > { %4749 = vmatprep.mubr.f32.mxu0 %v6096_v33  ;;  %v3219_v33 = vld [vmem:[%s6878_s3 + $0x48] sm:$0xff]  ;;  %v5057_v21 = vpack.c.bf16 %v3607_v2, %v3606_v30  ;;  %v3680_v30 = vld [vmem:[%s6876_s1 + $0x440] sm:$0xff] }
  0xcc   : > { %4379 = vmatmul.mubr.f32.gmra.mrb[10].mxu1 %v6335_v61  ;;  %3293 = vperm.xlu1 %5537, %v3219_v33   ;;  %v3681_v2 = vld [vmem:[%s6876_s1 + $0x448] sm:$0xff] }
  0xcd   : > { %4381 = vmatprep.mubr.f32.mxu1 %v6342_v9  ;;  %5052 = vmatpush3.bf16.msra.mxu1 %v5049_v3  ;;  %v6458_v3 = vld [vmem:[%s5643_s28 + $0xba] sm:$0xff]  ;;  %v3231_v33 = vld [vmem:[%s6878_s3 + $0xa8] sm:$0xff] }
  0xce   : > { %4750 = vmatmul.mubr.f32.gmra.mrb[28].mxu0 %v6108_v45  ;;  %5054 = vmatprep.subr.bf16.mxu1 %v5053_v11  ;;  %v3221_v45 = vld [vmem:[%s6878_s3 + $0x58] sm:$0xff] }
  0xcf   : > { %4752 = vmatprep.mubr.f32.mxu0 %v6112_v51  ;;  %v6373_v51 = vld [vmem:[%s5643_s28 + $0x7a] sm:$0xff] }
  0xd0   : > { %4382 = vmatmul.mubr.f32.gmra.mrb[12].mxu1 %v6357_v4  ;;  %3303 = vperm.xlu1 %5537, %v3221_v45   ;;  %v2470_v45 = vld [vmem:[%s5643_s28 + $0x5d] sm:$0xff] }
  0xd1   : > { %4384 = vmatprep.mubr.f32.mxu1 %v6364_v19  ;;  %5056 = vmatpush3.bf16.msra.mxu1 %v5053_v11 }
  0xd2   : > { %4753 = vmatmul.mubr.f32.gmra.mrb[30].mxu0 %v6124_v60  ;;  %5058 = vmatprep.subr.bf16.mxu1 %v5057_v21  ;;  %v3223_v60 = vld [vmem:[%s6878_s3 + $0x68] sm:$0xff] }
  0xd3   : > { %4755 = vmatprep.mubr.f32.mxu0 %v6128_v63  ;;  %v3222_v63 = vld [vmem:[%s6878_s3 + $0x60] sm:$0xff] }
  0xd4   : > { %4385 = vmatmul.mubr.f32.gmra.mrb[14].mxu1 %v6373_v51  ;;  %3313 = vperm.xlu1 %5537, %v3223_v60   ;;  %v5205_v60 = vpack.c.bf16 %v3681_v2, %v3680_v30  ;;  %v6553_v30 = vld [vmem:[%s5643_s28 + $0x102] sm:$0xff]  ;;  %v2477_v2 = vld [vmem:[%s5643_s28 + $0x95] sm:$0xff] }
  0xd5   : > { %4387 = vmatprep.mubr.f32.mxu1 %v6380_v13  ;;  %5060 = vmatpush3.bf16.msra.mxu1 %v5057_v21  ;;  %v3230_v21 = vld [vmem:[%s6878_s3 + $0xa0] sm:$0xff] }
  0xd6   : > { %4756 = vmatmul.mubr.f32.gmra.mrb[32].mxu0 %v6136_v6  ;;  %5221 = vmatprep.subr.bf16.mxu1 %v5598_v7  ;;  %v3674_v6 = vld [vmem:[%s6876_s1 + $0x410] sm:$0xff] }
  0xd7   : > { %4758 = vmatprep.mubr.f32.mxu0 %v2163_v27  ;;  %3308 = vperm.xlu0 %5536, %v3222_v63   ;;  %v5193_v50 = vpack.c.bf16 %v3675_v29, %v3674_v6  ;;  %v2471_v27 = vld [vmem:[%s5643_s28 + $0x65] sm:$0xff]  ;;  %v3682_v63 = vld [vmem:[%s6876_s1 + $0x450] sm:$0xff]  ;;  %v6502_v6 = vld [vmem:[%s5643_s28 + $0xda] sm:$0xff] }
  0xd8   : > { %4388 = vmatmul.mubr.f32.gmra.mrb[16].mxu1 %v6390_v32  ;;  %3323 = vperm.xlu1 %5537, %v3225_v36   ;;  %v3232_v29 = vld [vmem:[%s6878_s3 + $0xb0] sm:$0xff] }
  0xd9   : > { %4390 = vmatprep.mubr.f32.mxu1 %v6397_v22  ;;  %v2472_v36 = vld [vmem:[%s5643_s28 + $0x6d] sm:$0xff] }
  0xda   : > { %4759 = vmatmul.mubr.f32.gmra.mrb[34].mxu0 %v2164_v20  ;;  %v3683_v20 = vld [vmem:[%s6876_s1 + $0x458] sm:$0xff] }
  0xdb   : > { %4793 = vmatprep.mubr.f32.mxu0 %v2463_v26  ;;  %3318 = vperm.xlu0 %5536, %v3224_v35   ;;  %v3233_v26 = vld [vmem:[%s6878_s3 + $0xb8] sm:$0xff]  ;;  %v6509_v35 = vld [vmem:[%s5643_s28 + $0xe2] sm:$0xff] }
  0xdc   : > { %4391 = vmatmul.mubr.f32.gmra.mrb[18].mxu1 %v6413_v40  ;;  %3333 = vperm.xlu1 %5537, %v3227_v56   ;;  %v6524_v56 = vld [vmem:[%s5643_s28 + $0xea] sm:$0xff] }
  0xdd   : > { %4393 = vmatprep.mubr.f32.mxu1 %v6420_v47 }
  0xde   : > { %4794 = vmatmul.mubr.f32.vlgmr.msra.gmra.mrb[0].mxu0 %v2464_v24  ;;  %v2473_v24 = vld [vmem:[%s5643_s28 + $0x75] sm:$0xff] }
  0xdf   : > { %5192 = vmatpush3.bf16.msra.mxu0 %v6221_v25  ;;  %4796 = vmatprep.mubr.f32.mxu0 %v2465_v0  ;;  %v3679_v25 = vld [vmem:[%s6876_s1 + $0x438] sm:$0xff]  ;;  %v5209_v0 = vpack.c.bf16 %v3683_v20, %v3682_v63  ;;  %v2479_v20 = vld [vmem:[%s5643_s28 + $0xa5] sm:$0xff] }
  0xe0   : > { %5194 = vmatprep.subr.bf16.mxu0 %v5193_v50  ;;  %4394 = vmatmul.mubr.f32.gmra.mrb[20].mxu1 %v6435_v44  ;;  %v5201_v11 = vpack.c.bf16 %v3679_v25, %v3678_v5  ;;  %v3686_v25 = vld [vmem:[%s6876_s1 + $0x470] sm:$0xff] }
  0xe1   : > { %3328 = vperm.xlu0 %5536, %v3226_v58   ;;  %4396 = vmatprep.mubr.f32.mxu1 %v6443_v55  ;;  %v3234_v58 = vld [vmem:[%s6878_s3 + $0xc0] sm:$0xff]  ;;  %v6569_v63 = vld [vmem:[%s5643_s28 + $0x112] sm:$0xff] }
  0xe2   : > { %4797 = vmatmul.mubr.f32.gmra.mrb[2].mxu0 %v2466_v53  ;;  %3343 = vperm.xlu1 %5537, %v3229_v57   ;;  %v2474_v53 = vld [vmem:[%s5643_s28 + $0x7d] sm:$0xff] }
  0xe3   : > { %4799 = vmatprep.mubr.f32.mxu0 %v2467_v1  ;;  %5196 = vmatpush3.bf16.msra.mxu0 %v5193_v50  ;;  %v3684_v50 = vld [vmem:[%s6876_s1 + $0x460] sm:$0xff]  ;;  %v6531_v1 = vld [vmem:[%s5643_s28 + $0xf2] sm:$0xff] }
  0xe4   : > { %5198 = vmatprep.subr.bf16.mxu0 %v5197_v52  ;;  %4397 = vmatmul.mubr.f32.gmra.mrb[22].mxu1 %v6458_v3  ;;  %v5213_v5 = vpack.c.bf16 %v3685_v41, %v3684_v50  ;;  %v3687_v57 = vld [vmem:[%s6876_s1 + $0x478] sm:$0xff]  ;;  %v3243_v50 = vld [vmem:[%s6878_s3 + $0x108] sm:$0xff]  ;;  %v3242_v41 = vld [vmem:[%s6878_s3 + $0x100] sm:$0xff] }
  0xe5   : > { %3338 = vperm.xlu0 %5536, %v3228_v14   ;;  %4399 = vmatprep.mubr.f32.mxu1 %v6465_v16  ;;  %v3237_v14 = vld [vmem:[%s6878_s3 + $0xd8] sm:$0xff] }
  0xe6   : > { %4800 = vmatmul.mubr.f32.gmra.mrb[4].mxu0 %v2468_v59  ;;  %3353 = vperm.xlu1 %5537, %v3231_v33   ;;  %v6546_v59 = vld [vmem:[%s5643_s28 + $0xfa] sm:$0xff]  ;;  %v5217_v33 = vpack.c.bf16 %v3687_v57, %v3686_v25 }
  0xe7   : > { %4802 = vmatprep.mubr.f32.mxu0 %v2469_v8  ;;  %5200 = vmatpush3.bf16.msra.mxu0 %v5197_v52  ;;  %v2475_v52 = vld [vmem:[%s5643_s28 + $0x85] sm:$0xff]  ;;  %v3236_v8 = vld [vmem:[%s6878_s3 + $0xd0] sm:$0xff] }
  0xe8   : > { %5202 = vmatprep.subr.bf16.mxu0 %v5201_v11  ;;  %4400 = vmatmul.mubr.f32.gmra.mrb[24].mxu1 %v6480_v15  ;;  %v2816_v25 = vld [vmem:[%s5643_s28 + $0xbe] sm:$0xff]  ;;  %v1481_v57 = vld [vmem:[%s5643_s28 + $0xb3] sm:$0xff] }
  0xe9   : > { %3348 = vperm.xlu0 %5536, %v3230_v21   ;;  %4402 = vmatprep.mubr.f32.mxu1 %v6487_v10  ;;  %v3239_v21 = vld [vmem:[%s6878_s3 + $0xe8] sm:$0xff] }
  0xea   : > { %4803 = vmatmul.mubr.f32.gmra.mrb[6].mxu0 %v2470_v45  ;;  %3363 = vperm.xlu1 %5537, %v3233_v26   ;;  %v6562_v45 = vld [vmem:[%s5643_s28 + $0x10a] sm:$0xff]  ;;  %v3241_v26 = vld [vmem:[%s6878_s3 + $0xf8] sm:$0xff] }
  0xeb   : > { %4805 = vmatprep.mubr.f32.mxu0 %v2471_v27  ;;  %5204 = vmatpush3.bf16.msra.mxu0 %v5201_v11  ;;  %v2476_v11 = vld [vmem:[%s5643_s28 + $0x8d] sm:$0xff]  ;;  %v3238_v27 = vld [vmem:[%s6878_s3 + $0xe0] sm:$0xff] }
  0xec   : > { %5206 = vmatprep.subr.bf16.mxu0 %v5205_v60  ;;  %4403 = vmatmul.mubr.f32.gmra.mrb[26].mxu1 %v6502_v6 }
  0xed   : > { %3358 = vperm.xlu0 %5536, %v3232_v29   ;;  %4405 = vmatprep.mubr.f32.mxu1 %v6509_v35  ;;  %v6578_v29 = vld [vmem:[%s5643_s28 + $0x11a] sm:$0xff] }
  0xee   : > { %4806 = vmatmul.mubr.f32.gmra.mrb[8].mxu0 %v2472_v36  ;;  %3373 = vperm.xlu1 %5537, %v3235_v48   ;;  %v3240_v36 = vld [vmem:[%s6878_s3 + $0xf0] sm:$0xff]  ;;  %v2482_v48 = vld [vmem:[%s5643_s28 + $0xbd] sm:$0xff] }
  0xef   : > { %4808 = vmatprep.mubr.f32.mxu0 %v2473_v24  ;;  %5208 = vmatpush3.bf16.msra.mxu0 %v5205_v60  ;;  %v2478_v60 = vld [vmem:[%s5643_s28 + $0x9d] sm:$0xff]  ;;  %v2480_v24 = vld [vmem:[%s5643_s28 + $0xad] sm:$0xff] }
  0xf0   : > { %5210 = vmatprep.subr.bf16.mxu0 %v5209_v0  ;;  %4406 = vmatmul.mubr.f32.gmra.mrb[28].mxu1 %v6524_v56 }
  0xf1   : > { %3368 = vperm.xlu0 %5536, %v3234_v58   ;;  %4408 = vmatprep.mubr.f32.mxu1 %v6531_v1  ;;  %v2483_v58 = vld [vmem:[%s5643_s28 + $0xc5] sm:$0xff] }
  0xf2   : > { %4809 = vmatmul.mubr.f32.gmra.mrb[10].mxu0 %v2474_v53  ;;  %3383 = vperm.xlu1 %5537, %v3237_v14   ;;  %v3245_v53 = vld [vmem:[%s6878_s3 + $0x118] sm:$0xff]  ;;  %v2817_v14 = vld [vmem:[%s5643_s28 + $0xc6] sm:$0xff] }
  0xf3   : > { %4811 = vmatprep.mubr.f32.mxu0 %v2475_v52  ;;  %5212 = vmatpush3.bf16.msra.mxu0 %v5209_v0  ;;  %v2481_v0 = vld [vmem:[%s5643_s28 + $0xb5] sm:$0xff]  ;;  %v2484_v52 = vld [vmem:[%s5643_s28 + $0xcd] sm:$0xff] }
  0xf4   : > { %5214 = vmatprep.subr.bf16.mxu0 %v5213_v5  ;;  %4409 = vmatmul.mubr.f32.gmra.mrb[30].mxu1 %v6546_v59 }
  0xf5   : > { %3378 = vperm.xlu0 %5536, %v3236_v8   ;;  %4411 = vmatprep.mubr.f32.mxu1 %v6553_v30  ;;  %v2818_v8 = vld [vmem:[%s5643_s28 + $0xce] sm:$0xff] }
  0xf6   : > { %4812 = vmatmul.mubr.f32.gmra.mrb[12].mxu0 %v2476_v11  ;;  %3393 = vperm.xlu1 %5537, %v3239_v21   ;;  %v1483_v11 = vld [vmem:[%s5643_s28 + $0xc3] sm:$0xff]  ;;  %v1485_v21 = vld [vmem:[%s5643_s28 + $0xd3] sm:$0xff] }
  0xf7   : > { %4814 = vmatprep.mubr.f32.mxu0 %v2477_v2  ;;  %5216 = vmatpush3.bf16.msra.mxu0 %v5213_v5  ;;  %v2485_v5 = vld [vmem:[%s5643_s28 + $0xd5] sm:$0xff]  ;;  %v1484_v2 = vld [vmem:[%s5643_s28 + $0xcb] sm:$0xff] }
  0xf8   : > { %5218 = vmatprep.subr.bf16.mxu0 %v5217_v33  ;;  %4412 = vmatmul.mubr.f32.gmra.mrb[32].mxu1 %v6562_v45 }
  0xf9   : > { %3388 = vperm.xlu0 %5536, %v3238_v27   ;;  %4414 = vmatprep.mubr.f32.mxu1 %v6569_v63  ;;  %v1486_v27 = vld [vmem:[%s5643_s28 + $0xdb] sm:$0xff] }
  0xfa   : > { %4815 = vmatmul.mubr.f32.gmra.mrb[14].mxu0 %v2478_v60  ;;  %3403 = vperm.xlu1 %5537, %v3241_v26   ;;  %v2822_v60 = vld [vmem:[%s5643_s28 + $0xee] sm:$0xff] }
  0xfb   : > { %4817 = vmatprep.mubr.f32.mxu0 %v2479_v20  ;;  %5220 = vmatpush3.bf16.msra.mxu0 %v5217_v33  ;;  %v2820_v33 = vld [vmem:[%s5643_s28 + $0xde] sm:$0xff]  ;;  %v2823_v20 = vld [vmem:[%s5643_s28 + $0xf6] sm:$0xff]  ;;  %v1488_v26 = vld [vmem:[%s5643_s28 + $0xeb] sm:$0xff] }
  0xfc   : > { %4415 = vmatmul.mubr.f32.gmra.mrb[34].mxu1 %v6578_v29 }
  0xfd   : > { %3398 = vperm.xlu0 %5536, %v3240_v36   ;;  %4449 = vmatprep.mubr.f32.mxu1 %v6238_v28  ;;  %v3244_v28 = vld [vmem:[%s6878_s3 + $0x110] sm:$0xff] }
  0xfe   : > { %4818 = vmatmul.mubr.f32.gmra.mrb[16].mxu0 %v2480_v24  ;;  %3413 = vperm.xlu1 %5537, %v3243_v50   ;;  %v1489_v36 = vld [vmem:[%s5643_s28 + $0xf3] sm:$0xff]  ;;  %v2825_v24 = vld [vmem:[%s5643_s28 + $0x106] sm:$0xff] }
  0xff   : > { %4820 = vmatprep.mubr.f32.mxu0 %v2481_v0  ;;  %v1490_v0 = vld [vmem:[%s5643_s28 + $0xfb] sm:$0xff]  ;;  %v2826_v50 = vld [vmem:[%s5643_s28 + $0x10e] sm:$0xff] }
 0x100   : > { %4450 = vmatmul.mubr.f32.vlgmr.msra.gmra.mrb[0].mxu1 %v6249_v34  ;;  %v2487_v34 = vld [vmem:[%s5643_s28 + $0xe5] sm:$0xff] }
 0x101   : > { %3408 = vperm.xlu0 %5536, %v3242_v41   ;;  %5229 = vmatpush3.bf16.msra.mxu1 %v5598_v7  ;;  %v2486_v7 = vld [vmem:[%s5643_s28 + $0xdd] sm:$0xff] }
 0x102   : > { %4821 = vmatmul.mubr.f32.gmra.mrb[18].mxu0 %v2482_v48  ;;  %4452 = vmatprep.mubr.f32.mxu1 %v6254_v39  ;;  %v2488_v39 = vld [vmem:[%s5643_s28 + $0xed] sm:$0xff]  ;;  %v1491_v41 = vld [vmem:[%s5643_s28 + $0x103] sm:$0xff]  ;;  %v2827_v48 = vld [vmem:[%s5643_s28 + $0x116] sm:$0xff] }
 0x103   : > { %4823 = vmatprep.mubr.f32.mxu0 %v2483_v58  ;;  %5222 = vmatprep.subr.bf16.mxu1 %v5611_v12  ;;  %v1492_v58 = vld [vmem:[%s5643_s28 + $0x10b] sm:$0xff] }
 0x104   : > { %3423 = vperm.xlu1 %5537, %v3245_v53   ;;  %4453 = vmatmul.mubr.f32.gmra.mrb[2].mxu1 %v6269_v38  ;;  %v2489_v38 = vld [vmem:[%s5643_s28 + $0xf5] sm:$0xff]  ;;  %v2828_v53 = vld [vmem:[%s5643_s28 + $0x11e] sm:$0xff] }
 0x105   : > { %3418 = vperm.xlu0 %5536, %v3244_v28   ;;  %4455 = vmatprep.mubr.f32.mxu1 %v6276_v42  ;;  %v2491_v42 = vld [vmem:[%s5643_s28 + $0x105] sm:$0xff]  ;;  %v1493_v28 = vld [vmem:[%s5643_s28 + $0x113] sm:$0xff] }
 0x106   : > { %4824 = vmatmul.mubr.f32.gmra.mrb[20].mxu0 %v2484_v52  ;;  %5230 = vmatpush3.bf16.msra.mxu1 %v5611_v12  ;;  %v2490_v12 = vld [vmem:[%s5643_s28 + $0xfd] sm:$0xff]  ;;  %v2829_v52 = vld [vmem:[%s5643_s28 + $0x126] sm:$0xff] }
 0x107   : > { %4826 = vmatprep.mubr.f32.mxu0 %v2485_v5  ;;  %5223 = vmatprep.subr.bf16.mxu1 %v5626_v17  ;;  %v1494_v5 = vld [vmem:[%s5643_s28 + $0x11b] sm:$0xff] }
 0x108   : > { %4456 = vmatmul.mubr.f32.gmra.mrb[4].mxu1 %v6291_v46  ;;  %v2493_v46 = vld [vmem:[%s5643_s28 + $0x115] sm:$0xff] }
 0x109   : > { %4458 = vmatprep.mubr.f32.mxu1 %v6298_v18  ;;  %v2495_v18 = vld [vmem:[%s5643_s28 + $0x125] sm:$0xff] }
 0x10a   : > { %4827 = vmatmul.mubr.f32.gmra.mrb[22].mxu0 %v2486_v7  ;;  %5231 = vmatpush3.bf16.msra.mxu1 %v5626_v17  ;;  %v2492_v17 = vld [vmem:[%s5643_s28 + $0x10d] sm:$0xff] }
 0x10b   : > { %4829 = vmatprep.mubr.f32.mxu0 %v2487_v34  ;;  %5224 = vmatprep.subr.bf16.mxu1 %v5647_v23  ;;  %v2830_v7 = vld [vmem:[%s5643_s28 + $0x12e] sm:$0xff]  ;;  %v1495_v34 = vld [vmem:[%s5643_s28 + $0x123] sm:$0xff] }
 0x10c   : > { %4459 = vmatmul.mubr.f32.gmra.mrb[6].mxu1 %v6313_v54  ;;  %v2497_v54 = vld [vmem:[%s5643_s28 + $0x135] sm:$0xff] }
 0x10d   : > { %4461 = vmatprep.mubr.f32.mxu1 %v6320_v62  ;;  %v2797_v62 = vld [vmem:[%s5643_s28 + $0x26] sm:$0xff] }
 0x10e   : > { %4830 = vmatmul.mubr.f32.gmra.mrb[24].mxu0 %v2488_v39  ;;  %5232 = vmatpush3.bf16.msra.mxu1 %v5647_v23  ;;  %v2494_v23 = vld [vmem:[%s5643_s28 + $0x11d] sm:$0xff] }
 0x10f   : > { %4832 = vmatprep.mubr.f32.mxu0 %v2489_v38  ;;  %5225 = vmatprep.subr.bf16.mxu1 %v5665_v31  ;;  %v2831_v39 = vld [vmem:[%s5643_s28 + $0x136] sm:$0xff]  ;;  %v1496_v38 = vld [vmem:[%s5643_s28 + $0x12b] sm:$0xff] }
 0x110   : > { %4462 = vmatmul.mubr.f32.gmra.mrb[8].mxu1 %v6335_v61  ;;  %v2799_v61 = vld [vmem:[%s5643_s28 + $0x36] sm:$0xff] }
 0x111   : > { %4464 = vmatprep.mubr.f32.mxu1 %v6342_v9  ;;  %v2801_v9 = vld [vmem:[%s5643_s28 + $0x46] sm:$0xff] }
 0x112   : > { %4833 = vmatmul.mubr.f32.gmra.mrb[26].mxu0 %v2490_v12  ;;  %5233 = vmatpush3.bf16.msra.mxu1 %v5665_v31  ;;  %v2496_v31 = vld [vmem:[%s5643_s28 + $0x12d] sm:$0xff]  ;;  %v2832_v12 = vld [vmem:[%s5643_s28 + $0x13e] sm:$0xff] }
 0x113   : > { %4835 = vmatprep.mubr.f32.mxu0 %v2491_v42  ;;  %5226 = vmatprep.subr.bf16.mxu1 %v5681_v37 }
 0x114   : > { %4465 = vmatmul.mubr.f32.gmra.mrb[10].mxu1 %v6357_v4  ;;  %v2802_v4 = vld [vmem:[%s5643_s28 + $0x4e] sm:$0xff] }
 0x115   : > { %4467 = vmatprep.mubr.f32.mxu1 %v6364_v19  ;;  %v2803_v19 = vld [vmem:[%s5643_s28 + $0x56] sm:$0xff] }
 0x116   : > { %4836 = vmatmul.mubr.f32.gmra.mrb[28].mxu0 %v2492_v17  ;;  %5234 = vmatpush3.bf16.msra.mxu1 %v5681_v37  ;;  %v2498_v37 = vld [vmem:[%s5643_s28 + $0x13d] sm:$0xff] }
 0x117   : > { %4838 = vmatprep.mubr.f32.mxu0 %v2493_v46  ;;  %5227 = vmatprep.subr.bf16.mxu1 %v5697_v43 }
 0x118   : > { %4468 = vmatmul.mubr.f32.gmra.mrb[12].mxu1 %v6373_v51  ;;  %v2804_v51 = vld [vmem:[%s5643_s28 + $0x5e] sm:$0xff] }
 0x119   : > { %4470 = vmatprep.mubr.f32.mxu1 %v6380_v13  ;;  %v2805_v13 = vld [vmem:[%s5643_s28 + $0x66] sm:$0xff] }
 0x11a   : > { %4839 = vmatmul.mubr.f32.gmra.mrb[30].mxu0 %v2494_v23  ;;  %5235 = vmatpush3.bf16.msra.mxu1 %v5697_v43  ;;  %v2798_v43 = vld [vmem:[%s5643_s28 + $0x2e] sm:$0xff] }
 0x11b   : > { %4841 = vmatprep.mubr.f32.mxu0 %v2495_v18  ;;  %5228 = vmatprep.subr.bf16.mxu1 %v5713_v49 }
 0x11c   : > { %4471 = vmatmul.mubr.f32.gmra.mrb[14].mxu1 %v6390_v32  ;;  %v2806_v32 = vld [vmem:[%s5643_s28 + $0x6e] sm:$0xff] }
 0x11d   : > { %4473 = vmatprep.mubr.f32.mxu1 %v6397_v22  ;;  %v2807_v22 = vld [vmem:[%s5643_s28 + $0x76] sm:$0xff] }
 0x11e   : > { %4842 = vmatmul.mubr.f32.gmra.mrb[32].mxu0 %v2496_v31  ;;  %5236 = vmatpush3.bf16.msra.mxu1 %v5713_v49  ;;  %v2800_v49 = vld [vmem:[%s5643_s28 + $0x3e] sm:$0xff] }
 0x11f   : > { %4844 = vmatprep.mubr.f32.mxu0 %v2497_v54 }
 0x120   : > { %4474 = vmatmul.mubr.f32.gmra.mrb[16].mxu1 %v6413_v40  ;;  %v2808_v40 = vld [vmem:[%s5643_s28 + $0x7e] sm:$0xff] }
 0x121   : > { %4476 = vmatprep.mubr.f32.mxu1 %v6420_v47  ;;  %v2809_v47 = vld [vmem:[%s5643_s28 + $0x86] sm:$0xff] }
 0x122   : > { %4845 = vmatmul.mubr.f32.gmra.mrb[34].mxu0 %v2498_v37 }
 0x123   : > { %4879 = vmatprep.mubr.f32.mxu0 %v2797_v62 }
 0x124   : > { %4477 = vmatmul.mubr.f32.gmra.mrb[18].mxu1 %v6435_v44  ;;  %v2810_v44 = vld [vmem:[%s5643_s28 + $0x8e] sm:$0xff]  ;;  %v3249_v37 = vpop.permute.xlu0 %3248 }
 0x125   : > { %4479 = vmatprep.mubr.f32.mxu1 %v6443_v55  ;;  %v2811_v55 = vld [vmem:[%s5643_s28 + $0x96] sm:$0xff] }
 0x126   : > { %4880 = vmatmul.mubr.f32.vlgmr.msra.gmra.mrb[0].mxu0 %v2798_v43 }
 0x127   : > { %4882 = vmatprep.mubr.f32.mxu0 %v2799_v61 }
 0x128   : > { %4480 = vmatmul.mubr.f32.gmra.mrb[20].mxu1 %v6458_v3  ;;  %v2812_v3 = vld [vmem:[%s5643_s28 + $0x9e] sm:$0xff] }
 0x129   : > { %4482 = vmatprep.mubr.f32.mxu1 %v6465_v16  ;;  %v1161_v16 = vld [vmem:[%s5643_s28 + $0x122] sm:$0xff] }
 0x12a   : > { %4883 = vmatmul.mubr.f32.gmra.mrb[2].mxu0 %v2800_v49  ;;  %v3254_v49 = vpop.permute.xlu0 %3253 }
 0x12b   : > { %4885 = vmatprep.mubr.f32.mxu0 %v2801_v9 }
 0x12c   : > { %4483 = vmatmul.mubr.f32.gmra.mrb[22].mxu1 %v6480_v15  ;;  %v2813_v15 = vld [vmem:[%s5643_s28 + $0xa6] sm:$0xff] }
 0x12d   : > { %4485 = vmatprep.mubr.f32.mxu1 %v6487_v10  ;;  %v1162_v10 = vld [vmem:[%s5643_s28 + $0x12a] sm:$0xff] }
 0x12e   : > { %4886 = vmatmul.mubr.f32.gmra.mrb[4].mxu0 %v2802_v4 }
 0x12f   : > { %4888 = vmatprep.mubr.f32.mxu0 %v2803_v19 }
 0x130   : > { %4486 = vmatmul.mubr.f32.gmra.mrb[24].mxu1 %v6502_v6  ;;  %v2814_v6 = vld [vmem:[%s5643_s28 + $0xae] sm:$0xff] }
 0x131   : > { %4488 = vmatprep.mubr.f32.mxu1 %v6509_v35  ;;  %v1479_v35 = vld [vmem:[%s5643_s28 + $0xa3] sm:$0xff] }
 0x132   : > { %4889 = vmatmul.mubr.f32.gmra.mrb[6].mxu0 %v2804_v51 }
 0x133   : > { %4891 = vmatprep.mubr.f32.mxu0 %v2805_v13 }
 0x134   : > { %4489 = vmatmul.mubr.f32.gmra.mrb[26].mxu1 %v6524_v56  ;;  %v2815_v56 = vld [vmem:[%s5643_s28 + $0xb6] sm:$0xff] }
 0x135   : > { %4491 = vmatprep.mubr.f32.mxu1 %v6531_v1  ;;  %v1480_v1 = vld [vmem:[%s5643_s28 + $0xab] sm:$0xff] }
 0x136   : > { %4892 = vmatmul.mubr.f32.gmra.mrb[8].mxu0 %v2806_v32  ;;  %v3269_v32 = vpop.permute.xlu0 %3268 }
 0x137   : > { %4894 = vmatprep.mubr.f32.mxu0 %v2807_v22 }
 0x138   : > { %4492 = vmatmul.mubr.f32.gmra.mrb[28].mxu1 %v6546_v59  ;;  %v1482_v59 = vld [vmem:[%s5643_s28 + $0xbb] sm:$0xff] }
 0x139   : > { %4494 = vmatprep.mubr.f32.mxu1 %v6553_v30  ;;  %v2819_v30 = vld [vmem:[%s5643_s28 + $0xd6] sm:$0xff] }
 0x13a   : > { %4895 = vmatmul.mubr.f32.gmra.mrb[10].mxu0 %v2808_v40 }
 0x13b   : > { %4897 = vmatprep.mubr.f32.mxu0 %v2809_v47  ;;  %v3259_v18 = vpop.permute.xlu1 %3258 }
 0x13c   : > { %4495 = vmatmul.mubr.f32.gmra.mrb[30].mxu1 %v6562_v45  ;;  %v2821_v45 = vld [vmem:[%s5643_s28 + $0xe6] sm:$0xff] }
 0x13d   : > { %4497 = vmatprep.mubr.f32.mxu1 %v6569_v63  ;;  %v1487_v63 = vld [vmem:[%s5643_s28 + $0xe3] sm:$0xff] }
 0x13e   : > { %4898 = vmatmul.mubr.f32.gmra.mrb[12].mxu0 %v2810_v44  ;;  %v6734_v44 = vpop.permute.xlu0 %3278 }
 0x13f   : > { %4900 = vmatprep.mubr.f32.mxu0 %v2811_v55  ;;  %v3264_v61 = vpop.permute.xlu1 %3263 }
 0x140   : > { %4498 = vmatmul.mubr.f32.gmra.mrb[32].mxu1 %v6578_v29  ;;  %v2824_v29 = vld [vmem:[%s5643_s28 + $0xfe] sm:$0xff] }
 0x141   : > { %4500 = vmatprep.mubr.f32.mxu1 %v1161_v16 }
 0x142   : > { %4901 = vmatmul.mubr.f32.gmra.mrb[14].mxu0 %v2812_v3 }
 0x143   : > { %4903 = vmatprep.mubr.f32.mxu0 %v2813_v15  ;;  %v3274_v19 = vpop.permute.xlu1 %3273 }
 0x144   : > { %4501 = vmatmul.mubr.f32.gmra.mrb[34].mxu1 %v1162_v10 }
 0x145   : > { %4562 = vmatprep.mubr.f32.mxu1 %v1479_v35 }
 0x146   : > { %4904 = vmatmul.mubr.f32.gmra.mrb[16].mxu0 %v2814_v6  ;;  %v6746_v6 = vpop.permute.xlu0 %3288 }
 0x147   : > { %4906 = vmatprep.mubr.f32.mxu0 %v2815_v56  ;;  %v6732_v47 = vpop.permute.xlu1 %3283  ;;  %v6751_v56 = vld [vmem:[%s6877_s2] ss:$0 sm:$0xff] }
 0x148   : > { %4563 = vmatmul.mubr.f32.vlgmr.msra.gmra.mrb[18].mxu1 %v1480_v1 }
 0x149   : > { %4565 = vmatprep.mubr.f32.mxu1 %v1481_v57 }
 0x14a   : > { %4907 = vmatmul.mubr.f32.gmra.mrb[18].mxu0 %v2816_v25 }
 0x14b   : > { %4909 = vmatprep.mubr.f32.mxu0 %v2817_v14  ;;  %v6740_v16 = vpop.permute.xlu1 %3293 }
 0x14c   : > { %4566 = vmatmul.mubr.f32.gmra.mrb[20].mxu1 %v1482_v59  ;;  %v6756_v59 = vpop.permute.xlu0 %3298 }
 0x14d   : > { %4568 = vmatprep.mubr.f32.mxu1 %v1483_v11 }
 0x14e   : > { %4910 = vmatmul.mubr.f32.gmra.mrb[20].mxu0 %v2818_v8 }
 0x14f   : > { %4912 = vmatprep.mubr.f32.mxu0 %v2819_v30  ;;  %v6753_v1 = vpop.permute.xlu1 %3303 }
 0x150   : > { %4569 = vmatmul.mubr.f32.gmra.mrb[22].mxu1 %v1484_v2 }
 0x151   : > { %4571 = vmatprep.mubr.f32.mxu1 %v1485_v21 }
 0x152   : > { %4913 = vmatmul.mubr.f32.gmra.mrb[22].mxu0 %v2820_v33 }
 0x153   : > { %4915 = vmatprep.mubr.f32.mxu0 %v2821_v45 }
 0x154   : > { %4572 = vmatmul.mubr.f32.gmra.mrb[24].mxu1 %v1486_v27 }
 0x155   : > { %4574 = vmatprep.mubr.f32.mxu1 %v1487_v63 }
 0x156   : > { %4916 = vmatmul.mubr.f32.gmra.mrb[24].mxu0 %v2822_v60  ;;  %v6765_v60 = vpop.permute.xlu1 %3313 }
 0x157   : > { %4918 = vmatprep.mubr.f32.mxu0 %v2823_v20 }
 0x158   : > { %4575 = vmatmul.mubr.f32.gmra.mrb[26].mxu1 %v1488_v26 }
 0x159   : > { %4577 = vmatprep.mubr.f32.mxu1 %v1489_v36 }
 0x15a   : > { %4919 = vmatmul.mubr.f32.gmra.mrb[26].mxu0 %v2824_v29 }
 0x15b   : > { %4921 = vmatprep.mubr.f32.mxu0 %v2825_v24  ;;  %v6769_v24 = vpop.permute.xlu0 %3308 }
 0x15c   : > { %4578 = vmatmul.mubr.f32.gmra.mrb[28].mxu1 %v1490_v0 }
 0x15d   : > { %4580 = vmatprep.mubr.f32.mxu1 %v1491_v41 }
 0x15e   : > { %4922 = vmatmul.mubr.f32.gmra.mrb[28].mxu0 %v2826_v50 }
 0x15f   : > { %4924 = vmatprep.mubr.f32.mxu0 %v2827_v48 }
 0x160   : > { %4581 = vmatmul.mubr.f32.gmra.mrb[30].mxu1 %v1492_v58 }
 0x161   : > { %4583 = vmatprep.mubr.f32.mxu1 %v1493_v28 }
 0x162   : > { %4925 = vmatmul.mubr.f32.gmra.mrb[30].mxu0 %v2828_v53 }
 0x163   : > { %4927 = vmatprep.mubr.f32.mxu0 %v2829_v52 }
 0x164   : > { %4584 = vmatmul.mubr.f32.gmra.mrb[32].mxu1 %v1494_v5 }
 0x165   : > { %4586 = vmatprep.mubr.f32.mxu1 %v1495_v34  ;;  %v6775_v34 = vpop.permute.xlu1 %3323 }
 0x166   : > { %4928 = vmatmul.mubr.f32.gmra.mrb[32].mxu0 %v2830_v7 }
 0x167   : > { %4930 = vmatprep.mubr.f32.mxu0 %v2831_v39 }
 0x168   : > { %4587 = vmatmul.mubr.f32.gmra.mrb[34].mxu1 %v1496_v38 }
 0x16a   : > { %4931 = vmatmul.mubr.f32.gmra.mrb[34].mxu0 %v2832_v12 }
 0x1d3   : > { %v4451_v42 = vpop.f32.mrb[0].mxu1 }
 0x1d4   : > { %v1246_v17 = vpop.f32.mrb[1].mxu1 }
 0x1d7   : > { %v4454_v46 = vpop.f32.mrb[2].mxu1 }
 0x1d8   : > { %v1256_v23 = vpop.f32.mrb[3].mxu1 }
 0x1db   : > { %v4457_v31 = vpop.f32.mrb[4].mxu1 }
 0x1dc   : > { %v1266_v54 = vpop.f32.mrb[5].mxu1 }
 0x1df   : > { %v4460_v62 = vpop.f32.mrb[6].mxu1 }
 0x1e0   : > { %v1276_v43 = vpop.f32.mrb[7].mxu1 }
 0x1e3   : > { %v6720_v9 = vpop.f32.mrb[8].mxu1 }
 0x1e4   : > { %v6722_v4 = vpop.f32.mrb[9].mxu1 }
 0x1e7   : > { %v6724_v51 = vpop.f32.mrb[10].mxu1 }
 0x1e8   : > { %v6726_v13 = vpop.f32.mrb[11].mxu1 }
 0x1eb   : > { %v6728_v22 = vpop.f32.mrb[12].mxu1 }
 0x1ec   : > { %v6730_v40 = vpop.f32.mrb[13].mxu1 }
 0x1ef   : > { %v6736_v55 = vpop.f32.mrb[14].mxu1 }
 0x1f0   : > { %v6738_v3 = vpop.f32.mrb[15].mxu1 }
 0x1f3   : > { %v6742_v15 = vpop.f32.mrb[16].mxu1 }
 0x1f4   : > { %v6744_v10 = vpop.f32.mrb[17].mxu1 }
 0x1f9   : > { %v4881_v35 = vpop.f32.mrb[0].mxu0 }
 0x1fa   : > { %v5237_v25 = vadd.f32 %v4881_v35, %v4451_v42  ;;  %v2916_v57 = vpop.f32.mrb[1].mxu0 }
 0x1fb   : > { %v5238_v14 = vadd.f32 %v2916_v57, %v1246_v17 }
 0x1fc   : > { %v3139_v8 = vadd.f32 %v5237_v25, %v6751_v56  ;;  %v6787_v25 = vpop.permute.xlu1 %3333 }
 0x1fd   : > { %v3138_v11 = vadd.f32 %v5238_v14, %v6751_v56  ;;  %v4884_v30 = vpop.f32.mrb[2].mxu0 }
 0x1fe   : > { %v3175_v2 = vmax.f32 %v3139_v8, 0.0  ;;  %v5239_v33 = vadd.f32 %v4884_v30, %v4454_v46  ;;  %v2926_v21 = vpop.f32.mrb[3].mxu0  ;;  %v6779_v46 = vpop.permute.xlu0 %3318 }
 0x1ff   : > { %v3174_v45 = vmax.f32 %v3138_v11, 0.0  ;;  %v5240_v27 = vadd.f32 %v2926_v21, %v1256_v23 }
 0x200   : > { %v3427_v63 = vmul.f32 %v3254_v49, %v3175_v2  ;;  %v3141_v20 = vadd.f32 %v5239_v33, %v6751_v56 }
 0x201   : > { %v3426_v26 = vmul.f32 %v3249_v37, %v3174_v45  ;;  %v3140_v29 = vadd.f32 %v5240_v27, %v6751_v56  ;;  %v4887_v36 = vpop.f32.mrb[4].mxu0 }
 0x202   : > { %3463 = vst [vmem:[%s6763_s13 + $0x8] sm:$0xff] %v3427_v63  ;;  %v3177_v0 = vmax.f32 %v3141_v20, 0.0  ;;  %v5241_v50 = vadd.f32 %v4887_v36, %v4457_v31  ;;  %v2936_v41 = vpop.f32.mrb[5].mxu0  ;;  %v6793_v11 = vpop.permute.xlu0 %3328 }
 0x203   : > { %3462 = vst [vmem:[%s6763_s13] sm:$0xff] %v3426_v26  ;;  %v3176_v48 = vmax.f32 %v3140_v29, 0.0  ;;  %v5242_v58 = vadd.f32 %v2936_v41, %v1266_v54  ;;  %v6803_v63 = vpop.permute.xlu1 %3343 }
 0x204   : > { %v3429_v53 = vmul.f32 %v3264_v61, %v3177_v0  ;;  %v3143_v28 = vadd.f32 %v5241_v50, %v6751_v56 }
 0x205   : > { %v3428_v52 = vmul.f32 %v3259_v18, %v3176_v48  ;;  %v3142_v5 = vadd.f32 %v5242_v58, %v6751_v56  ;;  %v4890_v7 = vpop.f32.mrb[6].mxu0 }
 0x206   : > { %3465 = vst [vmem:[%s6763_s13 + $0x18] sm:$0xff] %v3429_v53  ;;  %v3179_v39 = vmax.f32 %v3143_v28, 0.0  ;;  %v5243_v38 = vadd.f32 %v4890_v7, %v4460_v62  ;;  %v2946_v12 = vpop.f32.mrb[7].mxu0  ;;  %v3339_v29 = vpop.permute.xlu0 %3338 }
 0x207   : > { %3464 = vst [vmem:[%s6763_s13 + $0x10] sm:$0xff] %v3428_v52  ;;  %v3178_v42 = vmax.f32 %v3142_v5, 0.0  ;;  %v5244_v17 = vadd.f32 %v2946_v12, %v1276_v43  ;;  %v3354_v28 = vpop.permute.xlu1 %3353 }
 0x208   : > { %v3431_v23 = vmul.f32 %v3274_v19, %v3179_v39  ;;  %v3145_v31 = vadd.f32 %v5243_v38, %v6751_v56 }
 0x209   : > { %v3430_v18 = vmul.f32 %v3269_v32, %v3178_v42  ;;  %v3144_v54 = vadd.f32 %v5244_v17, %v6751_v56  ;;  %v4893_v37 = vpop.f32.mrb[8].mxu0 }
 0x20a   : > { %3467 = vst [vmem:[%s6763_s13 + $0x28] sm:$0xff] %v3431_v23  ;;  %v3181_v61 = vmax.f32 %v3145_v31, 0.0  ;;  %v5245_v49 = vadd.f32 %v4893_v37, %v6720_v9  ;;  %v2956_v62 = vpop.f32.mrb[9].mxu0  ;;  %v3349_v39 = vpop.permute.xlu0 %3348 }
 0x20b   : > { %3466 = vst [vmem:[%s6763_s13 + $0x20] sm:$0xff] %v3430_v18  ;;  %v3180_v35 = vmax.f32 %v3144_v54, 0.0  ;;  %v5246_v43 = vadd.f32 %v2956_v62, %v6722_v4  ;;  %v3364_v37 = vpop.permute.xlu1 %3363 }
 0x20c   : > { %v3433_v19 = vmul.f32 %v6732_v47, %v3181_v61  ;;  %v3147_v32 = vadd.f32 %v5245_v49, %v6751_v56 }
 0x20d   : > { %v3432_v57 = vmul.f32 %v6734_v44, %v3180_v35  ;;  %v3146_v14 = vadd.f32 %v5246_v43, %v6751_v56  ;;  %v4896_v8 = vpop.f32.mrb[10].mxu0 }
 0x20e   : > { %3469 = vst [vmem:[%s6763_s13 + $0x38] sm:$0xff] %v3433_v19  ;;  %v3183_v9 = vmax.f32 %v3147_v32, 0.0  ;;  %v5247_v30 = vadd.f32 %v4896_v8, %v6724_v51  ;;  %v2966_v4 = vpop.f32.mrb[11].mxu0 }
 0x20f   : > { %3468 = vst [vmem:[%s6763_s13 + $0x30] sm:$0xff] %v3432_v57  ;;  %v3182_v2 = vmax.f32 %v3146_v14, 0.0  ;;  %v5248_v47 = vadd.f32 %v2966_v4, %v6726_v13 }
 0x210   : > { %v3435_v33 = vmul.f32 %v6740_v16, %v3183_v9  ;;  %v3149_v44 = vadd.f32 %v5247_v30, %v6751_v56 }
 0x211   : > { %v3434_v21 = vmul.f32 %v6746_v6, %v3182_v2  ;;  %v3148_v45 = vadd.f32 %v5248_v47, %v6751_v56  ;;  %v4899_v27 = vpop.f32.mrb[12].mxu0  ;;  %v3374_v47 = vpop.permute.xlu1 %3373 }
 0x212   : > { %3471 = vst [vmem:[%s6763_s13 + $0x48] sm:$0xff] %v3435_v33  ;;  %v3185_v20 = vmax.f32 %v3149_v44, 0.0  ;;  %v5249_v51 = vadd.f32 %v4899_v27, %v6728_v22  ;;  %v2976_v26 = vpop.f32.mrb[13].mxu0 }
 0x213   : > { %3470 = vst [vmem:[%s6763_s13 + $0x40] sm:$0xff] %v3434_v21  ;;  %v3184_v13 = vmax.f32 %v3148_v45, 0.0  ;;  %v5250_v16 = vadd.f32 %v2976_v26, %v6730_v40 }
 0x214   : > { %v3437_v36 = vmul.f32 %v6753_v1, %v3185_v20  ;;  %v3151_v6 = vadd.f32 %v5249_v51, %v6751_v56 }
 0x215   : > { %v3436_v0 = vmul.f32 %v6756_v59, %v3184_v13  ;;  %v3150_v50 = vadd.f32 %v5250_v16, %v6751_v56  ;;  %v4902_v41 = vpop.f32.mrb[14].mxu0 }
 0x216   : > { %3473 = vst [vmem:[%s6763_s13 + $0x58] sm:$0xff] %v3437_v36  ;;  %v3187_v48 = vmax.f32 %v3151_v6, 0.0  ;;  %v5251_v22 = vadd.f32 %v4902_v41, %v6736_v55  ;;  %v2986_v58 = vpop.f32.mrb[15].mxu0 }
 0x217   : > { %3472 = vst [vmem:[%s6763_s13 + $0x50] sm:$0xff] %v3436_v0  ;;  %v3186_v53 = vmax.f32 %v3150_v50, 0.0  ;;  %v5252_v40 = vadd.f32 %v2986_v58, %v6738_v3 }
 0x218   : > { %v3439_v1 = vmul.f32 %v6765_v60, %v3187_v48  ;;  %v3153_v52 = vadd.f32 %v5251_v22, %v6751_v56  ;;  %v3384_v22 = vpop.permute.xlu1 %3383 }
 0x219   : > { %v3438_v59 = vmul.f32 %v6769_v24, %v3186_v53  ;;  %v3152_v5 = vadd.f32 %v5252_v40, %v6751_v56  ;;  %v4905_v7 = vpop.f32.mrb[16].mxu0 }
 0x21a   : > { %3475 = vst [vmem:[%s6763_s13 + $0x68] sm:$0xff] %v3439_v1  ;;  %v3189_v55 = vmax.f32 %v3153_v52, 0.0  ;;  %v5253_v38 = vadd.f32 %v4905_v7, %v6742_v15  ;;  %v2996_v12 = vpop.f32.mrb[17].mxu0 }
 0x21b   : > { %3474 = vst [vmem:[%s6763_s13 + $0x60] sm:$0xff] %v3438_v59  ;;  %v3188_v3 = vmax.f32 %v3152_v5, 0.0  ;;  %v5254_v42 = vadd.f32 %v2996_v12, %v6744_v10  ;;  %v4564_v24 = vpop.f32.mrb[18].mxu1 }
 0x21c   : > { %v3441_v60 = vmul.f32 %v6775_v34, %v3189_v55  ;;  %v3155_v17 = vadd.f32 %v5253_v38, %v6751_v56  ;;  %v1670_v54 = vpop.f32.mrb[19].mxu1  ;;  %v3359_v34 = vpop.permute.xlu0 %3358 }
 0x21d   : > { %v3440_v23 = vmul.f32 %v6779_v46, %v3188_v3  ;;  %v3154_v31 = vadd.f32 %v5254_v42, %v6751_v56  ;;  %v4908_v18 = vpop.f32.mrb[18].mxu0 }
 0x21e   : > { %3477 = vst [vmem:[%s6763_s13 + $0x78] sm:$0xff] %v3441_v60  ;;  %v3191_v15 = vmax.f32 %v3155_v17, 0.0  ;;  %v5255_v61 = vadd.f32 %v4908_v18, %v4564_v24  ;;  %v3006_v49 = vpop.f32.mrb[19].mxu0 }
 0x21f   : > { %3476 = vst [vmem:[%s6763_s13 + $0x70] sm:$0xff] %v3440_v23  ;;  %v3190_v10 = vmax.f32 %v3154_v31, 0.0  ;;  %v5256_v62 = vadd.f32 %v3006_v49, %v1670_v54  ;;  %v4567_v46 = vpop.f32.mrb[20].mxu1  ;;  %v3394_v23 = vpop.permute.xlu1 %3393 }
 0x220   : > { %v3443_v35 = vmul.f32 %v6787_v25, %v3191_v15  ;;  %v3157_v43 = vadd.f32 %v5255_v61, %v6751_v56  ;;  %v1680_v14 = vpop.f32.mrb[21].mxu1  ;;  %v3369_v20 = vpop.permute.xlu0 %3368 }
 0x221   : > { %v3442_v19 = vmul.f32 %v6793_v11, %v3190_v10  ;;  %v3156_v32 = vadd.f32 %v5256_v62, %v6751_v56  ;;  %v4911_v57 = vpop.f32.mrb[20].mxu0 }
 0x222   : > { %3479 = vst [vmem:[%s6763_s13 + $0x88] sm:$0xff] %v3443_v35  ;;  %v3193_v8 = vmax.f32 %v3157_v43, 0.0  ;;  %v5257_v9 = vadd.f32 %v4911_v57, %v4567_v46  ;;  %v3016_v30 = vpop.f32.mrb[21].mxu0 }
 0x223   : > { %3478 = vst [vmem:[%s6763_s13 + $0x80] sm:$0xff] %v3442_v19  ;;  %v3192_v4 = vmax.f32 %v3156_v32, 0.0  ;;  %v5258_v2 = vadd.f32 %v3016_v30, %v1680_v14  ;;  %v4570_v44 = vpop.f32.mrb[22].mxu1 }
 0x224   : > { %v3445_v25 = vmul.f32 %v6803_v63, %v3193_v8  ;;  %v3159_v33 = vadd.f32 %v5257_v9, %v6751_v56  ;;  %v1690_v27 = vpop.f32.mrb[23].mxu1  ;;  %v3379_v59 = vpop.permute.xlu0 %3378 }
 0x225   : > { %v3444_v11 = vmul.f32 %v3339_v29, %v3192_v4  ;;  %v3158_v21 = vadd.f32 %v5258_v2, %v6751_v56  ;;  %v4914_v45 = vpop.f32.mrb[22].mxu0  ;;  %v3404_v4 = vpop.permute.xlu1 %3403 }
 0x226   : > { %3481 = vst [vmem:[%s6763_s13 + $0x98] sm:$0xff] %v3445_v25  ;;  %v3195_v51 = vmax.f32 %v3159_v33, 0.0  ;;  %v5259_v26 = vadd.f32 %v4914_v45, %v4570_v44  ;;  %v3026_v13 = vpop.f32.mrb[23].mxu0 }
 0x227   : > { %3480 = vst [vmem:[%s6763_s13 + $0x90] sm:$0xff] %v3444_v11  ;;  %v3194_v16 = vmax.f32 %v3158_v21, 0.0  ;;  %v5260_v36 = vadd.f32 %v3026_v13, %v1690_v27  ;;  %v4573_v0 = vpop.f32.mrb[24].mxu1 }
 0x228   : > { %v3447_v6 = vmul.f32 %v3354_v28, %v3195_v51  ;;  %v3161_v63 = vadd.f32 %v5259_v26, %v6751_v56  ;;  %v1700_v48 = vpop.f32.mrb[25].mxu1  ;;  %v3389_v10 = vpop.permute.xlu0 %3388 }
 0x229   : > { %v3446_v50 = vmul.f32 %v3349_v39, %v3194_v16  ;;  %v3160_v29 = vadd.f32 %v5260_v36, %v6751_v56  ;;  %v4917_v41 = vpop.f32.mrb[24].mxu0 }
 0x22a   : > { %3483 = vst [vmem:[%s6763_s13 + $0xa8] sm:$0xff] %v3447_v6  ;;  %v3197_v58 = vmax.f32 %v3161_v63, 0.0  ;;  %v5261_v53 = vadd.f32 %v4917_v41, %v4573_v0  ;;  %v3036_v40 = vpop.f32.mrb[25].mxu0 }
 0x22b   : > { %3482 = vst [vmem:[%s6763_s13 + $0xa0] sm:$0xff] %v3446_v50  ;;  %v3196_v1 = vmax.f32 %v3160_v29, 0.0  ;;  %v5262_v52 = vadd.f32 %v3036_v40, %v1700_v48  ;;  %v4576_v7 = vpop.f32.mrb[26].mxu1  ;;  %v3414_v50 = vpop.permute.xlu1 %3413 }
 0x22c   : > { %v3449_v28 = vmul.f32 %v3364_v37, %v3197_v58  ;;  %v3163_v5 = vadd.f32 %v5261_v53, %v6751_v56  ;;  %v1710_v12 = vpop.f32.mrb[27].mxu1  ;;  %v3399_v11 = vpop.permute.xlu0 %3398 }
 0x22d   : > { %v3448_v39 = vmul.f32 %v3359_v34, %v3196_v1  ;;  %v3162_v55 = vadd.f32 %v5262_v52, %v6751_v56  ;;  %v4920_v38 = vpop.f32.mrb[26].mxu0 }
 0x22e   : > { %3485 = vst [vmem:[%s6763_s13 + $0xb8] sm:$0xff] %v3449_v28  ;;  %v3199_v3 = vmax.f32 %v3163_v5, 0.0  ;;  %v5263_v42 = vadd.f32 %v4920_v38, %v4576_v7  ;;  %v3046_v60 = vpop.f32.mrb[27].mxu0 }
 0x22f   : > { %3484 = vst [vmem:[%s6763_s13 + $0xb0] sm:$0xff] %v3448_v39  ;;  %v3198_v17 = vmax.f32 %v3162_v55, 0.0  ;;  %v5264_v24 = vadd.f32 %v3046_v60, %v1710_v12  ;;  %v4579_v54 = vpop.f32.mrb[28].mxu1 }
 0x230   : > { %v3451_v31 = vmul.f32 %v3374_v47, %v3199_v3  ;;  %v3165_v18 = vadd.f32 %v5263_v42, %v6751_v56  ;;  %v1720_v49 = vpop.f32.mrb[29].mxu1  ;;  %v3409_v1 = vpop.permute.xlu0 %3408 }
 0x231   : > { %v3450_v37 = vmul.f32 %v3369_v20, %v3198_v17  ;;  %v3164_v15 = vadd.f32 %v5264_v24, %v6751_v56  ;;  %v4923_v61 = vpop.f32.mrb[28].mxu0  ;;  %v3424_v42 = vpop.permute.xlu1 %3423 }
 0x232   : > { %3487 = vst [vmem:[%s6763_s13 + $0xc8] sm:$0xff] %v3451_v31  ;;  %v3201_v62 = vmax.f32 %v3165_v18, 0.0  ;;  %v5265_v34 = vadd.f32 %v4923_v61, %v4579_v54  ;;  %v3056_v35 = vpop.f32.mrb[29].mxu0 }
 0x233   : > { %3486 = vst [vmem:[%s6763_s13 + $0xc0] sm:$0xff] %v3450_v37  ;;  %v3200_v43 = vmax.f32 %v3164_v15, 0.0  ;;  %v5266_v46 = vadd.f32 %v3056_v35, %v1720_v49  ;;  %v4582_v57 = vpop.f32.mrb[30].mxu1 }
 0x234   : > { %v3453_v19 = vmul.f32 %v3384_v22, %v3201_v62  ;;  %v3167_v32 = vadd.f32 %v5265_v34, %v6751_v56  ;;  %v1730_v30 = vpop.f32.mrb[31].mxu1  ;;  %v3419_v17 = vpop.permute.xlu0 %3418 }
 0x235   : > { %v3452_v14 = vmul.f32 %v3379_v59, %v3200_v43  ;;  %v3166_v8 = vadd.f32 %v5266_v46, %v6751_v56  ;;  %v4926_v9 = vpop.f32.mrb[30].mxu0 }
 0x236   : > { %3489 = vst [vmem:[%s6763_s13 + $0xd8] sm:$0xff] %v3453_v19  ;;  %v3203_v2 = vmax.f32 %v3167_v32, 0.0  ;;  %v5267_v47 = vadd.f32 %v4926_v9, %v4582_v57  ;;  %v3066_v25 = vpop.f32.mrb[31].mxu0 }
 0x237   : > { %3488 = vst [vmem:[%s6763_s13 + $0xd0] sm:$0xff] %v3452_v14  ;;  %v3202_v33 = vmax.f32 %v3166_v8, 0.0  ;;  %v5268_v44 = vadd.f32 %v3066_v25, %v1730_v30  ;;  %v4585_v27 = vpop.f32.mrb[32].mxu1 }
 0x238   : > { %v3455_v21 = vmul.f32 %v3394_v23, %v3203_v2  ;;  %v3169_v45 = vadd.f32 %v5267_v47, %v6751_v56  ;;  %v1740_v13 = vpop.f32.mrb[33].mxu1 }
 0x239   : > { %v3454_v20 = vmul.f32 %v3389_v10, %v3202_v33  ;;  %v3168_v51 = vadd.f32 %v5268_v44, %v6751_v56  ;;  %v4929_v26 = vpop.f32.mrb[32].mxu0 }
 0x23a   : > { %3491 = vst [vmem:[%s6763_s13 + $0xe8] sm:$0xff] %v3455_v21  ;;  %v3205_v16 = vmax.f32 %v3169_v45, 0.0  ;;  %v5269_v36 = vadd.f32 %v4929_v26, %v4585_v27  ;;  %v3076_v6 = vpop.f32.mrb[33].mxu0 }
 0x23b   : > { %3490 = vst [vmem:[%s6763_s13 + $0xe0] sm:$0xff] %v3454_v20  ;;  %v3204_v63 = vmax.f32 %v3168_v51, 0.0  ;;  %v5270_v0 = vadd.f32 %v3076_v6, %v1740_v13  ;;  %v4588_v48 = vpop.f32.mrb[34].mxu1 }
 0x23c   : > { %v3457_v29 = vmul.f32 %v3404_v4, %v3205_v16  ;;  %v3171_v41 = vadd.f32 %v5269_v36, %v6751_v56  ;;  %v1750_v40 = vpop.f32.mrb[35].mxu1 }
 0x23d   : > { %v3456_v22 = vmul.f32 %v3399_v11, %v3204_v63  ;;  %v3170_v58 = vadd.f32 %v5270_v0, %v6751_v56  ;;  %v4932_v53 = vpop.f32.mrb[34].mxu0 }
 0x23e   : > { %3493 = vst [vmem:[%s6763_s13 + $0xf8] sm:$0xff] %v3457_v29  ;;  %v3207_v52 = vmax.f32 %v3171_v41, 0.0  ;;  %v5271_v59 = vadd.f32 %v4932_v53, %v4588_v48  ;;  %v3086_v28 = vpop.f32.mrb[35].mxu0 }
 0x23f   : > { %3492 = vst [vmem:[%s6763_s13 + $0xf0] sm:$0xff] %v3456_v22  ;;  %v3206_v5 = vmax.f32 %v3170_v58, 0.0  ;;  %v5272_v7 = vadd.f32 %v3086_v28, %v1750_v40 }
 0x240   : > { %v3459_v39 = vmul.f32 %v3414_v50, %v3207_v52  ;;  %v3173_v55 = vadd.f32 %v5271_v59, %v6751_v56 }
 0x241   : > { %v3458_v38 = vmul.f32 %v3409_v1, %v3206_v5  ;;  %v3172_v12 = vadd.f32 %v5272_v7, %v6751_v56 }
 0x242   : > { %3495 = vst [vmem:[%s6763_s13 + $0x108] sm:$0xff] %v3459_v39  ;;  %v3209_v3 = vmax.f32 %v3173_v55, 0.0 }
 0x243   : > { %3494 = vst [vmem:[%s6763_s13 + $0x100] sm:$0xff] %v3458_v38  ;;  %v3208_v60 = vmax.f32 %v3172_v12, 0.0 }
 0x244   : > { %v3461_v24 = vmul.f32 %v3424_v42, %v3209_v3 }
 0x245   : > { %v3460_v23 = vmul.f32 %v3419_v17, %v3208_v60 }
 0x246   : > { %3497 = vst [vmem:[%s6763_s13 + $0x118] sm:$0xff] %v3461_v24 }
 0x247   : > { %3496 = vst [vmem:[%s6763_s13 + $0x110] sm:$0xff] %v3460_v23 }
 0x248 PF: > { %s14_s15 = sadd.s32 1, %s5544_s15  }
 0x249   : > { %p11_p4 = scmp.ge.s32.totalorder %s14_s15, 6  }
 0x24b   :  { %13 = sbr.rel (!%p11_p4) target bundleno = 1 (0x1), region = 74 }

</bundles_post_ra>
